<compile_context>
chip_gen: v5e
topology: v5e:2x2
jax: 0.10.0
libtpu: 0.0.40
codegen_flags: <defaults>
</compile_context>

<pallas_src>
import numpy as np
import jax
import jax.numpy as jnp
from jax.experimental import pallas as pl
from jax.experimental.pallas import tpu as pltpu


# --------------------------------------------------------------------------- host-side constant folding
def _prepare(p, C, K, T, H, W):
    """Build band/selection/shift matrices and fused BN affine vectors (host side)."""
    H2, W2, H4, W4 = H // 2, W // 2, H // 4, W // 4
    L0, L1, L2 = W * C, W2 * K, W4 * K
    R0, R1, R2 = T * (H + 2), T * (H2 + 2), T * (H4 + 2)
    f32 = np.float32

    def fold(name, bias=None):
        bn = p[name]
        s = bn["gamma"] / jnp.sqrt(bn["var"] + 1e-5)
        sh = bn["beta"] - bn["mean"] * s
        if bias is not None:
            sh = sh + bias * s
        return s, sh

    consts = []

    # BN0 (per input channel, tiled over W lanes) + pad-row mask
    s0, b0 = fold("bn0")
    consts.append(jnp.stack([jnp.tile(s0, W), jnp.tile(b0, W)]))          # [2, L0]
    rm0 = np.ones((R0, 1), f32)
    rm0[0::H + 2] = 0.0
    rm0[H + 1::H + 2] = 0.0
    consts.append(jnp.asarray(rm0))                                       # [R0, 1]

    # MaxPool2d(3,2,1) #1: H stride-2 selection + re-padding for the 8x8 stage
    s1p = np.zeros((R1, R0 - 2), f32)
    for t in range(T):
        for h in range(H2):
            s1p[(H2 + 2) * t + 1 + h, (H + 2) * t + 2 * h] = 1.0
    consts.append(jnp.asarray(s1p))                                       # [R1, R0-2]
    shl1 = np.zeros((L0, L0), f32)
    shr1 = np.zeros((L0, L0), f32)
    for w in range(W):
        for c in range(C):
            if w > 0:
                shl1[(w - 1) * C + c, w * C + c] = 1.0
            if w + 1 < W:
                shr1[(w + 1) * C + c, w * C + c] = 1.0
    consts.append(jnp.asarray(shl1))                                      # [L0, L0]
    consts.append(jnp.asarray(shr1))                                      # [L0, L0]

    # Conv2d 1x1 (C->K), pool-1's stride-2 W selection folded in
    e1 = np.zeros((W, W2), f32)
    for w2 in range(W2):
        e1[2 * w2, w2] = 1.0
    m1 = jnp.einsum("io,ck->icok", jnp.asarray(e1), p["w1"].T).reshape(L0, L1)
    consts.append(m1)                                                     # [L0, L1]
    s1, b1 = fold("bn1")
    consts.append(jnp.stack([jnp.tile(s1, W2), jnp.tile(b1, W2)]))        # [2, L1]
    rm1 = np.ones((R1, 1), f32)
    rm1[0::H2 + 2] = 0.0
    rm1[H2 + 1::H2 + 2] = 0.0
    consts.append(jnp.asarray(rm1))                                       # [R1, 1]

    # Conv2d 3x3 (K->K): one banded lane-mixing matrix per kh tap
    e2 = np.zeros((3, W2, W2), f32)
    for d in range(3):
        for wo in range(W2):
            wi = wo + d - 1
            if 0 <= wi < W2:
                e2[d, wi, wo] = 1.0
    m2 = jnp.stack([jnp.einsum("dio,kcd->icok", jnp.asarray(e2),
                               p["w2"][:, :, dh, :]).reshape(L1, L1) for dh in range(3)])
    consts.append(m2)                                                     # [3, L1, L1]
    s2, b2 = fold("bn2")
    consts.append(jnp.stack([jnp.tile(s2, W2), jnp.tile(b2, W2)]))        # [2, L1]
    rm2 = np.ones((R1 - 2, 1), f32)
    for r in range(R1 - 2):
        if r % (H2 + 2) >= H2:
            rm2[r] = 0.0
    consts.append(jnp.asarray(rm2))                                       # [R1-2, 1]

    # MaxPool2d(3,2,1) #2
    s3p = np.zeros((R2, R1 - 3), f32)
    for t in range(T):
        for h in range(H4):
            s3p[(H4 + 2) * t + 1 + h, (H2 + 2) * t + 2 * h] = 1.0
    consts.append(jnp.asarray(s3p))                                       # [R2, R1-3]
    shl2 = np.zeros((L1, L1), f32)
    shr2 = np.zeros((L1, L1), f32)
    for w in range(W2):
        for k in range(K):
            if w > 0:
                shl2[(w - 1) * K + k, w * K + k] = 1.0
            if w + 1 < W2:
                shr2[(w + 1) * K + k, w * K + k] = 1.0
    consts.append(jnp.asarray(shl2))                                      # [L1, L1]
    consts.append(jnp.asarray(shr2))                                      # [L1, L1]

    # Conv2d 3x3 (K->K) on the 4x4 map; pool-2's stride-2 W selection folded in
    e3 = np.zeros((3, W2, W4), f32)
    for d in range(3):
        for wo in range(W4):
            wi = wo + d - 1
            if 0 <= wi < W4:
                e3[d, 2 * wi, wo] = 1.0
    m3 = jnp.stack([jnp.einsum("dgo,kcd->gcok", jnp.asarray(e3),
                               p["w3"][:, :, dh, :]).reshape(L1, L2) for dh in range(3)])
    consts.append(m3)                                                     # [3, L1, L2]
    s3, b3 = fold("bn3")
    consts.append(jnp.stack([jnp.tile(s3, W4), jnp.tile(b3, W4)]))        # [2, L2]

    # AdaptiveMaxPool2d(3): W pair-max shift + per-i row selections + j-lane mask
    shp = np.zeros((L2, L2), f32)
    for j in range(3):
        for k in range(K):
            shp[(j + 1) * K + k, j * K + k] = 1.0
    consts.append(jnp.asarray(shp))                                       # [L2, L2]
    s4 = np.zeros((3, T, R2 - 3), f32)
    for i in range(3):
        for t in range(T):
            s4[i, t, (H4 + 2) * t + i] = 1.0
    consts.append(jnp.asarray(s4))                                        # [3, T, R2-3]
    jm = np.zeros((1, L2), f32)
    jm[0, :3 * K] = 1.0
    consts.append(jnp.asarray(jm))                                        # [1, L2]

    # fc_spatial: Linear(K*9 -> 5) + BN1d(5) (weights permuted to our lane order)
    wfs = p["fc_s_w"].reshape(5, K, 3, 3)            # [p, k, i, j]
    wfs = jnp.transpose(wfs, (2, 3, 1, 0))           # [i, j, k, p]
    wfs = jnp.pad(wfs, ((0, 0), (0, 1), (0, 0), (0, 0)))
    consts.append(wfs.reshape(3 * 4 * K, 5))         # [96, 5]
    sfs, bfs = fold("bn_fc_s", bias=p["fc_s_b"])
    consts.append(jnp.stack([sfs, bfs]))             # [2, 5]

    # temporal branch: T selections, block-diagonal channel mixers, BN affines
    st1 = np.zeros((T // 2, T), f32)
    for t in range(T // 2):
        st1[t, 2 * t] = 1.0
    consts.append(jnp.asarray(st1))                  # [T/2, T]

    diag12 = np.zeros((12, 12), f32)
    for q in range(12):
        if q % 4 != 3:
            diag12[q, q] = 1.0
    diag12 = jnp.asarray(diag12)
    lane96 = jnp.asarray(np.tile(jm[0], 3))          # zero on the padded j=3 lanes

    def tmix(wt):                                    # [K, K, 3] -> [3, 96, 96]
        return jnp.stack([jnp.einsum("pq,ck->pcqk", diag12,
                                     wt[:, :, dt].T).reshape(12 * K, 12 * K)
                          for dt in range(3)])

    def bn_t(name, bias):
        s, sh = fold(name, bias=bias)
        return jnp.stack([jnp.tile(s, 12) * lane96, jnp.tile(sh, 12) * lane96])

    consts.append(tmix(p["wt1"]))                    # [3, 96, 96]
    consts.append(bn_t("bnt1", p["bt1"]))            # [2, 96]
    st2 = np.zeros((2, 4), f32)
    st2[0, 0] = 1.0
    st2[1, 2] = 1.0
    consts.append(jnp.asarray(st2))                  # [2, 4]
    consts.append(tmix(p["wt2"]))                    # [3, 96, 96]
    consts.append(bn_t("bnt2", p["bt2"]))            # [2, 96]
    consts.append(tmix(p["wt3"])[1])                 # [96, 96] (T=1: only centre tap hits data)
    consts.append(bn_t("bnt3", p["bt3"]))            # [2, 96]

    # fc_temporal: AdaptiveAvgPool3d T 1->3 replication pre-summed into the weights
    wft = p["fc_t_w"].reshape(3, K, 3, 3, 3).sum(axis=2)     # [p, k, i, j]
    wft = jnp.transpose(wft, (2, 3, 1, 0))
    wft = jnp.pad(wft, ((0, 0), (0, 1), (0, 0), (0, 0)))
    consts.append(wft.reshape(3 * 4 * K, 3))         # [96, 3]
    sft, bft = fold("bn_fc_t", bias=p["fc_t_b"])
    consts.append(jnp.stack([sft, bft]))             # [2, 3]
    return consts


# --------------------------------------------------------------------------- fused kernel
def _make_kernel(T, H, W, C, K):
    H2, H4 = H // 2, H // 4
    R0, R1, R2 = T * (H + 2), T * (H2 + 2), T * (H4 + 2)
    L1 = (W // 2) * K

    def kernel(x_ref, bn0, rm0, s1p, shl1, shr1, m1, bn1, rm1, m2, bn2, rm2,
               s3p, shl2, shr2, m3, bn3, shp, s4, jm, wfs, bnfs,
               st1, mt1, bnt1, st2, mt2, bnt2, mt3, bnt3, wft, bnft,
               sp_out, tp_out,
               sa, sa2, sy2, sz3, sy3, sf, t0, t1, t2):
        f32 = jnp.float32

        def mm(a, b):
            return jnp.dot(a, b, preferred_element_type=f32)

        def aff_relu(y, bnref):
            return jnp.maximum(y * bnref[0:1, :] + bnref[1:2, :], 0.0)

        # --- BN0 + ReLU on the H-padded channels-last layout; re-zero pad rows -------
        sa[...] = jnp.maximum(x_ref[0] * bn0[0:1, :] + bn0[1:2, :], 0.0) * rm0[...]

        # --- MaxPool2d(3,2,1): 16x16 -> 8x8 -------------------------------------------
        yh = jnp.maximum(jnp.maximum(sa[pl.ds(0, R0 - 2), :], sa[pl.ds(1, R0 - 2), :]),
                         sa[pl.ds(2, R0 - 2), :])
        zh = mm(s1p[...], yh)                                   # H select + re-pad
        zw = jnp.maximum(jnp.maximum(zh, mm(zh, shl1[...])), mm(zh, shr1[...]))
        # --- Conv2d 1x1 (+ stride-2 W compaction) + BN1 + ReLU ------------------------
        sa2[...] = aff_relu(mm(zw, m1[...]), bn1) * rm1[...]

        # --- Conv2d 3x3 + BN2 + ReLU (3 row-shifted banded matmuls) -------------------
        y2 = mm(sa2[pl.ds(0, R1 - 2), :], m2[0])
        y2 = y2 + mm(sa2[pl.ds(1, R1 - 2), :], m2[1])
        y2 = y2 + mm(sa2[pl.ds(2, R1 - 2), :], m2[2])
        y2 = aff_relu(y2, bn2) * rm2[...]
        sy2[...] = jnp.zeros((R1 - 1, L1), f32)
        sy2[pl.ds(1, R1 - 2), :] = y2

        # --- MaxPool2d(3,2,1): 8x8 -> 4x4 ----------------------------------------------
        qh = jnp.maximum(jnp.maximum(sy2[pl.ds(0, R1 - 3), :], sy2[pl.ds(1, R1 - 3), :]),
                         sy2[pl.ds(2, R1 - 3), :])
        z2 = mm(s3p[...], qh)
        z2 = jnp.maximum(jnp.maximum(z2, mm(z2, shl2[...])), mm(z2, shr2[...]))
        sz3[...] = z2

        # --- Conv2d 3x3 + BN3 + ReLU (pool-2 W compaction folded into m3) -------------
        y3 = mm(sz3[pl.ds(0, R2 - 2), :], m3[0])
        y3 = y3 + mm(sz3[pl.ds(1, R2 - 2), :], m3[1])
        y3 = y3 + mm(sz3[pl.ds(2, R2 - 2), :], m3[2])
        sy3[...] = aff_relu(y3, bn3)

        # --- AdaptiveMaxPool2d(3): 4x4 -> 3x3 (2x2 windows, stride 1) ------------------
        qa = jnp.maximum(sy3[pl.ds(0, R2 - 3), :], sy3[pl.ds(1, R2 - 3), :])
        qa = jnp.maximum(qa, mm(qa, shp[...]))
        for i in range(3):
            sf[:, pl.ds(32 * i, 32)] = mm(s4[i], qa) * jm[...]
        feat = sf[...]                                          # [T, 96] per-frame features

        # --- fc_spatial: Linear(K*9 -> 5) + BatchNorm1d(5) (eval) ----------------------
        sp_out[0] = mm(feat, wfs[...]) * bnfs[0:1, :] + bnfs[1:2, :]

        # ------------------------------ temporal branch --------------------------------
        # MaxPool3d((3,1,1),(2,1,1),(1,0,0)): T -> T/2
        t0[...] = jnp.zeros((T + 2, 12 * K), f32)
        t0[pl.ds(1, T), :] = feat
        yt = jnp.maximum(jnp.maximum(t0[pl.ds(0, T), :], t0[pl.ds(1, T), :]),
                         t0[pl.ds(2, T), :])
        v1 = mm(st1[...], yt)                                   # [T/2, 96]
        # Conv3d((3,1,1),(2,1,1),(1,0,0)) + BN + ReLU: T/2 -> T/4
        t1[...] = jnp.zeros((T // 2 + 2, 12 * K), f32)
        t1[pl.ds(1, T // 2), :] = v1
        yc1 = mm(t1[pl.ds(0, T // 2), :], mt1[0])
        yc1 = yc1 + mm(t1[pl.ds(1, T // 2), :], mt1[1])
        yc1 = yc1 + mm(t1[pl.ds(2, T // 2), :], mt1[2])
        v2 = aff_relu(mm(st2[...], yc1), bnt1)                  # [T/4, 96]
        # Conv3d + BN + ReLU: T/4 -> 1 (only the single valid output centre)
        t2[...] = jnp.zeros((T // 4 + 2, 12 * K), f32)
        t2[pl.ds(1, T // 4), :] = v2
        yc2 = mm(t2[pl.ds(0, 1), :], mt2[0])
        yc2 = yc2 + mm(t2[pl.ds(1, 1), :], mt2[1])
        yc2 = yc2 + mm(t2[pl.ds(2, 1), :], mt2[2])
        v3 = aff_relu(yc2, bnt2)                                # [1, 96]
        # MaxPool3d on T=1 is the identity (zero pads, data >= 0)
        # Conv3d on T=1: only the centre tap touches data; + BN + ReLU
        v5 = aff_relu(mm(v3, mt3[...]), bnt3)                   # [1, 96]
        # AdaptiveAvgPool3d((3,3,3)): T 1->3 replication folded into wft (pre-summed)
        tp_out[0] = mm(v5, wft[...]) * bnft[0:1, :] + bnft[1:2, :]

    return kernel


# --------------------------------------------------------------------------- forward
def localization_st_forward(x, params):
    N, C, T, H, W = x.shape
    K = params["w1"].shape[0]
    assert H == 16 and W == 16 and T == 8, "kernel specialized to the reference sizes"

    consts = _prepare(params, C, K, T, H, W)

    # channels-last, per-frame H zero-padding, (W, C) packed on the lane axis
    xr = jnp.transpose(x, (0, 2, 3, 4, 1)).reshape(N, T, H, W * C)
    xr = jnp.pad(xr, ((0, 0), (0, 0), (1, 1), (0, 0))).reshape(N, T * (H + 2), W * C)

    R0, L0 = T * (H + 2), W * C
    R1, L1 = T * (H // 2 + 2), (W // 2) * K
    R2, L2 = T * (H // 4 + 2), (W // 4) * K
    kernel = _make_kernel(T, H, W, C, K)

    def const_spec(a):
        return pl.BlockSpec(a.shape, lambda n, nd=a.ndim: (0,) * nd)

    grid_spec = pltpu.PrefetchScalarGridSpec(
        num_scalar_prefetch=0,
        grid=(N,),
        in_specs=[pl.BlockSpec((1, R0, L0), lambda n: (n, 0, 0))]
                 + [const_spec(c) for c in consts],
        out_specs=[pl.BlockSpec((1, T, 5), lambda n: (n, 0, 0)),
                   pl.BlockSpec((1, 1, 3), lambda n: (n, 0, 0))],
        scratch_shapes=[
            pltpu.VMEM((R0, L0), jnp.float32),        # sa
            pltpu.VMEM((R1, L1), jnp.float32),        # sa2
            pltpu.VMEM((R1 - 1, L1), jnp.float32),    # sy2
            pltpu.VMEM((R2, L1), jnp.float32),        # sz3
            pltpu.VMEM((R2 - 2, L2), jnp.float32),    # sy3
            pltpu.VMEM((T, 12 * K), jnp.float32),     # sf (features)
            pltpu.VMEM((T + 2, 12 * K), jnp.float32),       # t0
            pltpu.VMEM((T // 2 + 2, 12 * K), jnp.float32),  # t1
            pltpu.VMEM((T // 4 + 2, 12 * K), jnp.float32),  # t2
        ],
    )

    sp, tp = pl.pallas_call(
        kernel,
        out_shape=(jax.ShapeDtypeStruct((N, T, 5), jnp.float32),
                   jax.ShapeDtypeStruct((N, 1, 3), jnp.float32)),
        grid_spec=grid_spec,
        compiler_params=pltpu.CompilerParams(dimension_semantics=("parallel",)),
    )(xr, *consts)

    dx, dy, sigma, delta, gamma = (sp[..., i] for i in range(5))
    tpf = tp[:, 0, :]
    dt, delta_t, gamma_t = (tpf[:, i] for i in range(3))
    return dx, dy, sigma, delta, gamma, dt, delta_t, gamma_t


# --------------------------------------------------------------------------- parameters
def init_params(key, C, K):
    ks = iter(jax.random.split(key, 64))

    def nrm(shape, scale=0.1):
        return jax.random.normal(next(ks), shape, jnp.float32) * scale

    def bn(c):
        return dict(gamma=jax.random.uniform(next(ks), (c,), jnp.float32, 0.5, 1.5),
                    beta=nrm((c,)), mean=nrm((c,)),
                    var=jax.random.uniform(next(ks), (c,), jnp.float32, 0.5, 1.5))

    p = {}
    p["bn0"] = bn(C)
    p["w1"] = nrm((K, C))                   # Conv2d 1x1 (bias=False)
    p["bn1"] = bn(K)
    p["w2"] = nrm((K, K, 3, 3))             # Conv2d 3x3 (bias=False)
    p["bn2"] = bn(K)
    p["w3"] = nrm((K, K, 3, 3))             # Conv2d 3x3 (bias=False)
    p["bn3"] = bn(K)
    p["fc_s_w"] = nrm((5, K * 9))
    p["fc_s_b"] = nrm((5,))
    p["bn_fc_s"] = bn(5)
    p["wt1"] = nrm((K, K, 3)); p["bt1"] = nrm((K,)); p["bnt1"] = bn(K)   # Conv3d (3,1,1)
    p["wt2"] = nrm((K, K, 3)); p["bt2"] = nrm((K,)); p["bnt2"] = bn(K)
    p["wt3"] = nrm((K, K, 3)); p["bt3"] = nrm((K,)); p["bnt3"] = bn(K)
    p["fc_t_w"] = nrm((3, K * 27))
    p["fc_t_b"] = nrm((3,))
    p["bn_fc_t"] = bn(3)
    return p


# --------------------------------------------------------------------------- main
if __name__ == "__main__":
    N, C, T, H, W = 2, 4, 8, 16, 16
    out_channels = 8

    key = jax.random.PRNGKey(0)
    kx, kp = jax.random.split(key)
    x = jax.random.normal(kx, (N, C, T, H, W), jnp.float32)
    params = init_params(kp, C, out_channels)

    fwd = jax.jit(localization_st_forward)
    outs = fwd(x, params)
    outs = jax.block_until_ready(outs)

    dx, dy, sigma, delta, gamma, dt, delta_t, gamma_t = outs
    assert dx.shape == (N, T) and gamma.shape == (N, T)
    assert dt.shape == (N,) and gamma_t.shape == (N,)
    assert all(bool(jnp.all(jnp.isfinite(o))) for o in outs)
    print("KERNEL_OK")
</pallas_src>

<mosaic_0001>
module attributes {stable_mosaic.version = 11 : i64} {
  func.func @kernel(%arg0: i32, %arg1: memref<1x144x64xf32, #tpu.memory_space<vmem>>, %arg2: memref<2x64xf32, #tpu.memory_space<vmem>>, %arg3: memref<144x1xf32, #tpu.memory_space<vmem>>, %arg4: memref<80x142xf32, #tpu.memory_space<vmem>>, %arg5: memref<64x64xf32, #tpu.memory_space<vmem>>, %arg6: memref<64x64xf32, #tpu.memory_space<vmem>>, %arg7: memref<64x64xf32, #tpu.memory_space<vmem>>, %arg8: memref<2x64xf32, #tpu.memory_space<vmem>>, %arg9: memref<80x1xf32, #tpu.memory_space<vmem>>, %arg10: memref<3x64x64xf32, #tpu.memory_space<vmem>>, %arg11: memref<2x64xf32, #tpu.memory_space<vmem>>, %arg12: memref<78x1xf32, #tpu.memory_space<vmem>>, %arg13: memref<48x77xf32, #tpu.memory_space<vmem>>, %arg14: memref<64x64xf32, #tpu.memory_space<vmem>>, %arg15: memref<64x64xf32, #tpu.memory_space<vmem>>, %arg16: memref<3x64x32xf32, #tpu.memory_space<vmem>>, %arg17: memref<2x32xf32, #tpu.memory_space<vmem>>, %arg18: memref<32x32xf32, #tpu.memory_space<vmem>>, %arg19: memref<3x8x45xf32, #tpu.memory_space<vmem>>, %arg20: memref<1x32xf32, #tpu.memory_space<vmem>>, %arg21: memref<96x5xf32, #tpu.memory_space<vmem>>, %arg22: memref<2x5xf32, #tpu.memory_space<vmem>>, %arg23: memref<4x8xf32, #tpu.memory_space<vmem>>, %arg24: memref<3x96x96xf32, #tpu.memory_space<vmem>>, %arg25: memref<2x96xf32, #tpu.memory_space<vmem>>, %arg26: memref<2x4xf32, #tpu.memory_space<vmem>>, %arg27: memref<3x96x96xf32, #tpu.memory_space<vmem>>, %arg28: memref<2x96xf32, #tpu.memory_space<vmem>>, %arg29: memref<96x96xf32, #tpu.memory_space<vmem>>, %arg30: memref<2x96xf32, #tpu.memory_space<vmem>>, %arg31: memref<96x3xf32, #tpu.memory_space<vmem>>, %arg32: memref<2x3xf32, #tpu.memory_space<vmem>>, %arg33: memref<1x8x5xf32, #tpu.memory_space<vmem>>, %arg34: memref<1x1x3xf32, #tpu.memory_space<vmem>>, %arg35: memref<144x64xf32, #tpu.memory_space<vmem>>, %arg36: memref<80x64xf32, #tpu.memory_space<vmem>>, %arg37: memref<79x64xf32, #tpu.memory_space<vmem>>, %arg38: memref<48x64xf32, #tpu.memory_space<vmem>>, %arg39: memref<46x32xf32, #tpu.memory_space<vmem>>, %arg40: memref<8x96xf32, #tpu.memory_space<vmem>>, %arg41: memref<10x96xf32, #tpu.memory_space<vmem>>, %arg42: memref<6x96xf32, #tpu.memory_space<vmem>>, %arg43: memref<4x96xf32, #tpu.memory_space<vmem>>) attributes {dimension_semantics = [#tpu.dimension_semantics<parallel>], iteration_bounds = array<i64: 2>, scalar_prefetch = 0 : i64, scratch_operands = 9 : i64, tpu.core_type = #tpu.core_type<tc>, window_params = [{transform_indices = @transform_0, window_bounds = array<i64: 1, 144, 64>}, {pipeline_mode = #tpu.pipeline_mode<synchronous>, transform_indices = @transform_1, window_bounds = array<i64: 2, 64>}, {pipeline_mode = #tpu.pipeline_mode<synchronous>, transform_indices = @transform_2, window_bounds = array<i64: 144, 1>}, {pipeline_mode = #tpu.pipeline_mode<synchronous>, transform_indices = @transform_3, window_bounds = array<i64: 80, 142>}, {pipeline_mode = #tpu.pipeline_mode<synchronous>, transform_indices = @transform_4, window_bounds = array<i64: 64, 64>}, {pipeline_mode = #tpu.pipeline_mode<synchronous>, transform_indices = @transform_5, window_bounds = array<i64: 64, 64>}, {pipeline_mode = #tpu.pipeline_mode<synchronous>, transform_indices = @transform_6, window_bounds = array<i64: 64, 64>}, {pipeline_mode = #tpu.pipeline_mode<synchronous>, transform_indices = @transform_7, window_bounds = array<i64: 2, 64>}, {pipeline_mode = #tpu.pipeline_mode<synchronous>, transform_indices = @transform_8, window_bounds = array<i64: 80, 1>}, {pipeline_mode = #tpu.pipeline_mode<synchronous>, transform_indices = @transform_9, window_bounds = array<i64: 3, 64, 64>}, {pipeline_mode = #tpu.pipeline_mode<synchronous>, transform_indices = @transform_10, window_bounds = array<i64: 2, 64>}, {pipeline_mode = #tpu.pipeline_mode<synchronous>, transform_indices = @transform_11, window_bounds = array<i64: 78, 1>}, {pipeline_mode = #tpu.pipeline_mode<synchronous>, transform_indices = @transform_12, window_bounds = array<i64: 48, 77>}, {pipeline_mode = #tpu.pipeline_mode<synchronous>, transform_indices = @transform_13, window_bounds = array<i64: 64, 64>}, {pipeline_mode = #tpu.pipeline_mode<synchronous>, transform_indices = @transform_14, window_bounds = array<i64: 64, 64>}, {pipeline_mode = #tpu.pipeline_mode<synchronous>, transform_indices = @transform_15, window_bounds = array<i64: 3, 64, 32>}, {pipeline_mode = #tpu.pipeline_mode<synchronous>, transform_indices = @transform_16, window_bounds = array<i64: 2, 32>}, {pipeline_mode = #tpu.pipeline_mode<synchronous>, transform_indices = @transform_17, window_bounds = array<i64: 32, 32>}, {pipeline_mode = #tpu.pipeline_mode<synchronous>, transform_indices = @transform_18, window_bounds = array<i64: 3, 8, 45>}, {pipeline_mode = #tpu.pipeline_mode<synchronous>, transform_indices = @transform_19, window_bounds = array<i64: 1, 32>}, {pipeline_mode = #tpu.pipeline_mode<synchronous>, transform_indices = @transform_20, window_bounds = array<i64: 96, 5>}, {pipeline_mode = #tpu.pipeline_mode<synchronous>, transform_indices = @transform_21, window_bounds = array<i64: 2, 5>}, {pipeline_mode = #tpu.pipeline_mode<synchronous>, transform_indices = @transform_22, window_bounds = array<i64: 4, 8>}, {pipeline_mode = #tpu.pipeline_mode<synchronous>, transform_indices = @transform_23, window_bounds = array<i64: 3, 96, 96>}, {pipeline_mode = #tpu.pipeline_mode<synchronous>, transform_indices = @transform_24, window_bounds = array<i64: 2, 96>}, {pipeline_mode = #tpu.pipeline_mode<synchronous>, transform_indices = @transform_25, window_bounds = array<i64: 2, 4>}, {pipeline_mode = #tpu.pipeline_mode<synchronous>, transform_indices = @transform_26, window_bounds = array<i64: 3, 96, 96>}, {pipeline_mode = #tpu.pipeline_mode<synchronous>, transform_indices = @transform_27, window_bounds = array<i64: 2, 96>}, {pipeline_mode = #tpu.pipeline_mode<synchronous>, transform_indices = @transform_28, window_bounds = array<i64: 96, 96>}, {pipeline_mode = #tpu.pipeline_mode<synchronous>, transform_indices = @transform_29, window_bounds = array<i64: 2, 96>}, {pipeline_mode = #tpu.pipeline_mode<synchronous>, transform_indices = @transform_30, window_bounds = array<i64: 96, 3>}, {pipeline_mode = #tpu.pipeline_mode<synchronous>, transform_indices = @transform_31, window_bounds = array<i64: 2, 3>}, {transform_indices = @transform_32, window_bounds = array<i64: 1, 8, 5>}, {transform_indices = @transform_33, window_bounds = array<i64: 1, 1, 3>}]} {
    %c0 = arith.constant 0 : index
    %c0_0 = arith.constant 0 : index
    %c0_1 = arith.constant 0 : index
    %0 = vector.load %arg1[%c0, %c0_0, %c0_1] : memref<1x144x64xf32, #tpu.memory_space<vmem>>, vector<1x144x64xf32>
    %1 = vector.shape_cast %0 : vector<1x144x64xf32> to vector<144x64xf32>
    %c0_2 = arith.constant 0 : index
    %c0_3 = arith.constant 0 : index
    %2 = vector.load %arg2[%c0_2, %c0_3] : memref<2x64xf32, #tpu.memory_space<vmem>>, vector<1x64xf32>
    %3 = vector.broadcast %2 : vector<1x64xf32> to vector<144x64xf32>
    %4 = arith.mulf %1, %3 : vector<144x64xf32>
    %c1 = arith.constant 1 : index
    %c0_4 = arith.constant 0 : index
    %5 = vector.load %arg2[%c1, %c0_4] : memref<2x64xf32, #tpu.memory_space<vmem>>, vector<1x64xf32>
    %6 = vector.broadcast %5 : vector<1x64xf32> to vector<144x64xf32>
    %7 = arith.addf %4, %6 : vector<144x64xf32>
    %cst = arith.constant 0.000000e+00 : f32
    %8 = vector.broadcast %cst : f32 to vector<144x64xf32>
    %9 = arith.maximumf %7, %8 : vector<144x64xf32>
    %c0_5 = arith.constant 0 : index
    %c0_6 = arith.constant 0 : index
    %10 = vector.load %arg3[%c0_5, %c0_6] : memref<144x1xf32, #tpu.memory_space<vmem>>, vector<144x1xf32>
    %11 = vector.broadcast %10 : vector<144x1xf32> to vector<144x64xf32>
    %12 = arith.mulf %9, %11 : vector<144x64xf32>
    %c0_7 = arith.constant 0 : index
    %c0_8 = arith.constant 0 : index
    %13 = vector.load %arg35[%c0_7, %c0_8] : memref<144x64xf32, #tpu.memory_space<vmem>>, vector<144x64xf32>
    tpu.vector_store %arg35[%c0_7, %c0_8], %12 {strides = array<i32>} : memref<144x64xf32, #tpu.memory_space<vmem>>, vector<144x64xf32>,
    %c0_9 = arith.constant 0 : index
    %c0_10 = arith.constant 0 : index
    %14 = vector.load %arg35[%c0_9, %c0_10] : memref<144x64xf32, #tpu.memory_space<vmem>>, vector<142x64xf32>
    %c1_11 = arith.constant 1 : index
    %c0_12 = arith.constant 0 : index
    %15 = vector.load %arg35[%c1_11, %c0_12] : memref<144x64xf32, #tpu.memory_space<vmem>>, vector<142x64xf32>
    %16 = arith.maximumf %14, %15 : vector<142x64xf32>
    %c2 = arith.constant 2 : index
    %c0_13 = arith.constant 0 : index
    %17 = vector.load %arg35[%c2, %c0_13] : memref<144x64xf32, #tpu.memory_space<vmem>>, vector<142x64xf32>
    %18 = arith.maximumf %16, %17 : vector<142x64xf32>
    %c0_14 = arith.constant 0 : index
    %c0_15 = arith.constant 0 : index
    %19 = vector.load %arg4[%c0_14, %c0_15] : memref<80x142xf32, #tpu.memory_space<vmem>>, vector<80x142xf32>
    %cst_16 = arith.constant dense<0.000000e+00> : vector<80x64xf32>
    %20 = tpu.matmul %19, %18, %cst_16 {dimension_numbers = #tpu.dot_dimension_numbers<[1], [0], [0], [1], [0, 0, 1, 1], [], []>} : vector<80x142xf32>, vector<142x64xf32>, vector<80x64xf32> -> vector<80x64xf32>
    %c0_17 = arith.constant 0 : index
    %c0_18 = arith.constant 0 : index
    %21 = vector.load %arg5[%c0_17, %c0_18] : memref<64x64xf32, #tpu.memory_space<vmem>>, vector<64x64xf32>
    %cst_19 = arith.constant dense<0.000000e+00> : vector<80x64xf32>
    %22 = tpu.matmul %20, %21, %cst_19 {dimension_numbers = #tpu.dot_dimension_numbers<[1], [0], [0], [1], [0, 0, 1, 1], [], []>} : vector<80x64xf32>, vector<64x64xf32>, vector<80x64xf32> -> vector<80x64xf32>
    %23 = arith.maximumf %20, %22 : vector<80x64xf32>
    %c0_20 = arith.constant 0 : index
    %c0_21 = arith.constant 0 : index
    %24 = vector.load %arg6[%c0_20, %c0_21] : memref<64x64xf32, #tpu.memory_space<vmem>>, vector<64x64xf32>
    %cst_22 = arith.constant dense<0.000000e+00> : vector<80x64xf32>
    %25 = tpu.matmul %20, %24, %cst_22 {dimension_numbers = #tpu.dot_dimension_numbers<[1], [0], [0], [1], [0, 0, 1, 1], [], []>} : vector<80x64xf32>, vector<64x64xf32>, vector<80x64xf32> -> vector<80x64xf32>
    %26 = arith.maximumf %23, %25 : vector<80x64xf32>
    %c0_23 = arith.constant 0 : index
    %c0_24 = arith.constant 0 : index
    %27 = vector.load %arg7[%c0_23, %c0_24] : memref<64x64xf32, #tpu.memory_space<vmem>>, vector<64x64xf32>
    %cst_25 = arith.constant dense<0.000000e+00> : vector<80x64xf32>
    %28 = tpu.matmul %26, %27, %cst_25 {dimension_numbers = #tpu.dot_dimension_numbers<[1], [0], [0], [1], [0, 0, 1, 1], [], []>} : vector<80x64xf32>, vector<64x64xf32>, vector<80x64xf32> -> vector<80x64xf32>
    %c0_26 = arith.constant 0 : index
    %c0_27 = arith.constant 0 : index
    %29 = vector.load %arg8[%c0_26, %c0_27] : memref<2x64xf32, #tpu.memory_space<vmem>>, vector<1x64xf32>
    %30 = vector.broadcast %29 : vector<1x64xf32> to vector<80x64xf32>
    %31 = arith.mulf %28, %30 : vector<80x64xf32>
    %c1_28 = arith.constant 1 : index
    %c0_29 = arith.constant 0 : index
    %32 = vector.load %arg8[%c1_28, %c0_29] : memref<2x64xf32, #tpu.memory_space<vmem>>, vector<1x64xf32>
    %33 = vector.broadcast %32 : vector<1x64xf32> to vector<80x64xf32>
    %34 = arith.addf %31, %33 : vector<80x64xf32>
    %cst_30 = arith.constant 0.000000e+00 : f32
    %35 = vector.broadcast %cst_30 : f32 to vector<80x64xf32>
    %36 = arith.maximumf %34, %35 : vector<80x64xf32>
    %c0_31 = arith.constant 0 : index
    %c0_32 = arith.constant 0 : index
    %37 = vector.load %arg9[%c0_31, %c0_32] : memref<80x1xf32, #tpu.memory_space<vmem>>, vector<80x1xf32>
    %38 = vector.broadcast %37 : vector<80x1xf32> to vector<80x64xf32>
    %39 = arith.mulf %36, %38 : vector<80x64xf32>
    %c0_33 = arith.constant 0 : index
    %c0_34 = arith.constant 0 : index
    %40 = vector.load %arg36[%c0_33, %c0_34] : memref<80x64xf32, #tpu.memory_space<vmem>>, vector<80x64xf32>
    tpu.vector_store %arg36[%c0_33, %c0_34], %39 {strides = array<i32>} : memref<80x64xf32, #tpu.memory_space<vmem>>, vector<80x64xf32>,
    %c0_35 = arith.constant 0 : index
    %c0_36 = arith.constant 0 : index
    %41 = vector.load %arg36[%c0_35, %c0_36] : memref<80x64xf32, #tpu.memory_space<vmem>>, vector<78x64xf32>
    %c0_37 = arith.constant 0 : index
    %c0_38 = arith.constant 0 : index
    %c0_39 = arith.constant 0 : index
    %42 = vector.load %arg10[%c0_37, %c0_38, %c0_39] : memref<3x64x64xf32, #tpu.memory_space<vmem>>, vector<1x64x64xf32>
    %43 = vector.shape_cast %42 : vector<1x64x64xf32> to vector<64x64xf32>
    %cst_40 = arith.constant dense<0.000000e+00> : vector<78x64xf32>
    %44 = tpu.matmul %41, %43, %cst_40 {dimension_numbers = #tpu.dot_dimension_numbers<[1], [0], [0], [1], [0, 0, 1, 1], [], []>} : vector<78x64xf32>, vector<64x64xf32>, vector<78x64xf32> -> vector<78x64xf32>
    %c1_41 = arith.constant 1 : index
    %c0_42 = arith.constant 0 : index
    %45 = vector.load %arg36[%c1_41, %c0_42] : memref<80x64xf32, #tpu.memory_space<vmem>>, vector<78x64xf32>
    %c1_43 = arith.constant 1 : index
    %c0_44 = arith.constant 0 : index
    %c0_45 = arith.constant 0 : index
    %46 = vector.load %arg10[%c1_43, %c0_44, %c0_45] : memref<3x64x64xf32, #tpu.memory_space<vmem>>, vector<1x64x64xf32>
    %47 = vector.shape_cast %46 : vector<1x64x64xf32> to vector<64x64xf32>
    %cst_46 = arith.constant dense<0.000000e+00> : vector<78x64xf32>
    %48 = tpu.matmul %45, %47, %cst_46 {dimension_numbers = #tpu.dot_dimension_numbers<[1], [0], [0], [1], [0, 0, 1, 1], [], []>} : vector<78x64xf32>, vector<64x64xf32>, vector<78x64xf32> -> vector<78x64xf32>
    %49 = arith.addf %44, %48 : vector<78x64xf32>
    %c2_47 = arith.constant 2 : index
    %c0_48 = arith.constant 0 : index
    %50 = vector.load %arg36[%c2_47, %c0_48] : memref<80x64xf32, #tpu.memory_space<vmem>>, vector<78x64xf32>
    %c2_49 = arith.constant 2 : index
    %c0_50 = arith.constant 0 : index
    %c0_51 = arith.constant 0 : index
    %51 = vector.load %arg10[%c2_49, %c0_50, %c0_51] : memref<3x64x64xf32, #tpu.memory_space<vmem>>, vector<1x64x64xf32>
    %52 = vector.shape_cast %51 : vector<1x64x64xf32> to vector<64x64xf32>
    %cst_52 = arith.constant dense<0.000000e+00> : vector<78x64xf32>
    %53 = tpu.matmul %50, %52, %cst_52 {dimension_numbers = #tpu.dot_dimension_numbers<[1], [0], [0], [1], [0, 0, 1, 1], [], []>} : vector<78x64xf32>, vector<64x64xf32>, vector<78x64xf32> -> vector<78x64xf32>
    %54 = arith.addf %49, %53 : vector<78x64xf32>
    %c0_53 = arith.constant 0 : index
    %c0_54 = arith.constant 0 : index
    %55 = vector.load %arg11[%c0_53, %c0_54] : memref<2x64xf32, #tpu.memory_space<vmem>>, vector<1x64xf32>
    %56 = vector.broadcast %55 : vector<1x64xf32> to vector<78x64xf32>
    %57 = arith.mulf %54, %56 : vector<78x64xf32>
    %c1_55 = arith.constant 1 : index
    %c0_56 = arith.constant 0 : index
    %58 = vector.load %arg11[%c1_55, %c0_56] : memref<2x64xf32, #tpu.memory_space<vmem>>, vector<1x64xf32>
    %59 = vector.broadcast %58 : vector<1x64xf32> to vector<78x64xf32>
    %60 = arith.addf %57, %59 : vector<78x64xf32>
    %cst_57 = arith.constant 0.000000e+00 : f32
    %61 = vector.broadcast %cst_57 : f32 to vector<78x64xf32>
    %62 = arith.maximumf %60, %61 : vector<78x64xf32>
    %c0_58 = arith.constant 0 : index
    %c0_59 = arith.constant 0 : index
    %63 = vector.load %arg12[%c0_58, %c0_59] : memref<78x1xf32, #tpu.memory_space<vmem>>, vector<78x1xf32>
    %64 = vector.broadcast %63 : vector<78x1xf32> to vector<78x64xf32>
    %65 = arith.mulf %62, %64 : vector<78x64xf32>
    %cst_60 = arith.constant 0.000000e+00 : f32
    %66 = vector.broadcast %cst_60 : f32 to vector<79x64xf32>
    %c0_61 = arith.constant 0 : index
    %c0_62 = arith.constant 0 : index
    %67 = vector.load %arg37[%c0_61, %c0_62] : memref<79x64xf32, #tpu.memory_space<vmem>>, vector<79x64xf32>
    tpu.vector_store %arg37[%c0_61, %c0_62], %66 {strides = array<i32>} : memref<79x64xf32, #tpu.memory_space<vmem>>, vector<79x64xf32>,
    %c1_63 = arith.constant 1 : index
    %c0_64 = arith.constant 0 : index
    %68 = vector.load %arg37[%c1_63, %c0_64] : memref<79x64xf32, #tpu.memory_space<vmem>>, vector<78x64xf32>
    tpu.vector_store %arg37[%c1_63, %c0_64], %65 {strides = array<i32>} : memref<79x64xf32, #tpu.memory_space<vmem>>, vector<78x64xf32>,
    %c0_65 = arith.constant 0 : index
    %c0_66 = arith.constant 0 : index
    %69 = vector.load %arg37[%c0_65, %c0_66] : memref<79x64xf32, #tpu.memory_space<vmem>>, vector<77x64xf32>
    %c1_67 = arith.constant 1 : index
    %c0_68 = arith.constant 0 : index
    %70 = vector.load %arg37[%c1_67, %c0_68] : memref<79x64xf32, #tpu.memory_space<vmem>>, vector<77x64xf32>
    %71 = arith.maximumf %69, %70 : vector<77x64xf32>
    %c2_69 = arith.constant 2 : index
    %c0_70 = arith.constant 0 : index
    %72 = vector.load %arg37[%c2_69, %c0_70] : memref<79x64xf32, #tpu.memory_space<vmem>>, vector<77x64xf32>
    %73 = arith.maximumf %71, %72 : vector<77x64xf32>
    %c0_71 = arith.constant 0 : index
    %c0_72 = arith.constant 0 : index
    %74 = vector.load %arg13[%c0_71, %c0_72] : memref<48x77xf32, #tpu.memory_space<vmem>>, vector<48x77xf32>
    %cst_73 = arith.constant dense<0.000000e+00> : vector<48x64xf32>
    %75 = tpu.matmul %74, %73, %cst_73 {dimension_numbers = #tpu.dot_dimension_numbers<[1], [0], [0], [1], [0, 0, 1, 1], [], []>} : vector<48x77xf32>, vector<77x64xf32>, vector<48x64xf32> -> vector<48x64xf32>
    %c0_74 = arith.constant 0 : index
    %c0_75 = arith.constant 0 : index
    %76 = vector.load %arg14[%c0_74, %c0_75] : memref<64x64xf32, #tpu.memory_space<vmem>>, vector<64x64xf32>
    %cst_76 = arith.constant dense<0.000000e+00> : vector<48x64xf32>
    %77 = tpu.matmul %75, %76, %cst_76 {dimension_numbers = #tpu.dot_dimension_numbers<[1], [0], [0], [1], [0, 0, 1, 1], [], []>} : vector<48x64xf32>, vector<64x64xf32>, vector<48x64xf32> -> vector<48x64xf32>
    %78 = arith.maximumf %75, %77 : vector<48x64xf32>
    %c0_77 = arith.constant 0 : index
    %c0_78 = arith.constant 0 : index
    %79 = vector.load %arg15[%c0_77, %c0_78] : memref<64x64xf32, #tpu.memory_space<vmem>>, vector<64x64xf32>
    %cst_79 = arith.constant dense<0.000000e+00> : vector<48x64xf32>
    %80 = tpu.matmul %75, %79, %cst_79 {dimension_numbers = #tpu.dot_dimension_numbers<[1], [0], [0], [1], [0, 0, 1, 1], [], []>} : vector<48x64xf32>, vector<64x64xf32>, vector<48x64xf32> -> vector<48x64xf32>
    %81 = arith.maximumf %78, %80 : vector<48x64xf32>
    %c0_80 = arith.constant 0 : index
    %c0_81 = arith.constant 0 : index
    %82 = vector.load %arg38[%c0_80, %c0_81] : memref<48x64xf32, #tpu.memory_space<vmem>>, vector<48x64xf32>
    tpu.vector_store %arg38[%c0_80, %c0_81], %81 {strides = array<i32>} : memref<48x64xf32, #tpu.memory_space<vmem>>, vector<48x64xf32>,
    %c0_82 = arith.constant 0 : index
    %c0_83 = arith.constant 0 : index
    %83 = vector.load %arg38[%c0_82, %c0_83] : memref<48x64xf32, #tpu.memory_space<vmem>>, vector<46x64xf32>
    %c0_84 = arith.constant 0 : index
    %c0_85 = arith.constant 0 : index
    %c0_86 = arith.constant 0 : index
    %84 = vector.load %arg16[%c0_84, %c0_85, %c0_86] : memref<3x64x32xf32, #tpu.memory_space<vmem>>, vector<1x64x32xf32>
    %85 = vector.shape_cast %84 : vector<1x64x32xf32> to vector<64x32xf32>
    %cst_87 = arith.constant dense<0.000000e+00> : vector<46x32xf32>
    %86 = tpu.matmul %83, %85, %cst_87 {dimension_numbers = #tpu.dot_dimension_numbers<[1], [0], [0], [1], [0, 0, 1, 1], [], []>} : vector<46x64xf32>, vector<64x32xf32>, vector<46x32xf32> -> vector<46x32xf32>
    %c1_88 = arith.constant 1 : index
    %c0_89 = arith.constant 0 : index
    %87 = vector.load %arg38[%c1_88, %c0_89] : memref<48x64xf32, #tpu.memory_space<vmem>>, vector<46x64xf32>
    %c1_90 = arith.constant 1 : index
    %c0_91 = arith.constant 0 : index
    %c0_92 = arith.constant 0 : index
    %88 = vector.load %arg16[%c1_90, %c0_91, %c0_92] : memref<3x64x32xf32, #tpu.memory_space<vmem>>, vector<1x64x32xf32>
    %89 = vector.shape_cast %88 : vector<1x64x32xf32> to vector<64x32xf32>
    %cst_93 = arith.constant dense<0.000000e+00> : vector<46x32xf32>
    %90 = tpu.matmul %87, %89, %cst_93 {dimension_numbers = #tpu.dot_dimension_numbers<[1], [0], [0], [1], [0, 0, 1, 1], [], []>} : vector<46x64xf32>, vector<64x32xf32>, vector<46x32xf32> -> vector<46x32xf32>
    %91 = arith.addf %86, %90 : vector<46x32xf32>
    %c2_94 = arith.constant 2 : index
    %c0_95 = arith.constant 0 : index
    %92 = vector.load %arg38[%c2_94, %c0_95] : memref<48x64xf32, #tpu.memory_space<vmem>>, vector<46x64xf32>
    %c2_96 = arith.constant 2 : index
    %c0_97 = arith.constant 0 : index
    %c0_98 = arith.constant 0 : index
    %93 = vector.load %arg16[%c2_96, %c0_97, %c0_98] : memref<3x64x32xf32, #tpu.memory_space<vmem>>, vector<1x64x32xf32>
    %94 = vector.shape_cast %93 : vector<1x64x32xf32> to vector<64x32xf32>
    %cst_99 = arith.constant dense<0.000000e+00> : vector<46x32xf32>
    %95 = tpu.matmul %92, %94, %cst_99 {dimension_numbers = #tpu.dot_dimension_numbers<[1], [0], [0], [1], [0, 0, 1, 1], [], []>} : vector<46x64xf32>, vector<64x32xf32>, vector<46x32xf32> -> vector<46x32xf32>
    %96 = arith.addf %91, %95 : vector<46x32xf32>
    %c0_100 = arith.constant 0 : index
    %c0_101 = arith.constant 0 : index
    %97 = vector.load %arg17[%c0_100, %c0_101] : memref<2x32xf32, #tpu.memory_space<vmem>>, vector<1x32xf32>
    %98 = vector.broadcast %97 : vector<1x32xf32> to vector<46x32xf32>
    %99 = arith.mulf %96, %98 : vector<46x32xf32>
    %c1_102 = arith.constant 1 : index
    %c0_103 = arith.constant 0 : index
    %100 = vector.load %arg17[%c1_102, %c0_103] : memref<2x32xf32, #tpu.memory_space<vmem>>, vector<1x32xf32>
    %101 = vector.broadcast %100 : vector<1x32xf32> to vector<46x32xf32>
    %102 = arith.addf %99, %101 : vector<46x32xf32>
    %cst_104 = arith.constant 0.000000e+00 : f32
    %103 = vector.broadcast %cst_104 : f32 to vector<46x32xf32>
    %104 = arith.maximumf %102, %103 : vector<46x32xf32>
    %c0_105 = arith.constant 0 : index
    %c0_106 = arith.constant 0 : index
    %105 = vector.load %arg39[%c0_105, %c0_106] : memref<46x32xf32, #tpu.memory_space<vmem>>, vector<46x32xf32>
    tpu.vector_store %arg39[%c0_105, %c0_106], %104 {strides = array<i32>} : memref<46x32xf32, #tpu.memory_space<vmem>>, vector<46x32xf32>,
    %c0_107 = arith.constant 0 : index
    %c0_108 = arith.constant 0 : index
    %106 = vector.load %arg39[%c0_107, %c0_108] : memref<46x32xf32, #tpu.memory_space<vmem>>, vector<45x32xf32>
    %c1_109 = arith.constant 1 : index
    %c0_110 = arith.constant 0 : index
    %107 = vector.load %arg39[%c1_109, %c0_110] : memref<46x32xf32, #tpu.memory_space<vmem>>, vector<45x32xf32>
    %108 = arith.maximumf %106, %107 : vector<45x32xf32>
    %c0_111 = arith.constant 0 : index
    %c0_112 = arith.constant 0 : index
    %109 = vector.load %arg18[%c0_111, %c0_112] : memref<32x32xf32, #tpu.memory_space<vmem>>, vector<32x32xf32>
    %cst_113 = arith.constant dense<0.000000e+00> : vector<45x32xf32>
    %110 = tpu.matmul %108, %109, %cst_113 {dimension_numbers = #tpu.dot_dimension_numbers<[1], [0], [0], [1], [0, 0, 1, 1], [], []>} : vector<45x32xf32>, vector<32x32xf32>, vector<45x32xf32> -> vector<45x32xf32>
    %111 = arith.maximumf %108, %110 : vector<45x32xf32>
    %c0_114 = arith.constant 0 : index
    %c0_115 = arith.constant 0 : index
    %c0_116 = arith.constant 0 : index
    %112 = vector.load %arg19[%c0_114, %c0_115, %c0_116] : memref<3x8x45xf32, #tpu.memory_space<vmem>>, vector<1x8x45xf32>
    %113 = vector.shape_cast %112 : vector<1x8x45xf32> to vector<8x45xf32>
    %cst_117 = arith.constant dense<0.000000e+00> : vector<8x32xf32>
    %114 = tpu.matmul %113, %111, %cst_117 {dimension_numbers = #tpu.dot_dimension_numbers<[1], [0], [0], [1], [0, 0, 1, 1], [], []>} : vector<8x45xf32>, vector<45x32xf32>, vector<8x32xf32> -> vector<8x32xf32>
    %c0_118 = arith.constant 0 : index
    %c0_119 = arith.constant 0 : index
    %115 = vector.load %arg20[%c0_118, %c0_119] : memref<1x32xf32, #tpu.memory_space<vmem>>, vector<1x32xf32>
    %116 = vector.broadcast %115 : vector<1x32xf32> to vector<8x32xf32>
    %117 = arith.mulf %114, %116 : vector<8x32xf32>
    %c0_120 = arith.constant 0 : index
    %c0_121 = arith.constant 0 : index
    %118 = vector.load %arg40[%c0_120, %c0_121] : memref<8x96xf32, #tpu.memory_space<vmem>>, vector<8x32xf32>
    tpu.vector_store %arg40[%c0_120, %c0_121], %117 {strides = array<i32>} : memref<8x96xf32, #tpu.memory_space<vmem>>, vector<8x32xf32>,
    %c1_122 = arith.constant 1 : index
    %c0_123 = arith.constant 0 : index
    %c0_124 = arith.constant 0 : index
    %119 = vector.load %arg19[%c1_122, %c0_123, %c0_124] : memref<3x8x45xf32, #tpu.memory_space<vmem>>, vector<1x8x45xf32>
    %120 = vector.shape_cast %119 : vector<1x8x45xf32> to vector<8x45xf32>
    %cst_125 = arith.constant dense<0.000000e+00> : vector<8x32xf32>
    %121 = tpu.matmul %120, %111, %cst_125 {dimension_numbers = #tpu.dot_dimension_numbers<[1], [0], [0], [1], [0, 0, 1, 1], [], []>} : vector<8x45xf32>, vector<45x32xf32>, vector<8x32xf32> -> vector<8x32xf32>
    %c0_126 = arith.constant 0 : index
    %c0_127 = arith.constant 0 : index
    %122 = vector.load %arg20[%c0_126, %c0_127] : memref<1x32xf32, #tpu.memory_space<vmem>>, vector<1x32xf32>
    %123 = vector.broadcast %122 : vector<1x32xf32> to vector<8x32xf32>
    %124 = arith.mulf %121, %123 : vector<8x32xf32>
    %c0_128 = arith.constant 0 : index
    %c32 = arith.constant 32 : index
    %125 = vector.load %arg40[%c0_128, %c32] : memref<8x96xf32, #tpu.memory_space<vmem>>, vector<8x32xf32>
    tpu.vector_store %arg40[%c0_128, %c32], %124 {strides = array<i32>} : memref<8x96xf32, #tpu.memory_space<vmem>>, vector<8x32xf32>,
    %c2_129 = arith.constant 2 : index
    %c0_130 = arith.constant 0 : index
    %c0_131 = arith.constant 0 : index
    %126 = vector.load %arg19[%c2_129, %c0_130, %c0_131] : memref<3x8x45xf32, #tpu.memory_space<vmem>>, vector<1x8x45xf32>
    %127 = vector.shape_cast %126 : vector<1x8x45xf32> to vector<8x45xf32>
    %cst_132 = arith.constant dense<0.000000e+00> : vector<8x32xf32>
    %128 = tpu.matmul %127, %111, %cst_132 {dimension_numbers = #tpu.dot_dimension_numbers<[1], [0], [0], [1], [0, 0, 1, 1], [], []>} : vector<8x45xf32>, vector<45x32xf32>, vector<8x32xf32> -> vector<8x32xf32>
    %c0_133 = arith.constant 0 : index
    %c0_134 = arith.constant 0 : index
    %129 = vector.load %arg20[%c0_133, %c0_134] : memref<1x32xf32, #tpu.memory_space<vmem>>, vector<1x32xf32>
    %130 = vector.broadcast %129 : vector<1x32xf32> to vector<8x32xf32>
    %131 = arith.mulf %128, %130 : vector<8x32xf32>
    %c0_135 = arith.constant 0 : index
    %c64 = arith.constant 64 : index
    %132 = vector.load %arg40[%c0_135, %c64] : memref<8x96xf32, #tpu.memory_space<vmem>>, vector<8x32xf32>
    tpu.vector_store %arg40[%c0_135, %c64], %131 {strides = array<i32>} : memref<8x96xf32, #tpu.memory_space<vmem>>, vector<8x32xf32>,
    %c0_136 = arith.constant 0 : index
    %c0_137 = arith.constant 0 : index
    %133 = vector.load %arg40[%c0_136, %c0_137] : memref<8x96xf32, #tpu.memory_space<vmem>>, vector<8x96xf32>
    %c0_138 = arith.constant 0 : index
    %c0_139 = arith.constant 0 : index
    %134 = vector.load %arg21[%c0_138, %c0_139] : memref<96x5xf32, #tpu.memory_space<vmem>>, vector<96x5xf32>
    %cst_140 = arith.constant dense<0.000000e+00> : vector<8x5xf32>
    %135 = tpu.matmul %133, %134, %cst_140 {dimension_numbers = #tpu.dot_dimension_numbers<[1], [0], [0], [1], [0, 0, 1, 1], [], []>} : vector<8x96xf32>, vector<96x5xf32>, vector<8x5xf32> -> vector<8x5xf32>
    %c0_141 = arith.constant 0 : index
    %c0_142 = arith.constant 0 : index
    %136 = vector.load %arg22[%c0_141, %c0_142] : memref<2x5xf32, #tpu.memory_space<vmem>>, vector<1x5xf32>
    %137 = vector.broadcast %136 : vector<1x5xf32> to vector<8x5xf32>
    %138 = arith.mulf %135, %137 : vector<8x5xf32>
    %c1_143 = arith.constant 1 : index
    %c0_144 = arith.constant 0 : index
    %139 = vector.load %arg22[%c1_143, %c0_144] : memref<2x5xf32, #tpu.memory_space<vmem>>, vector<1x5xf32>
    %140 = vector.broadcast %139 : vector<1x5xf32> to vector<8x5xf32>
    %141 = arith.addf %138, %140 : vector<8x5xf32>
    %c0_145 = arith.constant 0 : index
    %c0_146 = arith.constant 0 : index
    %c0_147 = arith.constant 0 : index
    %142 = vector.load %arg33[%c0_145, %c0_146, %c0_147] : memref<1x8x5xf32, #tpu.memory_space<vmem>>, vector<1x8x5xf32>
    %143 = vector.shape_cast %142 : vector<1x8x5xf32> to vector<8x5xf32>
    %144 = vector.shape_cast %141 : vector<8x5xf32> to vector<1x8x5xf32>
    tpu.vector_store %arg33[%c0_145, %c0_146, %c0_147], %144 {strides = array<i32>} : memref<1x8x5xf32, #tpu.memory_space<vmem>>, vector<1x8x5xf32>,
    %cst_148 = arith.constant 0.000000e+00 : f32
    %145 = vector.broadcast %cst_148 : f32 to vector<10x96xf32>
    %c0_149 = arith.constant 0 : index
    %c0_150 = arith.constant 0 : index
    %146 = vector.load %arg41[%c0_149, %c0_150] : memref<10x96xf32, #tpu.memory_space<vmem>>, vector<10x96xf32>
    tpu.vector_store %arg41[%c0_149, %c0_150], %145 {strides = array<i32>} : memref<10x96xf32, #tpu.memory_space<vmem>>, vector<10x96xf32>,
    %c1_151 = arith.constant 1 : index
    %c0_152 = arith.constant 0 : index
    %147 = vector.load %arg41[%c1_151, %c0_152] : memref<10x96xf32, #tpu.memory_space<vmem>>, vector<8x96xf32>
    tpu.vector_store %arg41[%c1_151, %c0_152], %133 {strides = array<i32>} : memref<10x96xf32, #tpu.memory_space<vmem>>, vector<8x96xf32>,
    %c0_153 = arith.constant 0 : index
    %c0_154 = arith.constant 0 : index
    %148 = vector.load %arg41[%c0_153, %c0_154] : memref<10x96xf32, #tpu.memory_space<vmem>>, vector<8x96xf32>
    %c1_155 = arith.constant 1 : index
    %c0_156 = arith.constant 0 : index
    %149 = vector.load %arg41[%c1_155, %c0_156] : memref<10x96xf32, #tpu.memory_space<vmem>>, vector<8x96xf32>
    %150 = arith.maximumf %148, %149 : vector<8x96xf32>
    %c2_157 = arith.constant 2 : index
    %c0_158 = arith.constant 0 : index
    %151 = vector.load %arg41[%c2_157, %c0_158] : memref<10x96xf32, #tpu.memory_space<vmem>>, vector<8x96xf32>
    %152 = arith.maximumf %150, %151 : vector<8x96xf32>
    %c0_159 = arith.constant 0 : index
    %c0_160 = arith.constant 0 : index
    %153 = vector.load %arg23[%c0_159, %c0_160] : memref<4x8xf32, #tpu.memory_space<vmem>>, vector<4x8xf32>
    %cst_161 = arith.constant dense<0.000000e+00> : vector<4x96xf32>
    %154 = tpu.matmul %153, %152, %cst_161 {dimension_numbers = #tpu.dot_dimension_numbers<[1], [0], [0], [1], [0, 0, 1, 1], [], []>} : vector<4x8xf32>, vector<8x96xf32>, vector<4x96xf32> -> vector<4x96xf32>
    %cst_162 = arith.constant 0.000000e+00 : f32
    %155 = vector.broadcast %cst_162 : f32 to vector<6x96xf32>
    %c0_163 = arith.constant 0 : index
    %c0_164 = arith.constant 0 : index
    %156 = vector.load %arg42[%c0_163, %c0_164] : memref<6x96xf32, #tpu.memory_space<vmem>>, vector<6x96xf32>
    tpu.vector_store %arg42[%c0_163, %c0_164], %155 {strides = array<i32>} : memref<6x96xf32, #tpu.memory_space<vmem>>, vector<6x96xf32>,
    %c1_165 = arith.constant 1 : index
    %c0_166 = arith.constant 0 : index
    %157 = vector.load %arg42[%c1_165, %c0_166] : memref<6x96xf32, #tpu.memory_space<vmem>>, vector<4x96xf32>
    tpu.vector_store %arg42[%c1_165, %c0_166], %154 {strides = array<i32>} : memref<6x96xf32, #tpu.memory_space<vmem>>, vector<4x96xf32>,
    %c0_167 = arith.constant 0 : index
    %c0_168 = arith.constant 0 : index
    %158 = vector.load %arg42[%c0_167, %c0_168] : memref<6x96xf32, #tpu.memory_space<vmem>>, vector<4x96xf32>
    %c0_169 = arith.constant 0 : index
    %c0_170 = arith.constant 0 : index
    %c0_171 = arith.constant 0 : index
    %159 = vector.load %arg24[%c0_169, %c0_170, %c0_171] : memref<3x96x96xf32, #tpu.memory_space<vmem>>, vector<1x96x96xf32>
    %160 = vector.shape_cast %159 : vector<1x96x96xf32> to vector<96x96xf32>
    %cst_172 = arith.constant dense<0.000000e+00> : vector<4x96xf32>
    %161 = tpu.matmul %158, %160, %cst_172 {dimension_numbers = #tpu.dot_dimension_numbers<[1], [0], [0], [1], [0, 0, 1, 1], [], []>} : vector<4x96xf32>, vector<96x96xf32>, vector<4x96xf32> -> vector<4x96xf32>
    %c1_173 = arith.constant 1 : index
    %c0_174 = arith.constant 0 : index
    %162 = vector.load %arg42[%c1_173, %c0_174] : memref<6x96xf32, #tpu.memory_space<vmem>>, vector<4x96xf32>
    %c1_175 = arith.constant 1 : index
    %c0_176 = arith.constant 0 : index
    %c0_177 = arith.constant 0 : index
    %163 = vector.load %arg24[%c1_175, %c0_176, %c0_177] : memref<3x96x96xf32, #tpu.memory_space<vmem>>, vector<1x96x96xf32>
    %164 = vector.shape_cast %163 : vector<1x96x96xf32> to vector<96x96xf32>
    %cst_178 = arith.constant dense<0.000000e+00> : vector<4x96xf32>
    %165 = tpu.matmul %162, %164, %cst_178 {dimension_numbers = #tpu.dot_dimension_numbers<[1], [0], [0], [1], [0, 0, 1, 1], [], []>} : vector<4x96xf32>, vector<96x96xf32>, vector<4x96xf32> -> vector<4x96xf32>
    %166 = arith.addf %161, %165 : vector<4x96xf32>
    %c2_179 = arith.constant 2 : index
    %c0_180 = arith.constant 0 : index
    %167 = vector.load %arg42[%c2_179, %c0_180] : memref<6x96xf32, #tpu.memory_space<vmem>>, vector<4x96xf32>
    %c2_181 = arith.constant 2 : index
    %c0_182 = arith.constant 0 : index
    %c0_183 = arith.constant 0 : index
    %168 = vector.load %arg24[%c2_181, %c0_182, %c0_183] : memref<3x96x96xf32, #tpu.memory_space<vmem>>, vector<1x96x96xf32>
    %169 = vector.shape_cast %168 : vector<1x96x96xf32> to vector<96x96xf32>
    %cst_184 = arith.constant dense<0.000000e+00> : vector<4x96xf32>
    %170 = tpu.matmul %167, %169, %cst_184 {dimension_numbers = #tpu.dot_dimension_numbers<[1], [0], [0], [1], [0, 0, 1, 1], [], []>} : vector<4x96xf32>, vector<96x96xf32>, vector<4x96xf32> -> vector<4x96xf32>
    %171 = arith.addf %166, %170 : vector<4x96xf32>
    %c0_185 = arith.constant 0 : index
    %c0_186 = arith.constant 0 : index
    %172 = vector.load %arg26[%c0_185, %c0_186] : memref<2x4xf32, #tpu.memory_space<vmem>>, vector<2x4xf32>
    %cst_187 = arith.constant dense<0.000000e+00> : vector<2x96xf32>
    %173 = tpu.matmul %172, %171, %cst_187 {dimension_numbers = #tpu.dot_dimension_numbers<[1], [0], [0], [1], [0, 0, 1, 1], [], []>} : vector<2x4xf32>, vector<4x96xf32>, vector<2x96xf32> -> vector<2x96xf32>
    %c0_188 = arith.constant 0 : index
    %c0_189 = arith.constant 0 : index
    %174 = vector.load %arg25[%c0_188, %c0_189] : memref<2x96xf32, #tpu.memory_space<vmem>>, vector<1x96xf32>
    %175 = vector.broadcast %174 : vector<1x96xf32> to vector<2x96xf32>
    %176 = arith.mulf %173, %175 : vector<2x96xf32>
    %c1_190 = arith.constant 1 : index
    %c0_191 = arith.constant 0 : index
    %177 = vector.load %arg25[%c1_190, %c0_191] : memref<2x96xf32, #tpu.memory_space<vmem>>, vector<1x96xf32>
    %178 = vector.broadcast %177 : vector<1x96xf32> to vector<2x96xf32>
    %179 = arith.addf %176, %178 : vector<2x96xf32>
    %cst_192 = arith.constant 0.000000e+00 : f32
    %180 = vector.broadcast %cst_192 : f32 to vector<2x96xf32>
    %181 = arith.maximumf %179, %180 : vector<2x96xf32>
    %cst_193 = arith.constant 0.000000e+00 : f32
    %182 = vector.broadcast %cst_193 : f32 to vector<4x96xf32>
    %c0_194 = arith.constant 0 : index
    %c0_195 = arith.constant 0 : index
    %183 = vector.load %arg43[%c0_194, %c0_195] : memref<4x96xf32, #tpu.memory_space<vmem>>, vector<4x96xf32>
    tpu.vector_store %arg43[%c0_194, %c0_195], %182 {strides = array<i32>} : memref<4x96xf32, #tpu.memory_space<vmem>>, vector<4x96xf32>,
    %c1_196 = arith.constant 1 : index
    %c0_197 = arith.constant 0 : index
    %184 = vector.load %arg43[%c1_196, %c0_197] : memref<4x96xf32, #tpu.memory_space<vmem>>, vector<2x96xf32>
    tpu.vector_store %arg43[%c1_196, %c0_197], %181 {strides = array<i32>} : memref<4x96xf32, #tpu.memory_space<vmem>>, vector<2x96xf32>,
    %c0_198 = arith.constant 0 : index
    %c0_199 = arith.constant 0 : index
    %185 = vector.load %arg43[%c0_198, %c0_199] : memref<4x96xf32, #tpu.memory_space<vmem>>, vector<1x96xf32>
    %c0_200 = arith.constant 0 : index
    %c0_201 = arith.constant 0 : index
    %c0_202 = arith.constant 0 : index
    %186 = vector.load %arg27[%c0_200, %c0_201, %c0_202] : memref<3x96x96xf32, #tpu.memory_space<vmem>>, vector<1x96x96xf32>
    %187 = vector.shape_cast %186 : vector<1x96x96xf32> to vector<96x96xf32>
    %cst_203 = arith.constant dense<0.000000e+00> : vector<1x96xf32>
    %188 = tpu.matmul %185, %187, %cst_203 {dimension_numbers = #tpu.dot_dimension_numbers<[1], [0], [0], [1], [0, 0, 1, 1], [], []>} : vector<1x96xf32>, vector<96x96xf32>, vector<1x96xf32> -> vector<1x96xf32>
    %c1_204 = arith.constant 1 : index
    %c0_205 = arith.constant 0 : index
    %189 = vector.load %arg43[%c1_204, %c0_205] : memref<4x96xf32, #tpu.memory_space<vmem>>, vector<1x96xf32>
    %c1_206 = arith.constant 1 : index
    %c0_207 = arith.constant 0 : index
    %c0_208 = arith.constant 0 : index
    %190 = vector.load %arg27[%c1_206, %c0_207, %c0_208] : memref<3x96x96xf32, #tpu.memory_space<vmem>>, vector<1x96x96xf32>
    %191 = vector.shape_cast %190 : vector<1x96x96xf32> to vector<96x96xf32>
    %cst_209 = arith.constant dense<0.000000e+00> : vector<1x96xf32>
    %192 = tpu.matmul %189, %191, %cst_209 {dimension_numbers = #tpu.dot_dimension_numbers<[1], [0], [0], [1], [0, 0, 1, 1], [], []>} : vector<1x96xf32>, vector<96x96xf32>, vector<1x96xf32> -> vector<1x96xf32>
    %193 = arith.addf %188, %192 : vector<1x96xf32>
    %c2_210 = arith.constant 2 : index
    %c0_211 = arith.constant 0 : index
    %194 = vector.load %arg43[%c2_210, %c0_211] : memref<4x96xf32, #tpu.memory_space<vmem>>, vector<1x96xf32>
    %c2_212 = arith.constant 2 : index
    %c0_213 = arith.constant 0 : index
    %c0_214 = arith.constant 0 : index
    %195 = vector.load %arg27[%c2_212, %c0_213, %c0_214] : memref<3x96x96xf32, #tpu.memory_space<vmem>>, vector<1x96x96xf32>
    %196 = vector.shape_cast %195 : vector<1x96x96xf32> to vector<96x96xf32>
    %cst_215 = arith.constant dense<0.000000e+00> : vector<1x96xf32>
    %197 = tpu.matmul %194, %196, %cst_215 {dimension_numbers = #tpu.dot_dimension_numbers<[1], [0], [0], [1], [0, 0, 1, 1], [], []>} : vector<1x96xf32>, vector<96x96xf32>, vector<1x96xf32> -> vector<1x96xf32>
    %198 = arith.addf %193, %197 : vector<1x96xf32>
    %c0_216 = arith.constant 0 : index
    %c0_217 = arith.constant 0 : index
    %199 = vector.load %arg28[%c0_216, %c0_217] : memref<2x96xf32, #tpu.memory_space<vmem>>, vector<1x96xf32>
    %200 = arith.mulf %198, %199 : vector<1x96xf32>
    %c1_218 = arith.constant 1 : index
    %c0_219 = arith.constant 0 : index
    %201 = vector.load %arg28[%c1_218, %c0_219] : memref<2x96xf32, #tpu.memory_space<vmem>>, vector<1x96xf32>
    %202 = arith.addf %200, %201 : vector<1x96xf32>
    %cst_220 = arith.constant 0.000000e+00 : f32
    %203 = vector.broadcast %cst_220 : f32 to vector<1x96xf32>
    %204 = arith.maximumf %202, %203 : vector<1x96xf32>
    %c0_221 = arith.constant 0 : index
    %c0_222 = arith.constant 0 : index
    %205 = vector.load %arg29[%c0_221, %c0_222] : memref<96x96xf32, #tpu.memory_space<vmem>>, vector<96x96xf32>
    %cst_223 = arith.constant dense<0.000000e+00> : vector<1x96xf32>
    %206 = tpu.matmul %204, %205, %cst_223 {dimension_numbers = #tpu.dot_dimension_numbers<[1], [0], [0], [1], [0, 0, 1, 1], [], []>} : vector<1x96xf32>, vector<96x96xf32>, vector<1x96xf32> -> vector<1x96xf32>
    %c0_224 = arith.constant 0 : index
    %c0_225 = arith.constant 0 : index
    %207 = vector.load %arg30[%c0_224, %c0_225] : memref<2x96xf32, #tpu.memory_space<vmem>>, vector<1x96xf32>
    %208 = arith.mulf %206, %207 : vector<1x96xf32>
    %c1_226 = arith.constant 1 : index
    %c0_227 = arith.constant 0 : index
    %209 = vector.load %arg30[%c1_226, %c0_227] : memref<2x96xf32, #tpu.memory_space<vmem>>, vector<1x96xf32>
    %210 = arith.addf %208, %209 : vector<1x96xf32>
    %cst_228 = arith.constant 0.000000e+00 : f32
    %211 = vector.broadcast %cst_228 : f32 to vector<1x96xf32>
    %212 = arith.maximumf %210, %211 : vector<1x96xf32>
    %c0_229 = arith.constant 0 : index
    %c0_230 = arith.constant 0 : index
    %213 = vector.load %arg31[%c0_229, %c0_230] : memref<96x3xf32, #tpu.memory_space<vmem>>, vector<96x3xf32>
    %cst_231 = arith.constant dense<0.000000e+00> : vector<1x3xf32>
    %214 = tpu.matmul %212, %213, %cst_231 {dimension_numbers = #tpu.dot_dimension_numbers<[1], [0], [0], [1], [0, 0, 1, 1], [], []>} : vector<1x96xf32>, vector<96x3xf32>, vector<1x3xf32> -> vector<1x3xf32>
    %c0_232 = arith.constant 0 : index
    %c0_233 = arith.constant 0 : index
    %215 = vector.load %arg32[%c0_232, %c0_233] : memref<2x3xf32, #tpu.memory_space<vmem>>, vector<1x3xf32>
    %216 = arith.mulf %214, %215 : vector<1x3xf32>
    %c1_234 = arith.constant 1 : index
    %c0_235 = arith.constant 0 : index
    %217 = vector.load %arg32[%c1_234, %c0_235] : memref<2x3xf32, #tpu.memory_space<vmem>>, vector<1x3xf32>
    %218 = arith.addf %216, %217 : vector<1x3xf32>
    %c0_236 = arith.constant 0 : index
    %c0_237 = arith.constant 0 : index
    %c0_238 = arith.constant 0 : index
    %219 = vector.load %arg34[%c0_236, %c0_237, %c0_238] : memref<1x1x3xf32, #tpu.memory_space<vmem>>, vector<1x1x3xf32>
    %220 = vector.shape_cast %219 : vector<1x1x3xf32> to vector<1x3xf32>
    %221 = vector.shape_cast %218 : vector<1x3xf32> to vector<1x1x3xf32>
    tpu.vector_store %arg34[%c0_236, %c0_237, %c0_238], %221 {strides = array<i32>} : memref<1x1x3xf32, #tpu.memory_space<vmem>>, vector<1x1x3xf32>,
    return
  }
  func.func @transform_0(%arg0: i32) -> (i32, i32, i32) {
    %c0_i32 = arith.constant 0 : i32
    %c0_i32_0 = arith.constant 0 : i32
    %c0_i32_1 = arith.constant 0 : i32
    return %arg0, %c0_i32, %c0_i32_0 : i32, i32, i32
  }
  func.func @transform_1(%arg0: i32) -> (i32, i32) {
    %c0_i32 = arith.constant 0 : i32
    %c0_i32_0 = arith.constant 0 : i32
    %c0_i32_1 = arith.constant 0 : i32
    return %c0_i32, %c0_i32_0 : i32, i32
  }
  func.func @transform_2(%arg0: i32) -> (i32, i32) {
    %c0_i32 = arith.constant 0 : i32
    %c0_i32_0 = arith.constant 0 : i32
    %c0_i32_1 = arith.constant 0 : i32
    return %c0_i32, %c0_i32_0 : i32, i32
  }
  func.func @transform_3(%arg0: i32) -> (i32, i32) {
    %c0_i32 = arith.constant 0 : i32
    %c0_i32_0 = arith.constant 0 : i32
    %c0_i32_1 = arith.constant 0 : i32
    return %c0_i32, %c0_i32_0 : i32, i32
  }
  func.func @transform_4(%arg0: i32) -> (i32, i32) {
    %c0_i32 = arith.constant 0 : i32
    %c0_i32_0 = arith.constant 0 : i32
    %c0_i32_1 = arith.constant 0 : i32
    return %c0_i32, %c0_i32_0 : i32, i32
  }
  func.func @transform_5(%arg0: i32) -> (i32, i32) {
    %c0_i32 = arith.constant 0 : i32
    %c0_i32_0 = arith.constant 0 : i32
    %c0_i32_1 = arith.constant 0 : i32
    return %c0_i32, %c0_i32_0 : i32, i32
  }
  func.func @transform_6(%arg0: i32) -> (i32, i32) {
    %c0_i32 = arith.constant 0 : i32
    %c0_i32_0 = arith.constant 0 : i32
    %c0_i32_1 = arith.constant 0 : i32
    return %c0_i32, %c0_i32_0 : i32, i32
  }
  func.func @transform_7(%arg0: i32) -> (i32, i32) {
    %c0_i32 = arith.constant 0 : i32
    %c0_i32_0 = arith.constant 0 : i32
    %c0_i32_1 = arith.constant 0 : i32
    return %c0_i32, %c0_i32_0 : i32, i32
  }
  func.func @transform_8(%arg0: i32) -> (i32, i32) {
    %c0_i32 = arith.constant 0 : i32
    %c0_i32_0 = arith.constant 0 : i32
    %c0_i32_1 = arith.constant 0 : i32
    return %c0_i32, %c0_i32_0 : i32, i32
  }
  func.func @transform_9(%arg0: i32) -> (i32, i32, i32) {
    %c0_i32 = arith.constant 0 : i32
    %c0_i32_0 = arith.constant 0 : i32
    %c0_i32_1 = arith.constant 0 : i32
    %c0_i32_2 = arith.constant 0 : i32
    return %c0_i32, %c0_i32_0, %c0_i32_1 : i32, i32, i32
  }
  func.func @transform_10(%arg0: i32) -> (i32, i32) {
    %c0_i32 = arith.constant 0 : i32
    %c0_i32_0 = arith.constant 0 : i32
    %c0_i32_1 = arith.constant 0 : i32
    return %c0_i32, %c0_i32_0 : i32, i32
  }
  func.func @transform_11(%arg0: i32) -> (i32, i32) {
    %c0_i32 = arith.constant 0 : i32
    %c0_i32_0 = arith.constant 0 : i32
    %c0_i32_1 = arith.constant 0 : i32
    return %c0_i32, %c0_i32_0 : i32, i32
  }
  func.func @transform_12(%arg0: i32) -> (i32, i32) {
    %c0_i32 = arith.constant 0 : i32
    %c0_i32_0 = arith.constant 0 : i32
    %c0_i32_1 = arith.constant 0 : i32
    return %c0_i32, %c0_i32_0 : i32, i32
  }
  func.func @transform_13(%arg0: i32) -> (i32, i32) {
    %c0_i32 = arith.constant 0 : i32
    %c0_i32_0 = arith.constant 0 : i32
    %c0_i32_1 = arith.constant 0 : i32
    return %c0_i32, %c0_i32_0 : i32, i32
  }
  func.func @transform_14(%arg0: i32) -> (i32, i32) {
    %c0_i32 = arith.constant 0 : i32
    %c0_i32_0 = arith.constant 0 : i32
    %c0_i32_1 = arith.constant 0 : i32
    return %c0_i32, %c0_i32_0 : i32, i32
  }
  func.func @transform_15(%arg0: i32) -> (i32, i32, i32) {
    %c0_i32 = arith.constant 0 : i32
    %c0_i32_0 = arith.constant 0 : i32
    %c0_i32_1 = arith.constant 0 : i32
    %c0_i32_2 = arith.constant 0 : i32
    return %c0_i32, %c0_i32_0, %c0_i32_1 : i32, i32, i32
  }
  func.func @transform_16(%arg0: i32) -> (i32, i32) {
    %c0_i32 = arith.constant 0 : i32
    %c0_i32_0 = arith.constant 0 : i32
    %c0_i32_1 = arith.constant 0 : i32
    return %c0_i32, %c0_i32_0 : i32, i32
  }
  func.func @transform_17(%arg0: i32) -> (i32, i32) {
    %c0_i32 = arith.constant 0 : i32
    %c0_i32_0 = arith.constant 0 : i32
    %c0_i32_1 = arith.constant 0 : i32
    return %c0_i32, %c0_i32_0 : i32, i32
  }
  func.func @transform_18(%arg0: i32) -> (i32, i32, i32) {
    %c0_i32 = arith.constant 0 : i32
    %c0_i32_0 = arith.constant 0 : i32
    %c0_i32_1 = arith.constant 0 : i32
    %c0_i32_2 = arith.constant 0 : i32
    return %c0_i32, %c0_i32_0, %c0_i32_1 : i32, i32, i32
  }
  func.func @transform_19(%arg0: i32) -> (i32, i32) {
    %c0_i32 = arith.constant 0 : i32
    %c0_i32_0 = arith.constant 0 : i32
    %c0_i32_1 = arith.constant 0 : i32
    return %c0_i32, %c0_i32_0 : i32, i32
  }
  func.func @transform_20(%arg0: i32) -> (i32, i32) {
    %c0_i32 = arith.constant 0 : i32
    %c0_i32_0 = arith.constant 0 : i32
    %c0_i32_1 = arith.constant 0 : i32
    return %c0_i32, %c0_i32_0 : i32, i32
  }
  func.func @transform_21(%arg0: i32) -> (i32, i32) {
    %c0_i32 = arith.constant 0 : i32
    %c0_i32_0 = arith.constant 0 : i32
    %c0_i32_1 = arith.constant 0 : i32
    return %c0_i32, %c0_i32_0 : i32, i32
  }
  func.func @transform_22(%arg0: i32) -> (i32, i32) {
    %c0_i32 = arith.constant 0 : i32
    %c0_i32_0 = arith.constant 0 : i32
    %c0_i32_1 = arith.constant 0 : i32
    return %c0_i32, %c0_i32_0 : i32, i32
  }
  func.func @transform_23(%arg0: i32) -> (i32, i32, i32) {
    %c0_i32 = arith.constant 0 : i32
    %c0_i32_0 = arith.constant 0 : i32
    %c0_i32_1 = arith.constant 0 : i32
    %c0_i32_2 = arith.constant 0 : i32
    return %c0_i32, %c0_i32_0, %c0_i32_1 : i32, i32, i32
  }
  func.func @transform_24(%arg0: i32) -> (i32, i32) {
    %c0_i32 = arith.constant 0 : i32
    %c0_i32_0 = arith.constant 0 : i32
    %c0_i32_1 = arith.constant 0 : i32
    return %c0_i32, %c0_i32_0 : i32, i32
  }
  func.func @transform_25(%arg0: i32) -> (i32, i32) {
    %c0_i32 = arith.constant 0 : i32
    %c0_i32_0 = arith.constant 0 : i32
    %c0_i32_1 = arith.constant 0 : i32
    return %c0_i32, %c0_i32_0 : i32, i32
  }
  func.func @transform_26(%arg0: i32) -> (i32, i32, i32) {
    %c0_i32 = arith.constant 0 : i32
    %c0_i32_0 = arith.constant 0 : i32
    %c0_i32_1 = arith.constant 0 : i32
    %c0_i32_2 = arith.constant 0 : i32
    return %c0_i32, %c0_i32_0, %c0_i32_1 : i32, i32, i32
  }
  func.func @transform_27(%arg0: i32) -> (i32, i32) {
    %c0_i32 = arith.constant 0 : i32
    %c0_i32_0 = arith.constant 0 : i32
    %c0_i32_1 = arith.constant 0 : i32
    return %c0_i32, %c0_i32_0 : i32, i32
  }
  func.func @transform_28(%arg0: i32) -> (i32, i32) {
    %c0_i32 = arith.constant 0 : i32
    %c0_i32_0 = arith.constant 0 : i32
    %c0_i32_1 = arith.constant 0 : i32
    return %c0_i32, %c0_i32_0 : i32, i32
  }
  func.func @transform_29(%arg0: i32) -> (i32, i32) {
    %c0_i32 = arith.constant 0 : i32
    %c0_i32_0 = arith.constant 0 : i32
    %c0_i32_1 = arith.constant 0 : i32
    return %c0_i32, %c0_i32_0 : i32, i32
  }
  func.func @transform_30(%arg0: i32) -> (i32, i32) {
    %c0_i32 = arith.constant 0 : i32
    %c0_i32_0 = arith.constant 0 : i32
    %c0_i32_1 = arith.constant 0 : i32
    return %c0_i32, %c0_i32_0 : i32, i32
  }
  func.func @transform_31(%arg0: i32) -> (i32, i32) {
    %c0_i32 = arith.constant 0 : i32
    %c0_i32_0 = arith.constant 0 : i32
    %c0_i32_1 = arith.constant 0 : i32
    return %c0_i32, %c0_i32_0 : i32, i32
  }
  func.func @transform_32(%arg0: i32) -> (i32, i32, i32) {
    %c0_i32 = arith.constant 0 : i32
    %c0_i32_0 = arith.constant 0 : i32
    %c0_i32_1 = arith.constant 0 : i32
    return %arg0, %c0_i32, %c0_i32_0 : i32, i32, i32
  }
  func.func @transform_33(%arg0: i32) -> (i32, i32, i32) {
    %c0_i32 = arith.constant 0 : i32
    %c0_i32_0 = arith.constant 0 : i32
    %c0_i32_1 = arith.constant 0 : i32
    return %arg0, %c0_i32, %c0_i32_0 : i32, i32, i32
  }
}

</mosaic_0001>

<bundles_post_ra>
// kernel: tile.73
= control target key start
LH: loop header
LB: loop body
LE: loop exit
PB: predicated region body
PF: predicated region fallthrough
CT: control target
= control target key end

     0   :  { %s28_s0 = inlined_call_operand.vmem [shape: f32[4], index: 0, kind: input, shape index: {}]   ;;  %s29_s1 = inlined_call_operand.vmem [shape: f32[16,4], index: 1, kind: output, shape index: {}]  }
   0x1   :  { %v4_v0 = vld [vmem:[%s28_s0] ss:$0 sm:$0xff] }
   0x2   :  { %5 = vst [vmem:[%s29_s1] sm:$0xff] %v4_v0 }
   0x3   :  { %8 = vst [vmem:[%s29_s1 + $0x8] sm:$0xff] %v4_v0 }

// kernel: tile.78
= control target key start
LH: loop header
LB: loop body
LE: loop exit
PB: predicated region body
PF: predicated region fallthrough
CT: control target
= control target key end

     0   :  { %s131_s10 = smov 60   ;;  %s132_s11 = smov 52   ;;  %vm3_vm0 = vcmask 31744   ;;  %vm9_vm1 = vcmask 523744   ;;  %vm15_vm2 = vcmask 490944   ;;  %vm21_vm3 = vcmask 458144   ;;  %s207_s0 = inlined_call_operand.vmem [shape: f32[16,4], index: 0, kind: input, shape index: {}]   ;;  %s208_s1 = inlined_call_operand.vmem [shape: f32[1,64], index: 1, kind: output, shape index: {}]  }
   0x1   :  { %v101_v0 = vld [vmem:[%s207_s0 + $0xf] sm:$0x1]   ;;  %v103_v1 = vld [vmem:[%s207_s0 + $0xd] sm:$0x1]   ;;  %v105_v2 = vld [vmem:[%s207_s0 + $0xb] sm:$0x1]  }
   0x2   :  { %7 = vrot.lane.b32.xlu0 %v101_v0, %s131_s10  ;;  %19 = vrot.lane.b32.xlu1 %v103_v1, %s132_s11  ;;  %s133_s14 = smov 44   ;;  %v102_v3 = vld [vmem:[%s207_s0 + $0xe] sm:$0x1]   ;;  %v104_v4 = vld [vmem:[%s207_s0 + $0xc] sm:$0x1]   ;;  %s134_s19 = smov 56  }
   0x3   :  { %31 = vrot.lane.b32.xlu2 %v105_v2, %s133_s14  ;;  %s135_s20 = smov 48   ;;  %v106_v5 = vld [vmem:[%s207_s0 + $0xa] sm:$0x1]   ;;  %s136_s23 = smov 40   ;;  %v107_v6 = vld [vmem:[%s207_s0 + $0x9] sm:$0x1]  }
   0x4   :  { %v108_v7 = vld [vmem:[%s207_s0 + $0x8] sm:$0x1]   ;;  %s137_s28 = smov 36   ;;  %s138_s29 = smov 32   ;;  %v109_v8 = vld [vmem:[%s207_s0 + $0x7] sm:$0x1]  }
   0x5   :  { %s139_s3 = smov 28   ;;  %v110_v9 = vld [vmem:[%s207_s0 + $0x6] sm:$0x1]   ;;  %v111_v10 = vld [vmem:[%s207_s0 + $0x5] sm:$0x1]   ;;  %s140_s8 = smov 24  }
   0x6   :  { %s141_s9 = smov 20   ;;  %v112_v11 = vld [vmem:[%s207_s0 + $0x4] sm:$0x1]   ;;  %s142_s12 = smov 16   ;;  %v113_v12 = vld [vmem:[%s207_s0 + $0x3] sm:$0x1]  }
   0x7   :  { %v114_v13 = vld [vmem:[%s207_s0 + $0x2] sm:$0x1]   ;;  %s143_s17 = smov 12   ;;  %s144_s18 = smov 8   ;;  %v115_v14 = vld [vmem:[%s207_s0 + $0x1] sm:$0x1]  }
   0x8   :  { %s145_s21 = smov 4   ;;  %v2_v15 = vld [vmem:[%s207_s0] sm:$0x1]   ;;  %vm27_vm4 = vcmask 425344   ;;  %vm33_vm5 = vcmask 392544   ;;  %vm39_vm6 = vcmask 359744  }
   0x9   :  { %4 = vst.msk [vmem:[#allocation0] sm:$0x1] %vm3_vm0, %v2_v15   ;;  %vm45_vm7 = vcmask 326944   ;;  %vm51_vm8 = vcmask 294144   ;;  %vm57_vm9 = vcmask 261344   ;;  %vm63_vm10 = vcmask 228544  }
   0xa   :  { %13 = vrot.lane.b32.xlu0 %v102_v3, %s134_s19  ;;  %25 = vrot.lane.b32.xlu1 %v104_v4, %s135_s20  ;;  %vm69_vm11 = vcmask 195744   ;;  %vm75_vm12 = vcmask 162944   ;;  %vm81_vm13 = vcmask 130144   ;;  %vm87_vm14 = vcmask 97344  }
   0xb   :  { %37 = vrot.lane.b32.xlu2 %v106_v5, %s136_s23  ;;  %vm93_vm15 = vcmask 64544  }
  0x12   :  { %43 = vrot.lane.b32.xlu0 %v107_v6, %s137_s28  ;;  %49 = vrot.lane.b32.xlu1 %v108_v7, %s138_s29 }
  0x13   :  { %55 = vrot.lane.b32.xlu2 %v109_v8, %s139_s3 }
  0x1a   :  { %61 = vrot.lane.b32.xlu0 %v110_v9, %s140_s8  ;;  %67 = vrot.lane.b32.xlu1 %v111_v10, %s141_s9 }
  0x1b   :  { %73 = vrot.lane.b32.xlu2 %v112_v11, %s142_s12 }
  0x22   :  { %79 = vrot.lane.b32.xlu0 %v113_v12, %s143_s17  ;;  %85 = vrot.lane.b32.xlu1 %v114_v13, %s144_s18 }
  0x23   :  { %91 = vrot.lane.b32.xlu2 %v115_v14, %s145_s21 }
  0x5d   :  { %v32_v16 = vpop.permute.xlu2 %31  }
  0x65   :  { %v38_v17 = vpop.permute.xlu2 %37  }
  0x6d   :  { %v56_v18 = vpop.permute.xlu2 %55  }
  0x74   :  { %v8_v19 = vpop.permute.xlu0 %7   ;;  %v20_v20 = vpop.permute.xlu1 %19  }
  0x75   :  { %10 = vst.msk [vmem:[#allocation0] sm:$0x1] %vm9_vm1, %v8_v19   ;;  %v74_v21 = vpop.permute.xlu2 %73  }
  0x7c   :  { %v14_v22 = vpop.permute.xlu0 %13   ;;  %v26_v23 = vpop.permute.xlu1 %25  }
  0x7d   :  { %16 = vst.msk [vmem:[#allocation0] sm:$0x1] %vm15_vm2, %v14_v22   ;;  %v92_v24 = vpop.permute.xlu2 %91  }
  0x7e   :  { %22 = vst.msk [vmem:[#allocation0] sm:$0x1] %vm21_vm3, %v20_v20  }
  0x7f   :  { %28 = vst.msk [vmem:[#allocation0] sm:$0x1] %vm27_vm4, %v26_v23  }
  0x80   :  { %34 = vst.msk [vmem:[#allocation0] sm:$0x1] %vm33_vm5, %v32_v16  }
  0x81   :  { %40 = vst.msk [vmem:[#allocation0] sm:$0x1] %vm39_vm6, %v38_v17  }
  0x84   :  { %v44_v25 = vpop.permute.xlu0 %43   ;;  %v50_v26 = vpop.permute.xlu1 %49  }
  0x85   :  { %46 = vst.msk [vmem:[#allocation0] sm:$0x1] %vm45_vm7, %v44_v25  }
  0x86   :  { %52 = vst.msk [vmem:[#allocation0] sm:$0x1] %vm51_vm8, %v50_v26  }
  0x87   :  { %58 = vst.msk [vmem:[#allocation0] sm:$0x1] %vm57_vm9, %v56_v18  }
  0x8c   :  { %v62_v27 = vpop.permute.xlu0 %61   ;;  %v68_v28 = vpop.permute.xlu1 %67  }
  0x8d   :  { %64 = vst.msk [vmem:[#allocation0] sm:$0x1] %vm63_vm10, %v62_v27  }
  0x8e   :  { %70 = vst.msk [vmem:[#allocation0] sm:$0x1] %vm69_vm11, %v68_v28  }
  0x8f   :  { %76 = vst.msk [vmem:[#allocation0] sm:$0x1] %vm75_vm12, %v74_v21  }
  0x94   :  { %v80_v29 = vpop.permute.xlu0 %79   ;;  %v86_v30 = vpop.permute.xlu1 %85  }
  0x95   :  { %82 = vst.msk [vmem:[#allocation0] sm:$0x1] %vm81_vm13, %v80_v29  }
  0x96   :  { %88 = vst.msk [vmem:[#allocation0] sm:$0x1] %vm87_vm14, %v86_v30  }
  0x97   :  { %94 = vst.msk [vmem:[#allocation0] sm:$0x1] %vm93_vm15, %v92_v24  }
  0x9e   :  { %v97_v31 = vld [vmem:[#allocation0] sm:$0x1] }
  0x9f   :  { %100 = vst [vmem:[%s208_s1] sm:$0x1] %v97_v31 }

// kernel: tile.83
= control target key start
LH: loop header
LB: loop body
LE: loop exit
PB: predicated region body
PF: predicated region fallthrough
CT: control target
= control target key end

     0   :  { %s22_s0 = inlined_call_operand.vmem [shape: f32[8], index: 0, kind: input, shape index: {}]   ;;  %s23_s1 = inlined_call_operand.vmem [shape: f32[8,8], index: 1, kind: output, shape index: {}]  }
   0x1   :  { %v4_v0 = vld [vmem:[%s22_s0] ss:$0 sm:$0xff] }
   0x2   :  { %5 = vst [vmem:[%s23_s1] sm:$0xff] %v4_v0 }

// kernel: tile.88
= control target key start
LH: loop header
LB: loop body
LE: loop exit
PB: predicated region body
PF: predicated region fallthrough
CT: control target
= control target key end

     0   :  { %s67_s10 = smov 56   ;;  %s68_s11 = smov 40   ;;  %vm3_vm0 = vcmask 64512   ;;  %vm9_vm1 = vcmask 523712   ;;  %vm15_vm2 = vcmask 458112   ;;  %vm21_vm3 = vcmask 392512   ;;  %s111_s0 = inlined_call_operand.vmem [shape: f32[8,8], index: 0, kind: input, shape index: {}]   ;;  %s112_s1 = inlined_call_operand.vmem [shape: f32[1,64], index: 1, kind: output, shape index: {}]  }
   0x1   :  { %v53_v0 = vld [vmem:[%s111_s0 + $0x7] sm:$0x1]   ;;  %v55_v1 = vld [vmem:[%s111_s0 + $0x5] sm:$0x1]   ;;  %v57_v2 = vld [vmem:[%s111_s0 + $0x3] sm:$0x1]  }
   0x2   :  { %7 = vrot.lane.b32.xlu0 %v53_v0, %s67_s10  ;;  %19 = vrot.lane.b32.xlu1 %v55_v1, %s68_s11  ;;  %s69_s14 = smov 24   ;;  %v54_v3 = vld [vmem:[%s111_s0 + $0x6] sm:$0x1]   ;;  %v56_v4 = vld [vmem:[%s111_s0 + $0x4] sm:$0x1]   ;;  %s70_s21 = smov 48  }
   0x3   :  { %31 = vrot.lane.b32.xlu2 %v57_v2, %s69_s14  ;;  %v58_v5 = vld [vmem:[%s111_s0 + $0x2] sm:$0x1]   ;;  %s71_s22 = smov 32   ;;  %s72_s23 = smov 16   ;;  %v59_v6 = vld [vmem:[%s111_s0 + $0x1] sm:$0x1]  }
   0x4   :  { %s73_s26 = smov 8   ;;  %v2_v7 = vld [vmem:[%s111_s0] sm:$0x1]   ;;  %vm27_vm4 = vcmask 326912   ;;  %vm33_vm5 = vcmask 261312   ;;  %vm39_vm6 = vcmask 195712  }
   0x5   :  { %4 = vst.msk [vmem:[#allocation0] sm:$0x1] %vm3_vm0, %v2_v7   ;;  %vm45_vm7 = vcmask 130112  }
   0xa   :  { %13 = vrot.lane.b32.xlu0 %v54_v3, %s70_s21  ;;  %25 = vrot.lane.b32.xlu1 %v56_v4, %s71_s22 }
   0xb   :  { %37 = vrot.lane.b32.xlu2 %v58_v5, %s72_s23 }
  0x12   :  { %43 = vrot.lane.b32.xlu0 %v59_v6, %s73_s26 }
  0x5d   :  { %v32_v8 = vpop.permute.xlu2 %31  }
  0x65   :  { %v38_v9 = vpop.permute.xlu2 %37  }
  0x74   :  { %v8_v10 = vpop.permute.xlu0 %7   ;;  %v20_v11 = vpop.permute.xlu1 %19  }
  0x75   :  { %10 = vst.msk [vmem:[#allocation0] sm:$0x1] %vm9_vm1, %v8_v10  }
  0x7c   :  { %v14_v12 = vpop.permute.xlu0 %13   ;;  %v26_v13 = vpop.permute.xlu1 %25  }
  0x7d   :  { %16 = vst.msk [vmem:[#allocation0] sm:$0x1] %vm15_vm2, %v14_v12  }
  0x7e   :  { %22 = vst.msk [vmem:[#allocation0] sm:$0x1] %vm21_vm3, %v20_v11  }
  0x7f   :  { %28 = vst.msk [vmem:[#allocation0] sm:$0x1] %vm27_vm4, %v26_v13  }
  0x80   :  { %34 = vst.msk [vmem:[#allocation0] sm:$0x1] %vm33_vm5, %v32_v8  }
  0x81   :  { %40 = vst.msk [vmem:[#allocation0] sm:$0x1] %vm39_vm6, %v38_v9  }
  0x84   :  { %v44_v14 = vpop.permute.xlu0 %43  }
  0x85   :  { %46 = vst.msk [vmem:[#allocation0] sm:$0x1] %vm45_vm7, %v44_v14  }
  0x8c   :  { %v49_v15 = vld [vmem:[#allocation0] sm:$0x1] }
  0x8d   :  { %52 = vst [vmem:[%s112_s1] sm:$0x1] %v49_v15 }

// kernel: tile.103
= control target key start
LH: loop header
LB: loop body
LE: loop exit
PB: predicated region body
PF: predicated region fallthrough
CT: control target
= control target key end

     0   :  { %s22_s0 = inlined_call_operand.vmem [shape: f32[8], index: 0, kind: input, shape index: {}]   ;;  %s23_s1 = inlined_call_operand.vmem [shape: f32[4,8], index: 1, kind: output, shape index: {}]  }
   0x1   :  { %v4_v0 = vld [vmem:[%s22_s0] ss:$0 sm:$0xff] }
   0x2   :  { %5 = vst [vmem:[%s23_s1] sm:$0xf] %v4_v0 }

// kernel: tile.108
= control target key start
LH: loop header
LB: loop body
LE: loop exit
PB: predicated region body
PF: predicated region fallthrough
CT: control target
= control target key end

     0   :  { %s37_s8 = smov 8   ;;  %s38_s9 = smov 16   ;;  %vm7_vm0 = vcmask 64512   ;;  %vm13_vm1 = vcmask 261312   ;;  %vm19_vm2 = vcmask 195712   ;;  %vm25_vm3 = vcmask 130112   ;;  %s55_s0 = inlined_call_operand.vmem [shape: f32[4,8], index: 0, kind: input, shape index: {}]   ;;  %s56_s1 = inlined_call_operand.vmem [shape: f32[1,32], index: 1, kind: output, shape index: {}]  }
   0x1   :  { %v4_v0 = vld [vmem:[%s55_s0] sm:$0xf]  ;;  %s36_s0 = smov 24  }
   0x2   :  { %5 = vst [vmem:[#allocation1] sm:$0xf] %v4_v0 }
   0x9   :  { %v10_v1 = vld [vmem:[#allocation1 + $0x3] sm:$0x1]   ;;  %v22_v2 = vld [vmem:[#allocation1 + $0x1] sm:$0x1]   ;;  %v16_v3 = vld [vmem:[#allocation1 + $0x2] sm:$0x1]  }
   0xa   :  { %11 = vrot.lane.b32.xlu0 %v10_v1, %s36_s0  ;;  %23 = vrot.lane.b32.xlu1 %v22_v2, %s37_s8  ;;  %v6_v4 = vld [vmem:[#allocation1] sm:$0x1]  }
   0xb   :  { %8 = vst.msk [vmem:[#allocation0] sm:$0x1] %vm7_vm0, %v6_v4  }
  0x12   :  { %17 = vrot.lane.b32.xlu0 %v16_v3, %s38_s9 }
  0x7c   :  { %v12_v5 = vpop.permute.xlu0 %11   ;;  %v24_v6 = vpop.permute.xlu1 %23  }
  0x7d   :  { %14 = vst.msk [vmem:[#allocation0] sm:$0x1] %vm13_vm1, %v12_v5  }
  0x84   :  { %v18_v7 = vpop.permute.xlu0 %17  }
  0x85   :  { %20 = vst.msk [vmem:[#allocation0] sm:$0x1] %vm19_vm2, %v18_v7  }
  0x86   :  { %26 = vst.msk [vmem:[#allocation0] sm:$0x1] %vm25_vm3, %v24_v6  }
  0x8d   :  { %v29_v8 = vld [vmem:[#allocation0] sm:$0x1] }
  0x8e   :  { %32 = vst [vmem:[%s56_s1] sm:$0x1] %v29_v8 }

// kernel: localization_st_forward.1
= control target key start
LH: loop header
LB: loop body
LE: loop exit
PB: predicated region body
PF: predicated region fallthrough
CT: control target
= control target key end

     0   :  { %s3761_s6 = smov 1   ;;  %s3762_s10 = smov 2   ;;  %s4679_s0 = inlined_call_operand.smem [shape: u32[34], index: -1, kind: input, shape index: {}] }
   0x1   :  { %s3806_s5 = sld [smem:[%s4679_s0]]   ;;  %s3763_s14 = smov 3  }
   0x2   :  { %s3811_s9 = sld [smem:[%s4679_s0 + %s3761_s6]]   ;;  %s3764_s18 = smov 4  }
   0x3   :  { %s3816_s13 = sld [smem:[%s4679_s0 + %s3762_s10]]   ;;  %s3765_s22 = smov 5  }
   0x4   :  { %s3821_s17 = sld [smem:[%s4679_s0 + %s3763_s14]]   ;;  %s3766_s26 = smov 6  }
   0x5   :  { %s3826_s21 = sld [smem:[%s4679_s0 + %s3764_s18]]   ;;  %s3767_s30 = smov 7  }
   0x6   :  { %s3831_s25 = sld [smem:[%s4679_s0 + %s3765_s22]]   ;;  %s3768_s4 = smov 8  }
   0x7   :  { %s3836_s29 = sld [smem:[%s4679_s0 + %s3766_s26]]   ;;  %s3769_s10 = smov 9  }
   0x8   :  { %s3841_s3 = sld [smem:[%s4679_s0 + %s3767_s30]]   ;;  %s3770_s15 = smov 10  }
   0x9   :  { %s3846_s8 = sld [smem:[%s4679_s0 + %s3768_s4]]   ;;  %s3771_s20 = smov 11  }
   0xa   :  { %s3851_s14 = sld [smem:[%s4679_s0 + %s3769_s10]]   ;;  %s3772_s26 = smov 12  }
   0xb   :  { %s3856_s19 = sld [smem:[%s4679_s0 + %s3770_s15]]   ;;  %s3773_s1 = smov 13  }
   0xc   :  { %s3861_s24 = sld [smem:[%s4679_s0 + %s3771_s20]]   ;;  %s3774_s7 = smov 14  }
   0xd   :  { %s3866_s30 = sld [smem:[%s4679_s0 + %s3772_s26]]   ;;  %s3775_s15 = smov 15  }
   0xe   :  { %4698 = sst [smem:[#allocation11_spill]] %s3841_s3  ;;  %s3776_s22 = smov 16  }
   0xf   :  { %s3871_s6 = sld [smem:[%s4679_s0 + %s3773_s1]]   ;;  %s3777_s28 = smov 17  }
  0x10   :  { %s3876_s12 = sld [smem:[%s4679_s0 + %s3774_s7]]   ;;  %s3778_s7 = smov 18  }
  0x11   :  { %s3881_s20 = sld [smem:[%s4679_s0 + %s3775_s15]]   ;;  %s3779_s15 = smov 19  }
  0x12   :  { %s3886_s27 = sld [smem:[%s4679_s0 + %s3776_s22]]   ;;  %s3780_s22 = smov 20  }
  0x13   :  { %s3891_s4 = sld [smem:[%s4679_s0 + %s3777_s28]]   ;;  %s3781_s28 = smov 21  }
  0x16   :  { %4699 = sst [smem:[#allocation12_spill]] %s3876_s12 }
  0x17   :  { %4700 = sst [smem:[#allocation13_spill]] %s3881_s20 }
  0x18   :  { %4701 = sst [smem:[#allocation14_spill]] %s3886_s27 }
  0x19   :  { %4702 = sst [smem:[#allocation15_spill]] %s3891_s4 }
  0x1a   :  { %s3896_s12 = sld [smem:[%s4679_s0 + %s3778_s7]]   ;;  %s3782_s7 = smov 22  }
  0x1b   :  { %s3901_s20 = sld [smem:[%s4679_s0 + %s3779_s15]]   ;;  %s3783_s15 = smov 23  }
  0x1c   :  { %s3906_s27 = sld [smem:[%s4679_s0 + %s3780_s22]]   ;;  %s3784_s22 = smov 24  }
  0x1d   :  { %s3911_s4 = sld [smem:[%s4679_s0 + %s3781_s28]]   ;;  %s3785_s28 = smov 25  }
  0x20   :  { %4703 = sst [smem:[#allocation16_spill]] %s3896_s12 }
  0x21   :  { %4704 = sst [smem:[#allocation17_spill]] %s3901_s20 }
  0x22   :  { %4705 = sst [smem:[#allocation18_spill]] %s3906_s27 }
  0x23   :  { %4706 = sst [smem:[#allocation19_spill]] %s3911_s4 }
  0x24   :  { %s3916_s12 = sld [smem:[%s4679_s0 + %s3782_s7]]   ;;  %s3786_s7 = smov 26  }
  0x25   :  { %s3921_s20 = sld [smem:[%s4679_s0 + %s3783_s15]]   ;;  %s3787_s15 = smov 27  }
  0x26   :  { %s3926_s27 = sld [smem:[%s4679_s0 + %s3784_s22]]   ;;  %s3788_s22 = smov 28  }
  0x27   :  { %s3931_s4 = sld [smem:[%s4679_s0 + %s3785_s28]]   ;;  %s3789_s28 = smov 29  }
  0x2a   :  { %4707 = sst [smem:[#allocation20_spill]] %s3916_s12 }
  0x2b   :  { %4708 = sst [smem:[#allocation21_spill]] %s3921_s20 }
  0x2c   :  { %4709 = sst [smem:[#allocation22_spill]] %s3926_s27 }
  0x2d   :  { %4710 = sst [smem:[#allocation23_spill]] %s3931_s4 }
  0x2e   :  { %s3936_s12 = sld [smem:[%s4679_s0 + %s3786_s7]]   ;;  %s3790_s7 = smov 30  }
  0x2f   :  { %s3941_s20 = sld [smem:[%s4679_s0 + %s3787_s15]]   ;;  %s3791_s15 = smov 31  }
  0x30   :  { %s3946_s27 = sld [smem:[%s4679_s0 + %s3788_s22]]   ;;  %s3792_s22 = smov 32  }
  0x31   :  { %s3951_s4 = sld [smem:[%s4679_s0 + %s3789_s28]]   ;;  %s3793_s28 = smov 33  }
  0x34   :  { %4711 = sst [smem:[#allocation24_spill]] %s3936_s12 }
  0x35   :  { %4712 = sst [smem:[#allocation25_spill]] %s3941_s20 }
  0x36   :  { %4713 = sst [smem:[#allocation26_spill]] %s3946_s27 }
  0x37   :  { %4714 = sst [smem:[#allocation27_spill]] %s3951_s4 }
  0x38   :  { %s3956_s12 = sld [smem:[%s4679_s0 + %s3790_s7]]   ;;  %s3973_s7 = smov 0  }
  0x39   :  { %s3961_s20 = sld [smem:[%s4679_s0 + %s3791_s15]]  }
  0x3a   :  { %s3966_s27 = sld [smem:[%s4679_s0 + %s3792_s22]]  }
  0x3b   :  { %s3971_s4 = sld [smem:[%s4679_s0 + %s3793_s28]]  }
  0x3c LB: > { %s4715_s3 = sld [smem:[#allocation11_spill]]  ;;  %s3466_s10 = sadd.s32 4294967295, %s3759_s7   ;;  %s3759_s7 = sphi %s3973_s7, %s78_s7  }
  0x3d   : > { %p3470_p0 = scmp.ge.s32.totalorder %s3759_s7, 1  ;;  %p924_p1 = scmp.lt.s32.totalorder %s3759_s7, 3 }
  0x3f   : > { %p925_p2 = pnand %p3470_p0, %p924_p1 }
  0x40   : > { %p1010_p3 = scmp.lt.s32.totalorder (!%p925_p2), %s3466_s10, 1  ;;  %s4716_s15 = sld [smem:[#allocation12_spill]] (!%p925_p2) }
  0x41   : > { %928 = sbr.rel (%p925_p2) target bundleno = 2625 (0xa41), region = 148  ;;  %s4717_s16 = sld [smem:[#allocation13_spill]] (!%p925_p2) }
  0x42   : > { %s4718_s18 = sld [smem:[#allocation15_spill]] (!%p925_p2)  ;;  %s3796_s1 = smov (!%p925_p2), 64  }
  0x43   : > { %s4719_s22 = sld [smem:[#allocation14_spill]] (!%p925_p2)  ;;  %s3797_s2 = smov (!%p925_p2), 32  }
  0x44   : > { %s4720_s23 = sld [smem:[#allocation16_spill]] (!%p925_p2) }
  0x45   : > { %s4721_s26 = sld [smem:[#allocation18_spill]] (!%p925_p2) }
  0x46   : > { %v1113_v0 = vld [vmem:[%s3816_s13 + $0x78] sm:$0xff]  ;;  %v1112_v1 = vld [vmem:[%s3816_s13 + $0x70] sm:$0xff]  ;;  %v1110_v2 = vld [vmem:[%s3816_s13 + $0x60] sm:$0xff]  ;;  %v3794_v3 = vmov 0   ;;  %s4733_s10 = smov (!%p1010_p3, %s3466_s10), 1  ;;  %vm1224_vm0 = vcmask 523264  }
  0x47   : > { %3737 = vset.pattern.permute.xlu2 %v3794_v3  ;;  %3736 = vset.pattern.permute.xlu1 %v3794_v3  ;;  %v1111_v4 = vld [vmem:[%s3816_s13 + $0x68] sm:$0xff]  ;;  %v1114_v5 = vld [vmem:[%s3816_s13 + $0x80] sm:$0xff]  ;;  %v1109_v6 = vld [vmem:[%s3816_s13 + $0x58] sm:$0xff]  ;;  %s3689_s0 = smul.u32 144, %s4733_s10  ;;  %vm1384_vm1 = vcmask 1045504   ;;  %vm1353_vm2 = vcmask 113664  }
  0x48   : > { %3735 = vset.pattern.permute.xlu0 %v3794_v3  ;;  %1188 = vperm.xlu1 %3736, %v1112_v1   ;;  %v1107_v7 = vld [vmem:[%s3816_s13 + $0x48] sm:$0xff]  ;;  %v1108_v8 = vld [vmem:[%s3816_s13 + $0x50] sm:$0xff]  ;;  %v1106_v9 = vld [vmem:[%s3816_s13 + $0x40] sm:$0xff]  ;;  %vm2251_vm3 = vcmask 522240   ;;  %vm2262_vm4 = vcmask 521216   ;;  %vm2339_vm5 = vcmask 1044480  }
  0x49   : > { %1193 = vperm.xlu0 %3735, %v1113_v0   ;;  %1178 = vperm.xlu2 %3737, %v1110_v2   ;;  %v1104_v10 = vld [vmem:[%s3816_s13 + $0x30] sm:$0xff]  ;;  %v1105_v11 = vld [vmem:[%s3816_s13 + $0x38] sm:$0xff]  ;;  %v1103_v12 = vld [vmem:[%s3816_s13 + $0x28] sm:$0xff]  ;;  %s4019_s11 = scalar_lea.vmem %s3806_s5, %s3689_s0  ;;  %vm2320_vm6 = vcmask 629760   ;;  %vm2731_vm7 = vcmask 261120   ;;  %vm2737_vm8 = vcmask 259072  }
  0x4a   : > { %v1101_v13 = vld [vmem:[%s3816_s13 + $0x18] sm:$0xff]  ;;  %v1102_v14 = vld [vmem:[%s3816_s13 + $0x20] sm:$0xff]  ;;  %v1100_v15 = vld [vmem:[%s3816_s13 + $0x10] sm:$0xff]  ;;  %vm2821_vm9 = vcmask 367616   ;;  %s4722_s28 = sld [smem:[#allocation17_spill]]  ;;  %vm2939_vm10 = vcmask 785408  }
  0x4b   : > { %v1115_v16 = vld [vmem:[%s3816_s13 + $0x88] sm:$0xff]  ;;  %v1098_v18 = vld [vmem:[%s3816_s13] sm:$0xff]  ;;  %v1763_v21 = vld [vmem:[%s3846_s8 + $0x10] sm:$0xff]  ;;  %s4723_s0 = sld [smem:[#allocation21_spill]]  ;;  %vm2972_vm11 = vcmask 779264   ;;  %vm2888_vm12 = vcmask 523520  }
  0x4c   : > { %v1099_v17 = vld [vmem:[%s3816_s13 + $0x8] sm:$0xff]  ;;  %v1761_v20 = vld [vmem:[%s3846_s8] sm:$0xff]  ;;  %v1764_v23 = vld [vmem:[%s3846_s8 + $0x18] sm:$0xff]  ;;  %vm2924_vm13 = vcmask 785920   ;;  %vm2981_vm14 = vcmask 64512   ;;  %vm3005_vm15 = vcmask 783360  }
  0x4d   : > { %v1762_v19 = vld [vmem:[%s3846_s8 + $0x8] sm:$0xff]  ;;  %v1765_v22 = vld [vmem:[%s3846_s8 + $0x20] sm:$0xff]  ;;  %v1768_v25 = vld [vmem:[%s3846_s8 + $0x38] sm:$0xff] }
  0x4e   : > { %v1766_v24 = vld [vmem:[%s3846_s8 + $0x28] sm:$0xff]  ;;  %v1767_v26 = vld [vmem:[%s3846_s8 + $0x30] sm:$0xff]  ;;  %v1769_v27 = vld [vmem:[%s3846_s8 + $0x40] sm:$0xff] }
  0x4f   : > { %v2180_v28 = vld [vmem:[%s3861_s24 + $0x40] sm:$0xff]  ;;  %v1770_v29 = vld [vmem:[%s3846_s8 + $0x48] sm:$0xff]  ;;  %v2178_v32 = vld [vmem:[%s3861_s24 + $0x30] sm:$0xff] }
  0x50   : > { %1183 = vperm.xlu1 %3736, %v1111_v4   ;;  %v2181_v30 = vld [vmem:[%s3861_s24 + $0x48] sm:$0x3f]  ;;  %v4022_v31 = vld [vmem:[%s3811_s9] ss:$0 sm:$0xff]  ;;  %v2179_v34 = vld [vmem:[%s3861_s24 + $0x38] sm:$0xff] }
  0x51   : > { %1198 = vperm.xlu0 %3735, %v1114_v5   ;;  %1173 = vperm.xlu2 %3737, %v1109_v6   ;;  %v1034_v33 = vld [vmem:[%s4019_s11 + $0x60] sm:$0xff]  ;;  %v2177_v35 = vld [vmem:[%s3861_s24 + $0x28] sm:$0xff]  ;;  %v2175_v39 = vld [vmem:[%s3861_s24 + $0x18] sm:$0xff] }
  0x52   : > { %v1054_v36 = vmul.f32 %v4022_v31, %v1034_v33  ;;  %v4030_v37 = vld [vmem:[%s3811_s9 + $0x1] ss:$0 sm:$0xff]  ;;  %v1033_v40 = vld [vmem:[%s4019_s11 + $0x58] sm:$0xff]  ;;  %v2174_v42 = vld [vmem:[%s3861_s24 + $0x10] sm:$0xff] }
  0x53   : > { %v2176_v41 = vld [vmem:[%s3861_s24 + $0x20] sm:$0xff]  ;;  %v1053_v44 = vmul.f32 %v4022_v31, %v1033_v40  ;;  %v2173_v50 = vld [vmem:[%s3861_s24 + $0x8] sm:$0xff]  ;;  %v1036_v56 = vld [vmem:[%s4019_s11 + $0x70] sm:$0xff] }
  0x54   : > { %v1074_v38 = vadd.f32 %v4030_v37, %v1054_v36  ;;  %v2172_v48 = vld [vmem:[%s3861_s24] sm:$0xff]  ;;  %v1037_v57 = vld [vmem:[%s4019_s11 + $0x78] sm:$0xff]  ;;  %v1027_v58 = vld [vmem:[%s4019_s11 + $0x28] sm:$0xff]  ;;  %v1056_v59 = vmul.f32 %v4022_v31, %v1036_v56 }
  0x55   : > { %v1073_v47 = vadd.f32 %v4030_v37, %v1053_v44  ;;  %v1030_v49 = vld [vmem:[%s4019_s11 + $0x40] sm:$0xff]  ;;  %v1057_v61 = vmul.f32 %v4022_v31, %v1037_v57  ;;  %v1047_v62 = vmul.f32 %v4022_v31, %v1027_v58  ;;  %v1035_v4 = vld [vmem:[%s4019_s11 + $0x68] sm:$0xff]  ;;  %v1024_v6 = vld [vmem:[%s4019_s11 + $0x10] sm:$0xff] }
  0x56   : > { %v1092_v43 = vmax.f32 %v1074_v38, 0.0  ;;  %v1050_v52 = vmul.f32 %v4022_v31, %v1030_v49  ;;  %v1076_v0 = vadd.f32 %v4030_v37, %v1056_v59  ;;  %v1038_v5 = vld [vmem:[%s4019_s11 + $0x80] sm:$0xff]  ;;  %v1029_v49 = vld [vmem:[%s4019_s11 + $0x38] sm:$0xff] }
  0x57   : > { %v1091_v51 = vmax.f32 %v1073_v47, 0.0  ;;  %v1077_v2 = vadd.f32 %v4030_v37, %v1057_v61  ;;  %v1067_v3 = vadd.f32 %v4030_v37, %v1047_v62 }
  0x58   : > { %1163 = vperm.xlu1 %3736, %v1107_v7   ;;  %v1070_v55 = vadd.f32 %v4030_v37, %v1050_v52  ;;  %v1094_v7 = vmax.f32 %v1076_v0, 0.0 }
  0x59   : > { %1168 = vperm.xlu0 %3735, %v1108_v8   ;;  %1158 = vperm.xlu2 %3737, %v1106_v9   ;;  %v1055_v8 = vmul.f32 %v4022_v31, %v1035_v4  ;;  %v1095_v9 = vmax.f32 %v1077_v2, 0.0  ;;  %v1026_v2 = vld [vmem:[%s4019_s11 + $0x20] sm:$0xff] }
  0x5a   : > { %v1088_v60 = vmax.f32 %v1070_v55, 0.0 }
  0x60   : > { %1148 = vperm.xlu1 %3736, %v1104_v10   ;;  %v1085_v10 = vmax.f32 %v1067_v3, 0.0  ;;  %v1025_v3 = vld [vmem:[%s4019_s11 + $0x18] sm:$0xff] }
  0x61   : > { %1153 = vperm.xlu0 %3735, %v1105_v11   ;;  %1143 = vperm.xlu2 %3737, %v1103_v12   ;;  %v1058_v11 = vmul.f32 %v4022_v31, %v1038_v5  ;;  %v1044_v12 = vmul.f32 %v4022_v31, %v1024_v6 }
  0x68   : > { %1133 = vperm.xlu1 %3736, %v1101_v13  }
  0x69   : > { %1138 = vperm.xlu0 %3735, %v1102_v14   ;;  %1128 = vperm.xlu2 %3737, %v1100_v15  }
  0x70   : > { %1203 = vperm.xlu1 %3736, %v1115_v16  }
  0x71   : > { %1123 = vperm.xlu0 %3735, %v1099_v17   ;;  %1118 = vperm.xlu2 %3737, %v1098_v18   ;;  %v1075_v17 = vadd.f32 %v4030_v37, %v1055_v8 }
  0x78   : > { %1778 = vperm.xlu1 %3736, %v1762_v19  }
  0x79   : > { %1773 = vperm.xlu0 %3735, %v1761_v20   ;;  %1783 = vperm.xlu2 %3737, %v1763_v21   ;;  %v1078_v20 = vadd.f32 %v4030_v37, %v1058_v11  ;;  %v1064_v21 = vadd.f32 %v4030_v37, %v1044_v12  ;;  %v1045_v12 = vmul.f32 %v4022_v31, %v1025_v3 }
  0x7b   : > { %v1082_v33 = vmax.f32 %v1064_v21, 0.0 }
  0x80   : > { %1793 = vperm.xlu1 %3736, %v1765_v22   ;;  %v1031_v22 = vld [vmem:[%s4019_s11 + $0x48] sm:$0xff] }
  0x81   : > { %1788 = vperm.xlu0 %3735, %v1764_v23   ;;  %1798 = vperm.xlu2 %3737, %v1766_v24   ;;  %v1032_v23 = vld [vmem:[%s4019_s11 + $0x50] sm:$0xff]  ;;  %v1022_v24 = vld [vmem:[%s4019_s11] sm:$0xff] }
  0x88   : > { %1808 = vperm.xlu1 %3736, %v1768_v25   ;;  %v1039_v25 = vld [vmem:[%s4019_s11 + $0x88] sm:$0xff] }
  0x89   : > { %1803 = vperm.xlu0 %3735, %v1767_v26   ;;  %1813 = vperm.xlu2 %3737, %v1769_v27   ;;  %v1023_v26 = vld [vmem:[%s4019_s11 + $0x8] sm:$0xff]  ;;  %v1093_v27 = vmax.f32 %v1075_v17, 0.0  ;;  %v1046_v17 = vmul.f32 %v4022_v31, %v1026_v2 }
  0x90   : > { %2224 = vperm.xlu1 %3736, %v2180_v28   ;;  %v1051_v28 = vmul.f32 %v4022_v31, %v1031_v22 }
  0x91   : > { %1818 = vperm.xlu0 %3735, %v1770_v29   ;;  %2229 = vperm.xlu2 %3737, %v2181_v30   ;;  %v1059_v29 = vmul.f32 %v4022_v31, %v1039_v25  ;;  %v1043_v30 = vmul.f32 %v4022_v31, %v1023_v26 }
  0x93   : > { %v4079_v36 = vadd.f32 %v4030_v37, %v1059_v29  ;;  %v4082_v38 = vadd.f32 %v4030_v37, %v1043_v30 }
  0x95   : > { %v1097_v2 = vmax.f32 %v4079_v36, 0.0 }
  0x98   : > { %2214 = vperm.xlu1 %3736, %v2178_v32   ;;  %v1096_v32 = vmax.f32 %v1078_v20, 0.0 }
  0x99   : > { %2219 = vperm.xlu0 %3735, %v2179_v34   ;;  %2209 = vperm.xlu2 %3737, %v2177_v35   ;;  %v1052_v34 = vmul.f32 %v4022_v31, %v1032_v23  ;;  %v1042_v35 = vmul.f32 %v4022_v31, %v1022_v24 }
  0x9b   : > { %v1062_v47 = vadd.f32 %v4030_v37, %v1042_v35 }
  0xa0   : > { %2199 = vperm.xlu1 %3736, %v2175_v39  }
  0xa1   : > { %2204 = vperm.xlu0 %3735, %v2176_v41   ;;  %2194 = vperm.xlu2 %3737, %v2174_v42  }
  0xa3   : > { %v1179_v45 = vpop.permute.xlu2 %1178 }
  0xa4   : > { %v1218_v46 = vmul.f32 %v1179_v45, %v1092_v43  ;;  %v1071_v43 = vadd.f32 %v4030_v37, %v1051_v28 }
  0xa6   : > { %1237 = vst.msk [vmem:[#allocation2 + $0x60] sm:$0xff] %vm1224_vm0, %v1218_v46  ;;  %v1072_v46 = vadd.f32 %v4030_v37, %v1052_v34 }
  0xa8   : > { %2184 = vperm.xlu1 %3736, %v2172_v48   ;;  %v1028_v48 = vld [vmem:[%s4019_s11 + $0x30] sm:$0xff]  ;;  %v1090_v52 = vmax.f32 %v1072_v46, 0.0  ;;  %s4724_s11 = sld [smem:[#allocation20_spill]] }
  0xa9   : > { %2189 = vperm.xlu0 %3735, %v2173_v50   ;;  %v1089_v50 = vmax.f32 %v1071_v43, 0.0 }
  0xab   : > { %v1174_v53 = vpop.permute.xlu2 %1173 }
  0xac   : > { %v1217_v54 = vmul.f32 %v1174_v53, %v1091_v51  ;;  %v1048_v51 = vmul.f32 %v4022_v31, %v1028_v48  ;;  %v1080_v53 = vmax.f32 %v1062_v47, 0.0 }
  0xae   : > { %1236 = vst.msk [vmem:[#allocation2 + $0x58] sm:$0xff] %vm1224_vm0, %v1217_v54  ;;  %v1049_v54 = vmul.f32 %v4022_v31, %v1029_v49  ;;  %v1068_v59 = vadd.f32 %v4030_v37, %v1048_v51  ;;  %v1066_v31 = vadd.f32 %v4030_v37, %v1046_v17 }
  0xb0   : > { %v1084_v46 = vmax.f32 %v1066_v31, 0.0 }
  0xb3   : > { %v1159_v63 = vpop.permute.xlu2 %1158 }
  0xb4   : > { %v1214_v1 = vmul.f32 %v1159_v63, %v1088_v60 }
  0xb5   : > { %v1272_v20 = vld [vmem:[#allocation2 + $0x59] sm:$0xff] }
  0xb6   : > { %1233 = vst.msk [vmem:[#allocation2 + $0x40] sm:$0xff] %vm1224_vm0, %v1214_v1  ;;  %v1069_v1 = vadd.f32 %v4030_v37, %v1049_v54 }
  0xba   : > { %v1189_v13 = vpop.permute.xlu1 %1188 }
  0xbb   : > { %v1194_v14 = vpop.permute.xlu0 %1193  ;;  %v1220_v15 = vmul.f32 %v1189_v13, %v1094_v7  ;;  %v1144_v16 = vpop.permute.xlu2 %1143 }
  0xbc   : > { %v1221_v18 = vmul.f32 %v1194_v14, %v1095_v9  ;;  %v1211_v19 = vmul.f32 %v1144_v16, %v1085_v10  ;;  %v1086_v10 = vmax.f32 %v1068_v59, 0.0  ;;  %v1087_v14 = vmax.f32 %v1069_v1, 0.0  ;;  %v1255_v16 = vld [vmem:[#allocation2 + $0x60] sm:$0xff] }
  0xbd   : > { %1239 = vst.msk [vmem:[#allocation2 + $0x70] sm:$0xff] %vm1224_vm0, %v1220_v15  ;;  %v1251_v49 = vld [vmem:[#allocation2 + $0x40] sm:$0xff] }
  0xbe   : > { %1240 = vst.msk [vmem:[#allocation2 + $0x78] sm:$0xff] %vm1224_vm0, %v1221_v18 }
  0xbf   : > { %1230 = vst.msk [vmem:[#allocation2 + $0x28] sm:$0xff] %vm1224_vm0, %v1211_v19  ;;  %v1254_v19 = vld [vmem:[#allocation2 + $0x58] sm:$0xff] }
  0xc2   : > { %v1184_v39 = vpop.permute.xlu1 %1183 }
  0xc3   : > { %v1199_v40 = vpop.permute.xlu0 %1198  ;;  %v1219_v41 = vmul.f32 %v1184_v39, %v1093_v27  ;;  %v1129_v42 = vpop.permute.xlu2 %1128  ;;  %v1065_v27 = vadd.f32 %v4030_v37, %v1045_v12 }
  0xc4   : > { %v1222_v44 = vmul.f32 %v1199_v40, %v1096_v32  ;;  %v1208_v45 = vmul.f32 %v1129_v42, %v1082_v33  ;;  %v1257_v60 = vld [vmem:[#allocation2 + $0x70] sm:$0xff]  ;;  %v1290_v32 = vmax.f32 %v1254_v19, %v1272_v20  ;;  %v1308_v33 = vld [vmem:[#allocation2 + $0x5a] sm:$0xff] }
  0xc5   : > { %1238 = vst.msk [vmem:[#allocation2 + $0x68] sm:$0xff] %vm1224_vm0, %v1219_v41  ;;  %v1275_v61 = vld [vmem:[#allocation2 + $0x71] sm:$0xff]  ;;  %v1083_v43 = vmax.f32 %v1065_v27, 0.0 }
  0xc6   : > { %1241 = vst.msk [vmem:[#allocation2 + $0x80] sm:$0xff] %vm1224_vm0, %v1222_v44  ;;  %v1258_v0 = vld [vmem:[#allocation2 + $0x78] sm:$0xff]  ;;  %v1293_v8 = vmax.f32 %v1257_v60, %v1275_v61 }
  0xc7   : > { %1227 = vst.msk [vmem:[#allocation2 + $0x10] sm:$0xff] %vm1224_vm0, %v1208_v45  ;;  %v1311_v18 = vld [vmem:[#allocation2 + $0x72] sm:$0xff]  ;;  %v1326_v45 = vmax.f32 %v1290_v32, %v1308_v33 }
  0xc8   : > { %v1329_v22 = vmax.f32 %v1293_v8, %v1311_v18 }
  0xca   : > { %v1164_v55 = vpop.permute.xlu1 %1163 }
  0xcb   : > { %v1169_v56 = vpop.permute.xlu0 %1168  ;;  %v1215_v57 = vmul.f32 %v1164_v55, %v1089_v50  ;;  %v1119_v58 = vpop.permute.xlu2 %1118 }
  0xcc   : > { %v1216_v62 = vmul.f32 %v1169_v56, %v1090_v52  ;;  %v1206_v63 = vmul.f32 %v1119_v58, %v1080_v53  ;;  %v1256_v5 = vld [vmem:[#allocation2 + $0x68] sm:$0xff] }
  0xcd   : > { %1234 = vst.msk [vmem:[#allocation2 + $0x48] sm:$0xff] %vm1224_vm0, %v1215_v57  ;;  %v1276_v4 = vld [vmem:[#allocation2 + $0x79] sm:$0xff]  ;;  %v1274_v6 = vld [vmem:[#allocation2 + $0x69] sm:$0xff]  ;;  %v1273_v11 = vld [vmem:[#allocation2 + $0x61] sm:$0xff] }
  0xce   : > { %1235 = vst.msk [vmem:[#allocation2 + $0x50] sm:$0xff] %vm1224_vm0, %v1216_v62  ;;  %v1294_v7 = vmax.f32 %v1258_v0, %v1276_v4  ;;  %v1312_v9 = vld [vmem:[#allocation2 + $0x7a] sm:$0xff]  ;;  %v1292_v15 = vmax.f32 %v1256_v5, %v1274_v6  ;;  %v1291_v23 = vmax.f32 %v1255_v16, %v1273_v11  ;;  %v1310_v26 = vld [vmem:[#allocation2 + $0x6a] sm:$0xff]  ;;  %v1309_v30 = vld [vmem:[#allocation2 + $0x62] sm:$0xff]  ;;  %v1081_v6 = vmax.f32 %v4082_v38, 0.0 }
  0xcf   : > { %1225 = vst.msk [vmem:[#allocation2] sm:$0xff] %vm1224_vm0, %v1206_v63  ;;  %v1248_v4 = vld [vmem:[#allocation2 + $0x28] sm:$0xff]  ;;  %v1259_v32 = vld [vmem:[#allocation2 + $0x80] sm:$0xff] }
  0xd0   : > { %v1330_v13 = vmax.f32 %v1294_v7, %v1312_v9  ;;  %v1328_v29 = vmax.f32 %v1292_v15, %v1310_v26  ;;  %v1327_v40 = vmax.f32 %v1291_v23, %v1309_v30 }
  0xd2   : > { %1388 = vmatpush.msra.mxu0 %v1330_v13  ;;  %v1149_v21 = vpop.permute.xlu1 %1148 }
  0xd3   : > { %v1154_v24 = vpop.permute.xlu0 %1153  ;;  %v1212_v25 = vmul.f32 %v1149_v21, %v1086_v10 }
  0xd4   : > { %v1213_v28 = vmul.f32 %v1154_v24, %v1087_v14  ;;  %1389 = vmatpush.msra.mxu0 %v1329_v22  ;;  %v1252_v39 = vld [vmem:[#allocation2 + $0x48] sm:$0xff]  ;;  %v1245_v22 = vld [vmem:[#allocation2 + $0x10] sm:$0xff] }
  0xd5   : > { %1231 = vst.msk [vmem:[#allocation2 + $0x30] sm:$0xff] %vm1224_vm0, %v1212_v25  ;;  %v1253_v34 = vld [vmem:[#allocation2 + $0x50] sm:$0xff]  ;;  %v1269_v44 = vld [vmem:[#allocation2 + $0x41] sm:$0xff] }
  0xd6   : > { %v1271_v35 = vld [vmem:[#allocation2 + $0x51] sm:$0xff]  ;;  %1232 = vst.msk [vmem:[#allocation2 + $0x38] sm:$0xff] %vm1224_vm0, %v1213_v28  ;;  %1390 = vmatpush.msra.mxu0 %v1328_v29  ;;  %v1270_v42 = vld [vmem:[#allocation2 + $0x49] sm:$0xff]  ;;  %v1287_v51 = vmax.f32 %v1251_v49, %v1269_v44 }
  0xd7   : > { %v1289_v41 = vmax.f32 %v1253_v34, %v1271_v35  ;;  %v1288_v47 = vmax.f32 %v1252_v39, %v1270_v42  ;;  %v1307_v48 = vld [vmem:[#allocation2 + $0x52] sm:$0xff]  ;;  %v1306_v54 = vld [vmem:[#allocation2 + $0x4a] sm:$0xff]  ;;  %v1305_v57 = vld [vmem:[#allocation2 + $0x42] sm:$0xff] }
  0xd8   : > { %1391 = vmatpush.msra.mxu0 %v1327_v40  ;;  %v1323_v62 = vmax.f32 %v1287_v51, %v1305_v57  ;;  %v1243_v35 = vld [vmem:[#allocation2] sm:$0xff]  ;;  %v1340_v57 = vld [vmem:[%s3821_s17 + $0x38] sm:$0xff] }
  0xd9   : > { %v1325_v50 = vmax.f32 %v1289_v41, %v1307_v48  ;;  %v1324_v56 = vmax.f32 %v1288_v47, %v1306_v54  ;;  %v1335_v54 = vld [vmem:[%s3821_s17 + $0x10] sm:$0xff] }
  0xda   : > { %1392 = vmatpush.msra.mxu0 %v1326_v45  ;;  %v1134_v37 = vpop.permute.xlu1 %1133 }
  0xdb   : > { %v1139_v52 = vpop.permute.xlu0 %1138  ;;  %v1209_v53 = vmul.f32 %v1134_v37, %v1083_v43 }
  0xdc   : > { %v1210_v55 = vmul.f32 %v1139_v52, %v1084_v46  ;;  %1393 = vmatpush.msra.mxu0 %v1325_v50  ;;  %v1249_v58 = vld [vmem:[#allocation2 + $0x30] sm:$0xff]  ;;  %v1334_v50 = vld [vmem:[%s3821_s17 + $0x8] sm:$0xff]  ;;  %v1333_v52 = vld [vmem:[%s3821_s17] sm:$0xff] }
  0xdd   : > { %1228 = vst.msk [vmem:[#allocation2 + $0x18] sm:$0xff] %vm1224_vm0, %v1209_v53  ;;  %v1250_v59 = vld [vmem:[#allocation2 + $0x38] sm:$0xff]  ;;  %v1266_v61 = vld [vmem:[#allocation2 + $0x29] sm:$0xff] }
  0xde   : > { %v1268_v60 = vld [vmem:[#allocation2 + $0x39] sm:$0xff]  ;;  %1229 = vst.msk [vmem:[#allocation2 + $0x20] sm:$0xff] %vm1224_vm0, %v1210_v55  ;;  %1394 = vmatpush.msra.mxu0 %v1324_v56  ;;  %v1267_v0 = vld [vmem:[#allocation2 + $0x31] sm:$0xff]  ;;  %v1284_v7 = vmax.f32 %v1248_v4, %v1266_v61  ;;  %v1338_v55 = vld [vmem:[%s3821_s17 + $0x28] sm:$0xff] }
  0xdf   : > { %v1286_v63 = vmax.f32 %v1250_v59, %v1268_v60  ;;  %v1304_v1 = vld [vmem:[#allocation2 + $0x3a] sm:$0xff]  ;;  %v1285_v3 = vmax.f32 %v1249_v58, %v1267_v0  ;;  %v1303_v8 = vld [vmem:[#allocation2 + $0x32] sm:$0xff]  ;;  %v1302_v13 = vld [vmem:[#allocation2 + $0x2a] sm:$0xff] }
  0xe0   : > { %1395 = vmatpush.msra.mxu0 %v1323_v62  ;;  %v1320_v15 = vmax.f32 %v1284_v7, %v1302_v13  ;;  %v1336_v53 = vld [vmem:[%s3821_s17 + $0x18] sm:$0xff]  ;;  %v1337_v56 = vld [vmem:[%s3821_s17 + $0x20] sm:$0xff]  ;;  %v1339_v58 = vld [vmem:[%s3821_s17 + $0x30] sm:$0xff] }
  0xe1   : > { %v1322_v5 = vmax.f32 %v1286_v63, %v1304_v1  ;;  %v1321_v10 = vmax.f32 %v1285_v3, %v1303_v8  ;;  %v1342_v59 = vld [vmem:[%s3821_s17 + $0x48] sm:$0xff]  ;;  %v1341_v60 = vld [vmem:[%s3821_s17 + $0x40] sm:$0xff]  ;;  %v1344_v61 = vld [vmem:[%s3821_s17 + $0x58] sm:$0xff] }
  0xe2   : > { %v1204_v9 = vpop.permute.xlu1 %1203  ;;  %v1343_v62 = vld [vmem:[%s3821_s17 + $0x50] sm:$0xff]  ;;  %v1489_v63 = vld [vmem:[%s3826_s21 + $0x38] sm:$0xff]  ;;  %v1487_v3 = vld [vmem:[%s3826_s21 + $0x28] sm:$0xff] }
  0xe3   : > { %1396 = vmatpush.msra.mxu0 %v1322_v5  ;;  %v1223_v11 = vmul.f32 %v1204_v9, %v1097_v2  ;;  %v1124_v12 = vpop.permute.xlu0 %1123  ;;  %v1584_v0 = vld [vmem:[%s3831_s25 + $0x38] sm:$0xff]  ;;  %1528 = vmatpush.msra.mxu2 %v1489_v63  ;;  %v1488_v1 = vld [vmem:[%s3826_s21 + $0x30] sm:$0xff]  ;;  %v1582_v4 = vld [vmem:[%s3831_s25 + $0x28] sm:$0xff] }
  0xe4   : > { %v1207_v14 = vmul.f32 %v1124_v12, %v1081_v6  ;;  %v1246_v16 = vld [vmem:[#allocation2 + $0x18] sm:$0xff]  ;;  %1593 = vmatpush.msra.mxu3 %v1584_v0  ;;  %v1583_v2 = vld [vmem:[%s3831_s25 + $0x30] sm:$0xff]  ;;  %v1346_v5 = vld [vmem:[%s3821_s17 + $0x68] sm:$0xff] }
  0xe5   : > { %1397 = vmatpush.msra.mxu0 %v1321_v10  ;;  %1242 = vst.msk [vmem:[#allocation2 + $0x88] sm:$0xff] %vm1224_vm0, %v1223_v11  ;;  %v1247_v36 = vld [vmem:[#allocation2 + $0x20] sm:$0xff]  ;;  %v1263_v18 = vld [vmem:[#allocation2 + $0x11] sm:$0xff]  ;;  %1529 = vmatpush.msra.mxu2 %v1488_v1 }
  0xe6   : > { %v1265_v17 = vld [vmem:[#allocation2 + $0x21] sm:$0xff]  ;;  %1226 = vst.msk [vmem:[#allocation2 + $0x8] sm:$0xff] %vm1224_vm0, %v1207_v14  ;;  %v1264_v19 = vld [vmem:[#allocation2 + $0x19] sm:$0xff]  ;;  %v1281_v24 = vmax.f32 %v1245_v22, %v1263_v18  ;;  %1594 = vmatpush.msra.mxu3 %v1583_v2  ;;  %v1484_v11 = vld [vmem:[%s3826_s21 + $0x10] sm:$0xff] }
  0xe7   : > { %1398 = vmatpush.msra.mxu0 %v1320_v15  ;;  %v1283_v38 = vmax.f32 %v1247_v36, %v1265_v17  ;;  %v1301_v20 = vld [vmem:[#allocation2 + $0x22] sm:$0xff]  ;;  %v1282_v21 = vmax.f32 %v1246_v16, %v1264_v19  ;;  %v1300_v25 = vld [vmem:[#allocation2 + $0x1a] sm:$0xff]  ;;  %v1299_v27 = vld [vmem:[#allocation2 + $0x12] sm:$0xff]  ;;  %1530 = vmatpush.msra.mxu2 %v1487_v3 }
  0xe8   : > { %v1317_v28 = vmax.f32 %v1281_v24, %v1299_v27  ;;  %v1486_v6 = vld [vmem:[%s3826_s21 + $0x20] sm:$0xff]  ;;  %1595 = vmatpush.msra.mxu3 %v1582_v4  ;;  %v1485_v9 = vld [vmem:[%s3826_s21 + $0x18] sm:$0xff]  ;;  %v1579_v12 = vld [vmem:[%s3831_s25 + $0x10] sm:$0xff] }
  0xe9   : > { %v1319_v23 = vmax.f32 %v1283_v38, %v1301_v20  ;;  %v1318_v26 = vmax.f32 %v1282_v21, %v1300_v25  ;;  %v1345_v7 = vld [vmem:[%s3821_s17 + $0x60] sm:$0xff]  ;;  %1531 = vmatpush.msra.mxu2 %v1486_v6  ;;  %v1580_v10 = vld [vmem:[%s3831_s25 + $0x18] sm:$0xff]  ;;  %v1347_v14 = vld [vmem:[%s3821_s17 + $0x70] sm:$0xff] }
  0xea   : > { %v1581_v8 = vld [vmem:[%s3831_s25 + $0x20] sm:$0xff]  ;;  %v1348_v13 = vld [vmem:[%s3821_s17 + $0x78] sm:$0xff]  ;;  %v1350_v15 = vld [vmem:[%s3821_s17 + $0x88] sm:$0xff] }
  0xeb   : > { %1399 = vmatpush.msra.mxu0 %v1319_v23  ;;  %1596 = vmatpush.msra.mxu3 %v1581_v8  ;;  %v1349_v16 = vld [vmem:[%s3821_s17 + $0x80] sm:$0xff]  ;;  %v1352_v36 = vld [vmem:[%s3821_s17 + $0x98] sm:$0xff]  ;;  %v1351_v17 = vld [vmem:[%s3821_s17 + $0x90] sm:$0xff] }
  0xec   : > { %v1260_v29 = vld [vmem:[#allocation2 + $0x88] sm:$0x3f]  ;;  %1532 = vmatpush.msra.mxu2 %v1485_v9  ;;  %v1482_v19 = vld [vmem:[%s3826_s21] sm:$0xff] }
  0xed   : > { %1400 = vmatpush.msra.mxu0 %v1318_v26  ;;  %v1278_v30 = vld [vmem:[#allocation2 + $0x89] sm:$0x3f]  ;;  %v1261_v41 = vld [vmem:[#allocation2 + $0x1] sm:$0xff]  ;;  %1597 = vmatpush.msra.mxu3 %v1580_v10 }
  0xee   : > { %v1244_v33 = vld [vmem:[#allocation2 + $0x8] sm:$0xff]  ;;  %v1296_v34 = vmax.f32 %v1260_v29, %v1278_v30  ;;  %v1279_v45 = vmax.f32 %v1243_v35, %v1261_v41  ;;  %1533 = vmatpush.msra.mxu2 %v1484_v11  ;;  %v1577_v20 = vld [vmem:[%s3831_s25] sm:$0xff] }
  0xef   : > { %v1262_v31 = vld [vmem:[#allocation2 + $0x9] sm:$0xff]  ;;  %1401 = vmatpush.msra.mxu0 %v1317_v28  ;;  %v1277_v42 = vld [vmem:[#allocation2 + $0x81] sm:$0xff]  ;;  %1598 = vmatpush.msra.mxu3 %v1579_v12 }
  0xf0   : > { %v1280_v39 = vmax.f32 %v1244_v33, %v1262_v31  ;;  %v1314_v40 = vld [vmem:[#allocation2 + $0x8a] sm:$0x3f]  ;;  %v1295_v46 = vmax.f32 %v1259_v32, %v1277_v42  ;;  %v1313_v48 = vld [vmem:[#allocation2 + $0x82] sm:$0xff]  ;;  %v1649_v42 = vld [vmem:[%s3836_s29 + $0x38] sm:$0xff] }
  0xf1   : > { %v1298_v43 = vld [vmem:[#allocation2 + $0xa] sm:$0xff]  ;;  %v1332_v44 = vmax.f32 %v1296_v34, %v1314_v40  ;;  %v1297_v49 = vld [vmem:[#allocation2 + $0x2] sm:$0xff] }
  0xf2   : > { %v1316_v47 = vmax.f32 %v1280_v39, %v1298_v43  ;;  %v1331_v37 = vmax.f32 %v1295_v46, %v1313_v48  ;;  %v1315_v51 = vmax.f32 %v1279_v45, %v1297_v49  ;;  %v1483_v18 = vld [vmem:[%s3826_s21 + $0x8] sm:$0xff]  ;;  %v1648_v43 = vld [vmem:[%s3836_s29 + $0x30] sm:$0xff]  ;;  %v1646_v46 = vld [vmem:[%s3836_s29 + $0x20] sm:$0xff] }
  0xf3   : > { %3473 = vmatpush.msk.msra.mxu1 %vm1384_vm1, %v1332_v44  ;;  %v1578_v38 = vld [vmem:[%s3831_s25 + $0x8] sm:$0xff]  ;;  %1534 = vmatpush.msra.mxu2 %v1483_v18  ;;  %v1645_v49 = vld [vmem:[%s3836_s29 + $0x18] sm:$0xff]  ;;  %vm2969_vm1 = vcmask 39936  }
  0xf4   : > { %1402 = vmatpush.msra.mxu0 %v1316_v47  ;;  %1599 = vmatpush.msra.mxu3 %v1578_v38  ;;  %v1647_v44 = vld [vmem:[%s3836_s29 + $0x28] sm:$0xff] }
  0xf5   : > { %1450 = vmatpush.msra.mxu1 %v1331_v37  ;;  %1535 = vmatpush.msra.mxu2 %v1482_v19 }
  0xf6   : > { %1403 = vmatpush.msra.mxu0 %v1315_v51  ;;  %3474 = vmatmul.msk.f32.vlgmr.msra.gmra.mxu1 %vm1353_vm2, %v1334_v50 }
  0xf7   : > { %1404 = vmatmul.f32.vlgmr.msra.gmra.mxu0 %v1333_v52  ;;  %1600 = vmatpush.msra.mxu3 %v1577_v20 }
  0xf8   : > { %1688 = vmatpush.msrb.mxu1 %v1649_v42  ;;  %v1855_v42 = vld [vmem:[%s3851_s14 + $0x20] sm:$0xff] }
  0xfa   : > { %1689 = vmatpush.msrb.mxu1 %v1648_v43  ;;  %v1854_v43 = vld [vmem:[%s3851_s14 + $0x18] sm:$0xff] }
  0xfc   : > { %1690 = vmatpush.msrb.mxu1 %v1647_v44  ;;  %v3549_v44 = vld [vmem:[%s3851_s14 + $0xb8] sm:$0xff] }
  0xfd   : > { %2089 = vmatpush.msrb.mxu0 %v3549_v44 }
  0xfe   : > { %3475 = vmatmul.msk.f32.gmra.mxu1 %vm1353_vm2, %v1336_v53 }
  0xff   : > { %1407 = vmatmul.f32.gmra.mxu0 %v1335_v54  ;;  %1691 = vmatpush.msrb.mxu1 %v1646_v46  ;;  %v1853_v46 = vld [vmem:[%s3851_s14 + $0x10] sm:$0xff] }
 0x101   : > { %1692 = vmatpush.msrb.mxu1 %v1645_v49  ;;  %v1852_v49 = vld [vmem:[%s3851_s14 + $0x8] sm:$0xff] }
 0x106   : > { %3476 = vmatmul.msk.f32.gmra.mxu1 %vm1353_vm2, %v1338_v55 }
 0x107   : > { %1410 = vmatmul.f32.gmra.mxu0 %v1337_v56 }
 0x10e   : > { %3477 = vmatmul.msk.f32.gmra.mxu1 %vm1353_vm2, %v1340_v57 }
 0x10f   : > { %1413 = vmatmul.f32.gmra.mxu0 %v1339_v58  ;;  %v1644_v58 = vld [vmem:[%s3836_s29 + $0x10] sm:$0xff] }
 0x110   : > { %1693 = vmatpush.msrb.mxu1 %v1644_v58  ;;  %v3543_v58 = vld [vmem:[%s3851_s14 + $0x88] sm:$0xff] }
 0x116   : > { %3478 = vmatmul.msk.f32.gmra.mxu1 %vm1353_vm2, %v1342_v59  ;;  %v1643_v59 = vld [vmem:[%s3836_s29 + $0x8] sm:$0xff] }
 0x117   : > { %1416 = vmatmul.f32.gmra.mxu0 %v1341_v60  ;;  %v1642_v60 = vld [vmem:[%s3836_s29] sm:$0xff]  ;;  %1694 = vmatpush.msrb.mxu1 %v1643_v59 }
 0x118   : > { %v3514_v59 = vld [vmem:[%s3851_s14 + $0x40] sm:$0xff] }
 0x119   : > { %1695 = vmatpush.msrb.mxu1 %v1642_v60  ;;  %v3542_v60 = vld [vmem:[%s3851_s14 + $0x80] sm:$0xff] }
 0x11e   : > { %3479 = vmatmul.msk.f32.gmra.mxu1 %vm1353_vm2, %v1344_v61 }
 0x11f   : > { %1419 = vmatmul.f32.gmra.mxu0 %v1343_v62 }
 0x126   : > { %3480 = vmatmul.msk.f32.gmra.mxu1 %vm1353_vm2, %v1346_v5 }
 0x127   : > { %1422 = vmatmul.f32.gmra.mxu0 %v1345_v7 }
 0x12e   : > { %3481 = vmatmul.msk.f32.gmra.mxu1 %vm1353_vm2, %v1348_v13 }
 0x12f   : > { %1425 = vmatmul.f32.gmra.mxu0 %v1347_v14 }
 0x136   : > { %3482 = vmatmul.msk.f32.gmra.mxu1 %vm1353_vm2, %v1350_v15 }
 0x137   : > { %1428 = vmatmul.f32.gmra.mxu0 %v1349_v16 }
 0x13e   : > { %3483 = vmatmul.msk.f32.gmra.mxu1 %vm1353_vm2, %v1352_v36  ;;  %vm3125_vm2 = vcmask 1043456  }
 0x13f   : > { %1431 = vmatmul.f32.gmra.mxu0 %v1351_v17 }
 0x173   : > { %v1452_v21 = vpop.f32.mrf.mxu1 }
 0x174   : > { %v1405_v22 = vpop.f32.mrf.mxu0 }
 0x175   : > { %v4159_v23 = vadd.f32 %v1452_v21, %v1405_v22 }
 0x177   : > { %3484 = vmatmul.msk.f32.vlgmr.msra.gmra.mxu2 %vm1224_vm0, %v4159_v23  ;;  %3494 = vmatmul.msk.f32.vlgmr.msra.gmra.mxu3 %vm1224_vm0, %v4159_v23 }
 0x17b   : > { %v1455_v24 = vpop.f32.mrf.mxu1 }
 0x17c   : > { %v1408_v25 = vpop.f32.mrf.mxu0 }
 0x17d   : > { %v4165_v26 = vadd.f32 %v1455_v24, %v1408_v25 }
 0x17f   : > { %3485 = vmatmul.msk.f32.gmra.mxu2 %vm1224_vm0, %v4165_v26  ;;  %3495 = vmatmul.msk.f32.gmra.mxu3 %vm1224_vm0, %v4165_v26 }
 0x183   : > { %v1458_v27 = vpop.f32.mrf.mxu1 }
 0x184   : > { %v1411_v28 = vpop.f32.mrf.mxu0 }
 0x185   : > { %v4171_v29 = vadd.f32 %v1458_v27, %v1411_v28 }
 0x187   : > { %3486 = vmatmul.msk.f32.gmra.mxu2 %vm1224_vm0, %v4171_v29  ;;  %3496 = vmatmul.msk.f32.gmra.mxu3 %vm1224_vm0, %v4171_v29 }
 0x18b   : > { %v1461_v30 = vpop.f32.mrf.mxu1 }
 0x18c   : > { %v1414_v32 = vpop.f32.mrf.mxu0 }
 0x18d   : > { %v4177_v33 = vadd.f32 %v1461_v30, %v1414_v32 }
 0x18f   : > { %3487 = vmatmul.msk.f32.gmra.mxu2 %vm1224_vm0, %v4177_v33  ;;  %3497 = vmatmul.msk.f32.gmra.mxu3 %vm1224_vm0, %v4177_v33 }
 0x193   : > { %v1464_v31 = vpop.f32.mrf.mxu1 }
 0x194   : > { %v1417_v34 = vpop.f32.mrf.mxu0 }
 0x195   : > { %v4183_v35 = vadd.f32 %v1464_v31, %v1417_v34 }
 0x197   : > { %3488 = vmatmul.msk.f32.gmra.mxu2 %vm1224_vm0, %v4183_v35  ;;  %3498 = vmatmul.msk.f32.gmra.mxu3 %vm1224_vm0, %v4183_v35 }
 0x19b   : > { %v1467_v39 = vpop.f32.mrf.mxu1 }
 0x19c   : > { %v1420_v40 = vpop.f32.mrf.mxu0 }
 0x19d   : > { %v4189_v41 = vadd.f32 %v1467_v39, %v1420_v40  ;;  %v1857_v39 = vld [vmem:[%s3851_s14 + $0x30] sm:$0xff]  ;;  %v1856_v40 = vld [vmem:[%s3851_s14 + $0x28] sm:$0xff] }
 0x19f   : > { %3489 = vmatmul.msk.f32.gmra.mxu2 %vm1224_vm0, %v4189_v41  ;;  %3499 = vmatmul.msk.f32.gmra.mxu3 %vm1224_vm0, %v4189_v41 }
 0x1a3   : > { %v1470_v45 = vpop.f32.mrf.mxu1 }
 0x1a4   : > { %v1423_v47 = vpop.f32.mrf.mxu0 }
 0x1a5   : > { %v1471_v48 = vadd.f32 %v1470_v45, %v1423_v47  ;;  %v3520_v45 = vld [vmem:[%s3851_s14 + $0x70] sm:$0xff] }
 0x1a6   : > { %v3548_v47 = vld [vmem:[%s3851_s14 + $0xb0] sm:$0xff] }
 0x1a7   : > { %3490 = vmatmul.msk.f32.gmra.mxu2 %vm1224_vm0, %v1471_v48  ;;  %3500 = vmatmul.msk.f32.gmra.mxu3 %vm1224_vm0, %v1471_v48 }
 0x1a8   : > { %2090 = vmatpush.msrb.mxu0 %v3548_v47 }
 0x1ab   : > { %v1473_v37 = vpop.f32.mrf.mxu1 }
 0x1ac   : > { %v1426_v50 = vpop.f32.mrf.mxu0 }
 0x1ad   : > { %v1474_v51 = vadd.f32 %v1473_v37, %v1426_v50  ;;  %v3547_v37 = vld [vmem:[%s3851_s14 + $0xa8] sm:$0xff]  ;;  %v3518_v50 = vld [vmem:[%s3851_s14 + $0x60] sm:$0xff] }
 0x1ae   : > { %2091 = vmatpush.msrb.mxu0 %v3547_v37 }
 0x1af   : > { %3491 = vmatmul.msk.f32.gmra.mxu2 %vm1224_vm0, %v1474_v51  ;;  %3501 = vmatmul.msk.f32.gmra.mxu3 %vm1224_vm0, %v1474_v51 }
 0x1b3   : > { %v1476_v52 = vpop.f32.mrf.mxu1 }
 0x1b4   : > { %v1429_v53 = vpop.f32.mrf.mxu0 }
 0x1b5   : > { %v1477_v54 = vadd.f32 %v1476_v52, %v1429_v53  ;;  %v3546_v52 = vld [vmem:[%s3851_s14 + $0xa0] sm:$0xff]  ;;  %v3517_v53 = vld [vmem:[%s3851_s14 + $0x58] sm:$0xff] }
 0x1b6   : > { %2092 = vmatpush.msrb.mxu0 %v3546_v52 }
 0x1b7   : > { %3492 = vmatmul.msk.f32.gmra.mxu2 %vm1224_vm0, %v1477_v54  ;;  %3502 = vmatmul.msk.f32.gmra.mxu3 %vm1224_vm0, %v1477_v54 }
 0x1bb   : > { %v1479_v55 = vpop.f32.mrf.mxu1 }
 0x1bc   : > { %v1432_v56 = vpop.f32.mrf.mxu0 }
 0x1bd   : > { %v1480_v57 = vadd.f32 %v1479_v55, %v1432_v56  ;;  %v3516_v55 = vld [vmem:[%s3851_s14 + $0x50] sm:$0xff] }
 0x1be   : > { %v3544_v56 = vld [vmem:[%s3851_s14 + $0x90] sm:$0xff] }
 0x1bf   : > { %3493 = vmatmul.msk.f32.gmra.mxu2 %vm1224_vm0, %v1480_v57  ;;  %3503 = vmatmul.msk.f32.gmra.mxu3 %vm1224_vm0, %v1480_v57 }
 0x1fa   : > { %v1537_v61 = vpop.f32.mrf.mxu2  ;;  %v1602_v62 = vpop.f32.mrf.mxu3 }
 0x1fb   : > { %v1567_v63 = vmax.f32 %v4159_v23, %v1537_v61  ;;  %v4252_v61 = vld [vmem:[%s4715_s3] ss:$0 sm:$0xff] }
 0x1fd   : > { %v1632_v0 = vmax.f32 %v1567_v63, %v1602_v62  ;;  %v4255_v62 = vld [vmem:[%s4715_s3 + $0x1] ss:$0 sm:$0xff] }
 0x1ff   : > { %3504 = vmatmul.msk.f32.vlgmr.msrb.gmra.mxu1 %vm1224_vm0, %v1632_v0 }
 0x202   : > { %v1540_v1 = vpop.f32.mrf.mxu2  ;;  %v1605_v2 = vpop.f32.mrf.mxu3 }
 0x203   : > { %v1568_v3 = vmax.f32 %v4165_v26, %v1540_v1 }
 0x205   : > { %v1633_v4 = vmax.f32 %v1568_v3, %v1605_v2  ;;  %v1774_v3 = vpop.permute.xlu0 %1773 }
 0x207   : > { %3505 = vmatmul.msk.f32.gmra.mxu1 %vm1224_vm0, %v1633_v4 }
 0x20a   : > { %v1543_v5 = vpop.f32.mrf.mxu2  ;;  %v1608_v6 = vpop.f32.mrf.mxu3 }
 0x20b   : > { %v1569_v7 = vmax.f32 %v4171_v29, %v1543_v5 }
 0x20d   : > { %v1634_v8 = vmax.f32 %v1569_v7, %v1608_v6 }
 0x20f   : > { %3506 = vmatmul.msk.f32.gmra.mxu1 %vm1224_vm0, %v1634_v8 }
 0x212   : > { %v1546_v9 = vpop.f32.mrf.mxu2  ;;  %v1611_v10 = vpop.f32.mrf.mxu3 }
 0x213   : > { %v1570_v11 = vmax.f32 %v4177_v33, %v1546_v9  ;;  %v1779_v9 = vpop.permute.xlu1 %1778 }
 0x215   : > { %v1635_v12 = vmax.f32 %v1570_v11, %v1611_v10 }
 0x217   : > { %3507 = vmatmul.msk.f32.gmra.mxu1 %vm1224_vm0, %v1635_v12 }
 0x21a   : > { %v1549_v13 = vpop.f32.mrf.mxu2  ;;  %v1614_v14 = vpop.f32.mrf.mxu3 }
 0x21b   : > { %v1571_v15 = vmax.f32 %v4183_v35, %v1549_v13  ;;  %v1858_v35 = vld [vmem:[%s3851_s14 + $0x38] sm:$0xff] }
 0x21c   : > { %1993 = vmatpush.msrb.mxu3 %v1858_v35 }
 0x21d   : > { %v1636_v16 = vmax.f32 %v1571_v15, %v1614_v14 }
 0x21e   : > { %1994 = vmatpush.msrb.mxu3 %v1857_v39 }
 0x21f   : > { %3508 = vmatmul.msk.f32.gmra.mxu1 %vm1224_vm0, %v1636_v16  ;;  %v1784_v16 = vpop.permute.xlu2 %1783 }
 0x220   : > { %1995 = vmatpush.msrb.mxu3 %v1856_v40 }
 0x222   : > { %v1552_v36 = vpop.f32.mrf.mxu2  ;;  %v1617_v17 = vpop.f32.mrf.mxu3  ;;  %1996 = vmatpush.msrb.mxu3 %v1855_v42 }
 0x223   : > { %v1572_v18 = vmax.f32 %v4189_v41, %v1552_v36  ;;  %v3521_v41 = vld [vmem:[%s3851_s14 + $0x78] sm:$0xff] }
 0x224   : > { %1916 = vmatpush.msrb.mxu2 %v3521_v41  ;;  %1997 = vmatpush.msrb.mxu3 %v1854_v43 }
 0x225   : > { %v1637_v38 = vmax.f32 %v1572_v18, %v1617_v17 }
 0x226   : > { %1917 = vmatpush.msrb.mxu2 %v3520_v45  ;;  %1998 = vmatpush.msrb.mxu3 %v1853_v46 }
 0x227   : > { %3509 = vmatmul.msk.f32.gmra.mxu1 %vm1224_vm0, %v1637_v38  ;;  %v1799_v44 = vpop.permute.xlu2 %1798 }
 0x228   : > { %1999 = vmatpush.msrb.mxu3 %v1852_v49 }
 0x22a   : > { %v1555_v19 = vpop.f32.mrf.mxu2  ;;  %v1620_v20 = vpop.f32.mrf.mxu3 }
 0x22b   : > { %v1573_v21 = vmax.f32 %v1471_v48, %v1555_v19  ;;  %v3519_v48 = vld [vmem:[%s3851_s14 + $0x68] sm:$0xff] }
 0x22c   : > { %1918 = vmatpush.msrb.mxu2 %v3519_v48 }
 0x22d   : > { %v1638_v22 = vmax.f32 %v1573_v21, %v1620_v20 }
 0x22e   : > { %1919 = vmatpush.msrb.mxu2 %v3518_v50 }
 0x22f   : > { %3510 = vmatmul.msk.f32.gmra.mxu1 %vm1224_vm0, %v1638_v22 }
 0x230   : > { %1920 = vmatpush.msrb.mxu2 %v3517_v53 }
 0x232   : > { %v1558_v23 = vpop.f32.mrf.mxu2  ;;  %v1623_v24 = vpop.f32.mrf.mxu3  ;;  %1921 = vmatpush.msrb.mxu2 %v3516_v55 }
 0x233   : > { %v1574_v25 = vmax.f32 %v1474_v51, %v1558_v23  ;;  %v1851_v51 = vld [vmem:[%s3851_s14] sm:$0xff]  ;;  %v1789_v23 = vpop.permute.xlu0 %1788 }
 0x234   : > { %2000 = vmatpush.msrb.mxu3 %v1851_v51 }
 0x235   : > { %v1639_v26 = vmax.f32 %v1574_v25, %v1623_v24 }
 0x237   : > { %3511 = vmatmul.msk.f32.gmra.mxu1 %vm1224_vm0, %v1639_v26 }
 0x23a   : > { %v1561_v27 = vpop.f32.mrf.mxu2  ;;  %v1626_v28 = vpop.f32.mrf.mxu3 }
 0x23b   : > { %v1575_v29 = vmax.f32 %v1477_v54, %v1561_v27  ;;  %v3545_v54 = vld [vmem:[%s3851_s14 + $0x98] sm:$0xff]  ;;  %v1804_v52 = vpop.permute.xlu0 %1803 }
 0x23c   : > { %2093 = vmatpush.msrb.mxu0 %v3545_v54 }
 0x23d   : > { %v1640_v30 = vmax.f32 %v1575_v29, %v1626_v28 }
 0x23e   : > { %2094 = vmatpush.msrb.mxu0 %v3544_v56 }
 0x23f   : > { %3512 = vmatmul.msk.f32.gmra.mxu1 %vm1224_vm0, %v1640_v30 }
 0x240   : > { %2095 = vmatpush.msrb.mxu0 %v3543_v58 }
 0x242   : > { %v1564_v32 = vpop.f32.mrf.mxu2  ;;  %v1629_v31 = vpop.f32.mrf.mxu3  ;;  %2096 = vmatpush.msrb.mxu0 %v3542_v60 }
 0x243   : > { %v1576_v33 = vmax.f32 %v1480_v57, %v1564_v32  ;;  %v3515_v57 = vld [vmem:[%s3851_s14 + $0x48] sm:$0xff] }
 0x244   : > { %1922 = vmatpush.msrb.mxu2 %v3515_v57 }
 0x245   : > { %v1641_v34 = vmax.f32 %v1576_v33, %v1629_v31  ;;  %v1794_v33 = vpop.permute.xlu1 %1793 }
 0x246   : > { %1923 = vmatpush.msrb.mxu2 %v3514_v59 }
 0x247   : > { %3513 = vmatmul.msk.f32.gmra.mxu1 %vm1224_vm0, %v1641_v34 }
 0x27c   : > { %v1697_v63 = vpop.f32.mrf.mxu1 }
 0x27d   : > { %v1729_v0 = vmul.f32 %v4252_v61, %v1697_v63  ;;  %v1809_v63 = vpop.permute.xlu1 %1808 }
 0x27f   : > { %v1741_v1 = vadd.f32 %v4255_v62, %v1729_v0 }
 0x281   : > { %v1751_v2 = vmax.f32 %v1741_v1, 0.0 }
 0x283   : > { %v1821_v4 = vmul.f32 %v1774_v3, %v1751_v2 }
 0x284   : > { %v1700_v5 = vpop.f32.mrf.mxu1 }
 0x285   : > { %1831 = vst.msk [vmem:[#allocation3] sm:$0xff] %vm1224_vm0, %v1821_v4  ;;  %v1730_v6 = vmul.f32 %v4252_v61, %v1700_v5 }
 0x287   : > { %v1742_v7 = vadd.f32 %v4255_v62, %v1730_v6 }
 0x289   : > { %v1752_v8 = vmax.f32 %v1742_v7, 0.0 }
 0x28b   : > { %v1822_v10 = vmul.f32 %v1779_v9, %v1752_v8  ;;  %v1814_v8 = vpop.permute.xlu2 %1813 }
 0x28c   : > { %v1703_v11 = vpop.f32.mrf.mxu1  ;;  %v1841_v12 = vld [vmem:[#allocation3] sm:$0xff] }
 0x28d   : > { %1832 = vst.msk [vmem:[#allocation3 + $0x8] sm:$0xff] %vm1224_vm0, %v1822_v10  ;;  %v1731_v13 = vmul.f32 %v4252_v61, %v1703_v11  ;;  %3532 = vmatmul.msk.f32.vlgmr.msrb.gmra.mxu3 %vm1224_vm0, %v1841_v12 }
 0x28f   : > { %v1743_v14 = vadd.f32 %v4255_v62, %v1731_v13 }
 0x291   : > { %v1753_v15 = vmax.f32 %v1743_v14, 0.0 }
 0x293   : > { %v1823_v36 = vmul.f32 %v1784_v16, %v1753_v15 }
 0x294   : > { %v1706_v17 = vpop.f32.mrf.mxu1  ;;  %v1859_v18 = vld [vmem:[#allocation3 + $0x1] sm:$0xff] }
 0x295   : > { %v1842_v38 = vld [vmem:[#allocation3 + $0x8] sm:$0xff]  ;;  %1833 = vst.msk [vmem:[#allocation3 + $0x10] sm:$0xff] %vm1224_vm0, %v1823_v36  ;;  %v1732_v20 = vmul.f32 %v4252_v61, %v1706_v17  ;;  %3522 = vmatmul.msk.f32.vlgmr.msrb.gmra.mxu2 %vm1224_vm0, %v1859_v18  ;;  %v1819_v36 = vpop.permute.xlu0 %1818 }
 0x296   : > { %v2032_v19 = vld [vmem:[#allocation3 + $0x2] sm:$0xff]  ;;  %3533 = vmatmul.msk.f32.gmra.mxu3 %vm1224_vm0, %v1842_v38 }
 0x297   : > { %3550 = vmatmul.msk.f32.vlgmr.msrb.gmra.mxu0 %vm1224_vm0, %v2032_v19  ;;  %v1744_v21 = vadd.f32 %v4255_v62, %v1732_v20 }
 0x299   : > { %v1754_v22 = vmax.f32 %v1744_v21, 0.0 }
 0x29b   : > { %v1824_v24 = vmul.f32 %v1789_v23, %v1754_v22  ;;  %v4317_v23 = vpop.permute.xlu1 %2224 }
 0x29c   : > { %v1709_v25 = vpop.f32.mrf.mxu1  ;;  %v1860_v26 = vld [vmem:[#allocation3 + $0x9] sm:$0xff] }
 0x29d   : > { %v1843_v27 = vld [vmem:[#allocation3 + $0x10] sm:$0xff]  ;;  %1834 = vst.msk [vmem:[#allocation3 + $0x18] sm:$0xff] %vm1224_vm0, %v1824_v24  ;;  %v1733_v29 = vmul.f32 %v4252_v61, %v1709_v25  ;;  %3523 = vmatmul.msk.f32.gmra.mxu2 %vm1224_vm0, %v1860_v26  ;;  %v3795_v24 = vmov 0.0  }
 0x29e   : > { %v2033_v28 = vld [vmem:[#allocation3 + $0xa] sm:$0xff]  ;;  %3534 = vmatmul.msk.f32.gmra.mxu3 %vm1224_vm0, %v1843_v27  ;;  %2242 = vst.msk [vmem:[#allocation4] sm:$0xff] %vm1224_vm0, %v3795_v24 }
 0x29f   : > { %3551 = vmatmul.msk.f32.gmra.mxu0 %vm1224_vm0, %v2033_v28  ;;  %v1745_v30 = vadd.f32 %v4255_v62, %v1733_v29  ;;  %2243 = vst.msk [vmem:[#allocation4 + $0x8] sm:$0xff] %vm1224_vm0, %v3795_v24  ;;  %v4339_v28 = vpop.permute.xlu0 %2219 }
 0x2a0   : > { %2244 = vst.msk [vmem:[#allocation4 + $0x10] sm:$0xff] %vm1224_vm0, %v3795_v24 }
 0x2a1   : > { %v1755_v32 = vmax.f32 %v1745_v30, 0.0  ;;  %2245 = vst.msk [vmem:[#allocation4 + $0x18] sm:$0xff] %vm1224_vm0, %v3795_v24 }
 0x2a2   : > { %2246 = vst.msk [vmem:[#allocation4 + $0x20] sm:$0xff] %vm1224_vm0, %v3795_v24 }
 0x2a3   : > { %v1825_v31 = vmul.f32 %v1794_v33, %v1755_v32  ;;  %2247 = vst.msk [vmem:[#allocation4 + $0x28] sm:$0xff] %vm1224_vm0, %v3795_v24  ;;  %v4337_v25 = vpop.permute.xlu1 %2214 }
 0x2a4   : > { %v1712_v34 = vpop.f32.mrf.mxu1  ;;  %v1861_v35 = vld [vmem:[#allocation3 + $0x11] sm:$0xff]  ;;  %2248 = vst.msk [vmem:[#allocation4 + $0x30] sm:$0xff] %vm1224_vm0, %v3795_v24 }
 0x2a5   : > { %v1844_v39 = vld [vmem:[#allocation3 + $0x18] sm:$0xff]  ;;  %1835 = vst.msk [vmem:[#allocation3 + $0x20] sm:$0xff] %vm1224_vm0, %v1825_v31  ;;  %v1734_v41 = vmul.f32 %v4252_v61, %v1712_v34  ;;  %3524 = vmatmul.msk.f32.gmra.mxu2 %vm1224_vm0, %v1861_v35  ;;  %v4342_v31 = vld [vmem:[%s3856_s19] ss:$0 sm:$0xff]  ;;  %v4345_v35 = vld [vmem:[%s3856_s19 + $0x1] ss:$0 sm:$0xff] }
 0x2a6   : > { %v2034_v40 = vld [vmem:[#allocation3 + $0x12] sm:$0xff]  ;;  %3535 = vmatmul.msk.f32.gmra.mxu3 %vm1224_vm0, %v1844_v39  ;;  %2249 = vst.msk [vmem:[#allocation4 + $0x38] sm:$0xff] %vm1224_vm0, %v3795_v24 }
 0x2a7   : > { %3552 = vmatmul.msk.f32.gmra.mxu0 %vm1224_vm0, %v2034_v40  ;;  %v1746_v42 = vadd.f32 %v4255_v62, %v1734_v41  ;;  %2250 = vst.msk [vmem:[#allocation4 + $0x40] sm:$0xff] %vm1224_vm0, %v3795_v24  ;;  %v4347_v40 = vpop.permute.xlu2 %2229 }
 0x2a8   : > { %2252 = vst.msk [vmem:[#allocation4 + $0x48] sm:$0x7f] %vm2251_vm3, %v3795_v24  ;;  %vm3121_vm3 = vcmask 31744  }
 0x2a9   : > { %v1756_v43 = vmax.f32 %v1746_v42, 0.0  ;;  %v2205_v42 = vpop.permute.xlu0 %2204  ;;  %2971 = vst.msk [vmem:[#allocation8] sm:$0xff] %vm2939_vm10, %v3795_v24 }
 0x2aa   : > { %2973 = vst.msk [vmem:[#allocation8 + $0x8] sm:$0x3] %vm2972_vm11, %v3795_v24 }
 0x2ab   : > { %v1826_v45 = vmul.f32 %v1799_v44, %v1756_v43  ;;  %v2200_v29 = vpop.permute.xlu1 %2199  ;;  %3006 = vst.msk [vmem:[#allocation9] sm:$0x3f] %vm3005_vm15, %v3795_v24 }
 0x2ac   : > { %v1715_v46 = vpop.f32.mrf.mxu1  ;;  %v1862_v47 = vld [vmem:[#allocation3 + $0x19] sm:$0xff] }
 0x2ad   : > { %v1845_v48 = vld [vmem:[#allocation3 + $0x20] sm:$0xff]  ;;  %1836 = vst.msk [vmem:[#allocation3 + $0x28] sm:$0xff] %vm1224_vm0, %v1826_v45  ;;  %v1735_v37 = vmul.f32 %v4252_v61, %v1715_v46  ;;  %3525 = vmatmul.msk.f32.gmra.mxu2 %vm1224_vm0, %v1862_v47 }
 0x2ae   : > { %v2035_v49 = vld [vmem:[#allocation3 + $0x1a] sm:$0xff]  ;;  %3536 = vmatmul.msk.f32.gmra.mxu3 %vm1224_vm0, %v1845_v48 }
 0x2af   : > { %3553 = vmatmul.msk.f32.gmra.mxu0 %vm1224_vm0, %v2035_v49  ;;  %v1747_v50 = vadd.f32 %v4255_v62, %v1735_v37 }
 0x2b1   : > { %v1757_v51 = vmax.f32 %v1747_v50, 0.0 }
 0x2b3   : > { %v1827_v53 = vmul.f32 %v1804_v52, %v1757_v51  ;;  %v2185_v48 = vpop.permute.xlu1 %2184  ;;  %v2210_v52 = vpop.permute.xlu2 %2209 }
 0x2b4   : > { %v1718_v54 = vpop.f32.mrf.mxu1  ;;  %v1863_v55 = vld [vmem:[#allocation3 + $0x21] sm:$0xff] }
 0x2b5   : > { %v1846_v56 = vld [vmem:[#allocation3 + $0x28] sm:$0xff]  ;;  %1837 = vst.msk [vmem:[#allocation3 + $0x30] sm:$0xff] %vm1224_vm0, %v1827_v53  ;;  %v1736_v58 = vmul.f32 %v4252_v61, %v1718_v54  ;;  %3526 = vmatmul.msk.f32.gmra.mxu2 %vm1224_vm0, %v1863_v55 }
 0x2b6   : > { %v2036_v57 = vld [vmem:[#allocation3 + $0x22] sm:$0xff]  ;;  %3537 = vmatmul.msk.f32.gmra.mxu3 %vm1224_vm0, %v1846_v56 }
 0x2b7   : > { %3554 = vmatmul.msk.f32.gmra.mxu0 %vm1224_vm0, %v2036_v57  ;;  %v1748_v59 = vadd.f32 %v4255_v62, %v1736_v58  ;;  %v2190_v58 = vpop.permute.xlu0 %2189 }
 0x2b9   : > { %v1758_v60 = vmax.f32 %v1748_v59, 0.0 }
 0x2bb   : > { %v1828_v0 = vmul.f32 %v1809_v63, %v1758_v60 }
 0x2bc   : > { %v1721_v1 = vpop.f32.mrf.mxu1  ;;  %v1864_v2 = vld [vmem:[#allocation3 + $0x29] sm:$0xff] }
 0x2bd   : > { %v1847_v3 = vld [vmem:[#allocation3 + $0x30] sm:$0xff]  ;;  %1838 = vst.msk [vmem:[#allocation3 + $0x38] sm:$0xff] %vm1224_vm0, %v1828_v0  ;;  %v1737_v5 = vmul.f32 %v4252_v61, %v1721_v1  ;;  %3527 = vmatmul.msk.f32.gmra.mxu2 %vm1224_vm0, %v1864_v2 }
 0x2be   : > { %v2037_v4 = vld [vmem:[#allocation3 + $0x2a] sm:$0xff]  ;;  %3538 = vmatmul.msk.f32.gmra.mxu3 %vm1224_vm0, %v1847_v3 }
 0x2bf   : > { %3555 = vmatmul.msk.f32.gmra.mxu0 %vm1224_vm0, %v2037_v4  ;;  %v1749_v6 = vadd.f32 %v4255_v62, %v1737_v5 }
 0x2c1   : > { %v1759_v7 = vmax.f32 %v1749_v6, 0.0  ;;  %v2195_v6 = vpop.permute.xlu2 %2194 }
 0x2c3   : > { %v1829_v9 = vmul.f32 %v1814_v8, %v1759_v7 }
 0x2c4   : > { %v1724_v10 = vpop.f32.mrf.mxu1  ;;  %v1865_v11 = vld [vmem:[#allocation3 + $0x31] sm:$0xff] }
 0x2c5   : > { %v1848_v12 = vld [vmem:[#allocation3 + $0x38] sm:$0xff]  ;;  %1839 = vst.msk [vmem:[#allocation3 + $0x40] sm:$0xff] %vm1224_vm0, %v1829_v9  ;;  %v1738_v14 = vmul.f32 %v4252_v61, %v1724_v10  ;;  %3528 = vmatmul.msk.f32.gmra.mxu2 %vm1224_vm0, %v1865_v11 }
 0x2c6   : > { %v2038_v13 = vld [vmem:[#allocation3 + $0x32] sm:$0xff]  ;;  %3539 = vmatmul.msk.f32.gmra.mxu3 %vm1224_vm0, %v1848_v12 }
 0x2c7   : > { %3556 = vmatmul.msk.f32.gmra.mxu0 %vm1224_vm0, %v2038_v13  ;;  %v1750_v15 = vadd.f32 %v4255_v62, %v1738_v14 }
 0x2c9   : > { %v1760_v16 = vmax.f32 %v1750_v15, 0.0 }
 0x2cb   : > { %v1830_v17 = vmul.f32 %v1819_v36, %v1760_v16 }
 0x2cc   : > { %v1866_v18 = vld [vmem:[#allocation3 + $0x39] sm:$0xff] }
 0x2cd   : > { %v1849_v38 = vld [vmem:[#allocation3 + $0x40] sm:$0xff]  ;;  %1840 = vst.msk [vmem:[#allocation3 + $0x48] sm:$0xff] %vm1224_vm0, %v1830_v17  ;;  %3529 = vmatmul.msk.f32.gmra.mxu2 %vm1224_vm0, %v1866_v18 }
 0x2ce   : > { %v2039_v19 = vld [vmem:[#allocation3 + $0x3a] sm:$0xff]  ;;  %3540 = vmatmul.msk.f32.gmra.mxu3 %vm1224_vm0, %v1849_v38 }
 0x2cf   : > { %3557 = vmatmul.msk.f32.gmra.mxu0 %vm1224_vm0, %v2039_v19 }
 0x2d4   : > { %v1867_v61 = vld [vmem:[#allocation3 + $0x41] sm:$0xff]  ;;  %v1868_v62 = vld [vmem:[#allocation3 + $0x49] sm:$0x3f] }
 0x2d5   : > { %v1850_v20 = vld [vmem:[#allocation3 + $0x48] sm:$0x3f]  ;;  %3530 = vmatmul.msk.f32.gmra.mxu2 %vm1224_vm0, %v1867_v61 }
 0x2d6   : > { %v2040_v21 = vld [vmem:[#allocation3 + $0x42] sm:$0xff]  ;;  %3541 = vmatmul.msk.f32.gmra.mxu3 %vm1224_vm0, %v1850_v20  ;;  %v2041_v22 = vld [vmem:[#allocation3 + $0x4a] sm:$0x3f] }
 0x2d7   : > { %3558 = vmatmul.msk.f32.gmra.mxu0 %vm1224_vm0, %v2040_v21 }
 0x2dd   : > { %3531 = vmatmul.msk.f32.gmra.mxu2 %vm1224_vm0, %v1868_v62 }
 0x2df   : > { %3559 = vmatmul.msk.f32.gmra.mxu0 %vm1224_vm0, %v2041_v22 }
 0x310   : > { %v2002_v26 = vpop.f32.mrf.mxu3 }
 0x314   : > { %v2098_v27 = vpop.f32.mrf.mxu0 }
 0x318   : > { %v1925_v30 = vpop.f32.mrf.mxu2 }
 0x319   : > { %v2005_v32 = vpop.f32.mrf.mxu3  ;;  %v2003_v33 = vadd.f32 %v2002_v26, %v1925_v30 }
 0x31b   : > { %v2128_v34 = vadd.f32 %v2098_v27, %v2003_v33 }
 0x31c   : > { %v2101_v39 = vpop.f32.mrf.mxu0 }
 0x31d   : > { %v2140_v41 = vmul.f32 %v4342_v31, %v2128_v34 }
 0x31f   : > { %v2152_v43 = vadd.f32 %v4345_v35, %v2140_v41 }
 0x320   : > { %v1928_v44 = vpop.f32.mrf.mxu2 }
 0x321   : > { %v2008_v45 = vpop.f32.mrf.mxu3  ;;  %v2162_v46 = vmax.f32 %v2152_v43, 0.0  ;;  %v2006_v47 = vadd.f32 %v2005_v32, %v1928_v44 }
 0x323   : > { %v2232_v49 = vmul.f32 %v2185_v48, %v2162_v46  ;;  %v2129_v37 = vadd.f32 %v2101_v39, %v2006_v47 }
 0x324   : > { %v2104_v50 = vpop.f32.mrf.mxu0 }
 0x325   : > { %2253 = vst.msk [vmem:[#allocation4 + $0x1] sm:$0xff] %vm1224_vm0, %v2232_v49  ;;  %v2141_v51 = vmul.f32 %v4342_v31, %v2129_v37 }
 0x327   : > { %v2153_v53 = vadd.f32 %v4345_v35, %v2141_v51 }
 0x328   : > { %v1931_v54 = vpop.f32.mrf.mxu2 }
 0x329   : > { %v2011_v55 = vpop.f32.mrf.mxu3  ;;  %v2163_v56 = vmax.f32 %v2153_v53, 0.0  ;;  %v2009_v57 = vadd.f32 %v2008_v45, %v1931_v54 }
 0x32b   : > { %v2233_v59 = vmul.f32 %v2190_v58, %v2163_v56  ;;  %v2130_v60 = vadd.f32 %v2104_v50, %v2009_v57 }
 0x32c   : > { %v2107_v63 = vpop.f32.mrf.mxu0 }
 0x32d   : > { %2254 = vst.msk [vmem:[#allocation4 + $0x9] sm:$0xff] %vm1224_vm0, %v2233_v59  ;;  %v2142_v0 = vmul.f32 %v4342_v31, %v2130_v60 }
 0x32f   : > { %v2154_v1 = vadd.f32 %v4345_v35, %v2142_v0 }
 0x330   : > { %v1934_v2 = vpop.f32.mrf.mxu2 }
 0x331   : > { %v2014_v3 = vpop.f32.mrf.mxu3  ;;  %v2164_v4 = vmax.f32 %v2154_v1, 0.0  ;;  %v2012_v5 = vadd.f32 %v2011_v55, %v1934_v2 }
 0x333   : > { %v2234_v7 = vmul.f32 %v2195_v6, %v2164_v4  ;;  %v2131_v8 = vadd.f32 %v2107_v63, %v2012_v5 }
 0x334   : > { %v2110_v9 = vpop.f32.mrf.mxu0 }
 0x335   : > { %2255 = vst.msk [vmem:[#allocation4 + $0x11] sm:$0xff] %vm1224_vm0, %v2234_v7  ;;  %v2143_v10 = vmul.f32 %v4342_v31, %v2131_v8 }
 0x337   : > { %v2155_v11 = vadd.f32 %v4345_v35, %v2143_v10 }
 0x338   : > { %v1937_v12 = vpop.f32.mrf.mxu2 }
 0x339   : > { %v2017_v13 = vpop.f32.mrf.mxu3  ;;  %v2165_v14 = vmax.f32 %v2155_v11, 0.0  ;;  %v2015_v15 = vadd.f32 %v2014_v3, %v1937_v12 }
 0x33b   : > { %v2235_v16 = vmul.f32 %v2200_v29, %v2165_v14  ;;  %v2132_v36 = vadd.f32 %v2110_v9, %v2015_v15 }
 0x33c   : > { %v2113_v17 = vpop.f32.mrf.mxu0 }
 0x33d   : > { %2256 = vst.msk [vmem:[#allocation4 + $0x19] sm:$0xff] %vm1224_vm0, %v2235_v16  ;;  %v2144_v18 = vmul.f32 %v4342_v31, %v2132_v36 }
 0x33f   : > { %v2156_v38 = vadd.f32 %v4345_v35, %v2144_v18 }
 0x340   : > { %v1940_v19 = vpop.f32.mrf.mxu2 }
 0x341   : > { %v2166_v61 = vmax.f32 %v2156_v38, 0.0  ;;  %v2018_v20 = vadd.f32 %v2017_v13, %v1940_v19  ;;  %v2020_v21 = vpop.f32.mrf.mxu3 }
 0x343   : > { %v2236_v62 = vmul.f32 %v2205_v42, %v2166_v61  ;;  %v2133_v22 = vadd.f32 %v2113_v17, %v2018_v20 }
 0x344   : > { %v2116_v26 = vpop.f32.mrf.mxu0 }
 0x345   : > { %2257 = vst.msk [vmem:[#allocation4 + $0x21] sm:$0xff] %vm1224_vm0, %v2236_v62  ;;  %v2145_v27 = vmul.f32 %v4342_v31, %v2133_v22 }
 0x347   : > { %v2157_v29 = vadd.f32 %v4345_v35, %v2145_v27 }
 0x348   : > { %v1943_v30 = vpop.f32.mrf.mxu2 }
 0x349   : > { %v2167_v32 = vmax.f32 %v2157_v29, 0.0  ;;  %v2021_v33 = vadd.f32 %v2020_v21, %v1943_v30  ;;  %v2023_v41 = vpop.f32.mrf.mxu3  ;;  %v2267_v30 = vld [vmem:[#allocation4 + $0x18] sm:$0xff] }
 0x34b   : > { %v2237_v34 = vmul.f32 %v2210_v52, %v2167_v32  ;;  %v2134_v39 = vadd.f32 %v2116_v26, %v2021_v33  ;;  %v2277_v32 = vld [vmem:[#allocation4 + $0x19] sm:$0xff] }
 0x34c   : > { %v2119_v43 = vpop.f32.mrf.mxu0  ;;  %v2268_v62 = vld [vmem:[#allocation4 + $0x20] sm:$0xff] }
 0x34d   : > { %2258 = vst.msk [vmem:[#allocation4 + $0x29] sm:$0xff] %vm1224_vm0, %v2237_v34  ;;  %v2146_v42 = vmul.f32 %v4342_v31, %v2134_v39  ;;  %v2278_v22 = vld [vmem:[#allocation4 + $0x21] sm:$0xff] }
 0x34e   : > { %v2288_v34 = vmax.f32 %v2268_v62, %v2278_v22  ;;  %v2297_v39 = vld [vmem:[#allocation4 + $0x1a] sm:$0xff]  ;;  %v3585_v62 = vld [vmem:[%s4717_s16 + $0x70] sm:$0xff] }
 0x34f   : > { %v2158_v44 = vadd.f32 %v4345_v35, %v2146_v42  ;;  %v2276_v42 = vld [vmem:[#allocation4 + $0x11] sm:$0xff] }
 0x350   : > { %v1946_v45 = vpop.f32.mrf.mxu2  ;;  %v2508_v22 = vld [vmem:[%s4717_s16 + $0x10] sm:$0xff] }
 0x351   : > { %v2168_v46 = vmax.f32 %v2158_v44, 0.0  ;;  %v2024_v47 = vadd.f32 %v2023_v41, %v1946_v45  ;;  %v2026_v50 = vpop.f32.mrf.mxu3  ;;  %v2266_v41 = vld [vmem:[#allocation4 + $0x10] sm:$0xff]  ;;  %v2287_v44 = vmax.f32 %v2267_v30, %v2277_v32  ;;  %v3604_v30 = vld [vmem:[%s4717_s16 + $0xa8] sm:$0xff]  ;;  %v3583_v32 = vld [vmem:[%s4717_s16 + $0x60] sm:$0xff] }
 0x352   : > { %v2296_v45 = vld [vmem:[#allocation4 + $0x12] sm:$0xff] }
 0x353   : > { %v2238_v48 = vmul.f32 %v4337_v25, %v2168_v46  ;;  %v2135_v49 = vadd.f32 %v2119_v43, %v2024_v47  ;;  %v2265_v46 = vld [vmem:[#allocation4 + $0x8] sm:$0xff] }
 0x354   : > { %v2122_v52 = vpop.f32.mrf.mxu0  ;;  %v2269_v38 = vld [vmem:[#allocation4 + $0x28] sm:$0xff] }
 0x355   : > { %2259 = vst.msk [vmem:[#allocation4 + $0x31] sm:$0xff] %vm1224_vm0, %v2238_v48  ;;  %v2147_v37 = vmul.f32 %v4342_v31, %v2135_v49  ;;  %v2279_v19 = vld [vmem:[#allocation4 + $0x29] sm:$0xff]  ;;  %v2307_v48 = vmax.f32 %v2287_v44, %v2297_v39  ;;  %v2286_v49 = vmax.f32 %v2266_v41, %v2276_v42  ;;  %v3582_v39 = vld [vmem:[%s4717_s16 + $0x58] sm:$0xff] }
 0x356   : > { %v2289_v27 = vmax.f32 %v2269_v38, %v2279_v19  ;;  %v2298_v29 = vld [vmem:[#allocation4 + $0x22] sm:$0xff]  ;;  %v3602_v41 = vld [vmem:[%s4717_s16 + $0x98] sm:$0xff]  ;;  %v3581_v42 = vld [vmem:[%s4717_s16 + $0x50] sm:$0xff] }
 0x357   : > { %v2159_v51 = vadd.f32 %v4345_v35, %v2147_v37  ;;  %v2308_v43 = vmax.f32 %v2288_v34, %v2298_v29  ;;  %v2275_v47 = vld [vmem:[#allocation4 + $0x9] sm:$0xff]  ;;  %v2510_v19 = vld [vmem:[%s4717_s16 + $0x20] sm:$0xff] }
 0x358   : > { %v1949_v53 = vpop.f32.mrf.mxu2  ;;  %v2295_v37 = vld [vmem:[#allocation4 + $0xa] sm:$0xff]  ;;  %v3603_v34 = vld [vmem:[%s4717_s16 + $0xa0] sm:$0xff] }
 0x359   : > { %v2169_v54 = vmax.f32 %v2159_v51, 0.0  ;;  %v2027_v55 = vadd.f32 %v2026_v50, %v1949_v53  ;;  %v2029_v59 = vpop.f32.mrf.mxu3  ;;  %v2264_v50 = vld [vmem:[#allocation4] sm:$0xff]  ;;  %v2285_v53 = vmax.f32 %v2265_v46, %v2275_v47  ;;  %v2511_v38 = vld [vmem:[%s4717_s16 + $0x28] sm:$0xff] }
 0x35a   : > { %v2274_v51 = vld [vmem:[#allocation4 + $0x1] sm:$0xff] }
 0x35b   : > { %v2239_v56 = vmul.f32 %v4339_v28, %v2169_v54  ;;  %v2136_v57 = vadd.f32 %v2122_v52, %v2027_v55  ;;  %v2306_v52 = vmax.f32 %v2286_v49, %v2296_v45  ;;  %v2294_v54 = vld [vmem:[#allocation4 + $0x2] sm:$0xff]  ;;  %v2305_v55 = vmax.f32 %v2285_v53, %v2295_v37 }
 0x35c   : > { %v2125_v1 = vpop.f32.mrf.mxu0  ;;  %v2270_v36 = vld [vmem:[#allocation4 + $0x30] sm:$0xff]  ;;  %v2507_v29 = vld [vmem:[%s4717_s16 + $0x8] sm:$0xff]  ;;  %v3579_v46 = vld [vmem:[%s4717_s16 + $0x40] sm:$0xff] }
 0x35d   : > { %2260 = vst.msk [vmem:[#allocation4 + $0x39] sm:$0xff] %vm1224_vm0, %v2239_v56  ;;  %v2148_v58 = vmul.f32 %v4342_v31, %v2136_v57  ;;  %v2299_v21 = vld [vmem:[#allocation4 + $0x2a] sm:$0xff]  ;;  %v2284_v56 = vmax.f32 %v2264_v50, %v2274_v51  ;;  %v3599_v47 = vld [vmem:[%s4717_s16 + $0x80] sm:$0xff] }
 0x35e   : > { %v2309_v33 = vmax.f32 %v2289_v27, %v2299_v21  ;;  %v3606_v21 = vld [vmem:[%s4717_s16 + $0xb8] sm:$0xff]  ;;  %v3584_v27 = vld [vmem:[%s4717_s16 + $0x68] sm:$0xff] }
 0x35f   : > { %v2160_v25 = vadd.f32 %v4345_v35, %v2148_v58  ;;  %v2304_v57 = vmax.f32 %v2284_v56, %v2294_v54  ;;  %v2314_v58 = vld [vmem:[%s3866_s30] sm:$0xff]  ;;  %v3580_v44 = vld [vmem:[%s4717_s16 + $0x48] sm:$0xff] }
 0x360   : > { %v1952_v60 = vpop.f32.mrf.mxu2  ;;  %v3600_v45 = vld [vmem:[%s4717_s16 + $0x88] sm:$0xff] }
 0x361   : > { %v2170_v63 = vmax.f32 %v2160_v25, 0.0  ;;  %v2030_v0 = vadd.f32 %v2029_v59, %v1952_v60  ;;  %v2315_v25 = vld [vmem:[%s3866_s30 + $0x8] sm:$0xff]  ;;  %v2385_v59 = vld [vmem:[%s3871_s6 + $0x38] sm:$0xff] }
 0x362   : > { %v2452_v60 = vld [vmem:[%s4716_s15 + $0x38] sm:$0xff]  ;;  %2412 = vmatpush.msra.mxu2 %v2385_v59 }
 0x363   : > { %v2240_v2 = vmul.f32 %v4317_v23, %v2170_v63  ;;  %v2137_v3 = vadd.f32 %v2125_v1, %v2030_v0  ;;  %v2384_v63 = vld [vmem:[%s3871_s6 + $0x30] sm:$0xff]  ;;  %2461 = vmatpush.msra.mxu3 %v2452_v60  ;;  %v2383_v1 = vld [vmem:[%s3871_s6 + $0x28] sm:$0xff] }
 0x364   : > { %v2271_v12 = vld [vmem:[#allocation4 + $0x38] sm:$0xff]  ;;  %v2451_v0 = vld [vmem:[%s4716_s15 + $0x30] sm:$0xff]  ;;  %2413 = vmatpush.msra.mxu2 %v2384_v63 }
 0x365   : > { %v2149_v4 = vmul.f32 %v4342_v31, %v2137_v3  ;;  %2261 = vst.msk [vmem:[#allocation4 + $0x41] sm:$0xff] %vm1224_vm0, %v2240_v2  ;;  %v2281_v14 = vld [vmem:[#allocation4 + $0x39] sm:$0xff]  ;;  %v2450_v2 = vld [vmem:[%s4716_s15 + $0x28] sm:$0xff]  ;;  %2462 = vmatpush.msra.mxu3 %v2451_v0 }
 0x366   : > { %v2300_v18 = vld [vmem:[#allocation4 + $0x32] sm:$0xff]  ;;  %v2382_v3 = vld [vmem:[%s3871_s6 + $0x20] sm:$0xff]  ;;  %2414 = vmatpush.msra.mxu2 %v2383_v1 }
 0x367   : > { %v2161_v28 = vadd.f32 %v4345_v35, %v2149_v4  ;;  %v2280_v35 = vld [vmem:[#allocation4 + $0x31] sm:$0xff]  ;;  %v2449_v4 = vld [vmem:[%s4716_s15 + $0x20] sm:$0xff]  ;;  %2463 = vmatpush.msra.mxu3 %v2450_v2 }
 0x368   : > { %v2290_v20 = vmax.f32 %v2270_v36, %v2280_v35  ;;  %2415 = vmatpush.msra.mxu2 %v2382_v3 }
 0x369   : > { %v2171_v5 = vmax.f32 %v2161_v28, 0.0  ;;  %v2316_v28 = vld [vmem:[%s3866_s30 + $0x10] sm:$0xff]  ;;  %2464 = vmatpush.msra.mxu3 %v2449_v4 }
 0x36a   : > { %v2310_v26 = vmax.f32 %v2290_v20, %v2300_v18  ;;  %v2512_v18 = vld [vmem:[%s4717_s16 + $0x30] sm:$0xff]  ;;  %v2509_v20 = vld [vmem:[%s4717_s16 + $0x18] sm:$0xff] }
 0x36b   : > { %v2241_v6 = vmul.f32 %v4347_v40, %v2171_v5  ;;  %v2291_v40 = vmax.f32 %v2271_v12, %v2281_v14  ;;  %v2381_v5 = vld [vmem:[%s3871_s6 + $0x18] sm:$0xff]  ;;  %v2319_v12 = vld [vmem:[%s3866_s30 + $0x28] sm:$0xff]  ;;  %v2445_v14 = vld [vmem:[%s4716_s15] sm:$0xff] }
 0x36c   : > { %v2272_v7 = vld [vmem:[#allocation4 + $0x40] sm:$0xff]  ;;  %2416 = vmatpush.msra.mxu2 %v2381_v5 }
 0x36d   : > { %2263 = vst.msk [vmem:[#allocation4 + $0x49] sm:$0x3f] %vm2262_vm4, %v2241_v6  ;;  %v2282_v10 = vld [vmem:[#allocation4 + $0x41] sm:$0xff]  ;;  %v2448_v6 = vld [vmem:[%s4716_s15 + $0x18] sm:$0xff]  ;;  %vm3353_vm4 = vcmask 16384  }
 0x36e   : > { %v2292_v15 = vmax.f32 %v2272_v7, %v2282_v10  ;;  %v2301_v16 = vld [vmem:[#allocation4 + $0x3a] sm:$0xff]  ;;  %v2380_v7 = vld [vmem:[%s3871_s6 + $0x10] sm:$0xff]  ;;  %2465 = vmatpush.msra.mxu3 %v2448_v6 }
 0x36f   : > { %v2311_v61 = vmax.f32 %v2291_v40, %v2301_v16  ;;  %2417 = vmatpush.msra.mxu2 %v2380_v7  ;;  %v2317_v10 = vld [vmem:[%s3866_s30 + $0x18] sm:$0xff] }
 0x370   : > { %v2513_v16 = vld [vmem:[%s4717_s16 + $0x38] sm:$0xff] }
 0x374   : > { %v2273_v8 = vld [vmem:[#allocation4 + $0x48] sm:$0x1f] }
 0x375   : > { %v2283_v9 = vld [vmem:[#allocation4 + $0x49] sm:$0x1f] }
 0x376   : > { %v2293_v11 = vmax.f32 %v2273_v8, %v2283_v9  ;;  %v2303_v13 = vld [vmem:[#allocation4 + $0x4a] sm:$0x1f]  ;;  %v2302_v23 = vld [vmem:[#allocation4 + $0x42] sm:$0xff]  ;;  %v2447_v8 = vld [vmem:[%s4716_s15 + $0x10] sm:$0xff] }
 0x377   : > { %v2312_v17 = vmax.f32 %v2292_v15, %v2302_v23  ;;  %v2379_v9 = vld [vmem:[%s3871_s6 + $0x8] sm:$0xff]  ;;  %2466 = vmatpush.msra.mxu3 %v2447_v8  ;;  %v2378_v23 = vld [vmem:[%s3871_s6] sm:$0xff] }
 0x378   : > { %v2313_v31 = vmax.f32 %v2293_v11, %v2303_v13  ;;  %2418 = vmatpush.msra.mxu2 %v2379_v9  ;;  %v2318_v11 = vld [vmem:[%s3866_s30 + $0x20] sm:$0xff]  ;;  %v2446_v13 = vld [vmem:[%s4716_s15 + $0x8] sm:$0xff] }
 0x379   : > { %2467 = vmatpush.msra.mxu3 %v2446_v13 }
 0x37a   : > { %3560 = vmatpush.msk.msra.mxu1 %vm2339_vm5, %v2313_v31  ;;  %2419 = vmatpush.msra.mxu2 %v2378_v23 }
 0x37b   : > { %2468 = vmatpush.msra.mxu3 %v2445_v14 }
 0x37c   : > { %2350 = vmatpush.msra.mxu1 %v2312_v17  ;;  %2676 = vmatpush.msrb.mxu2 %v3606_v21  ;;  %v2758_v21 = vld [vmem:[%s4718_s18 + $0x8] sm:$0xff] }
 0x37e   : > { %2351 = vmatpush.msra.mxu1 %v2311_v61  ;;  %v3586_v61 = vld [vmem:[%s4717_s16 + $0x78] sm:$0xff] }
 0x37f   : > { %2555 = vmatpush.msra.mxu0 %v3586_v61  ;;  %v2760_v61 = vld [vmem:[%s4718_s18 + $0x18] sm:$0xff] }
 0x380   : > { %2352 = vmatpush.msra.mxu1 %v2310_v26  ;;  %v3605_v26 = vld [vmem:[%s4717_s16 + $0xb0] sm:$0xff]  ;;  %2791 = vmatpush.msrb.mxu3 %v2760_v61 }
 0x381   : > { %2556 = vmatpush.msra.mxu0 %v3585_v62  ;;  %2677 = vmatpush.msrb.mxu2 %v3605_v26 }
 0x382   : > { %2353 = vmatpush.msra.mxu1 %v2309_v33  ;;  %v2506_v33 = vld [vmem:[%s4717_s16] sm:$0xff] }
 0x383   : > { %2557 = vmatpush.msra.mxu0 %v3584_v27  ;;  %2678 = vmatpush.msrb.mxu2 %v3604_v30 }
 0x384   : > { %2354 = vmatpush.msra.mxu1 %v2308_v43  ;;  %v3601_v43 = vld [vmem:[%s4717_s16 + $0x90] sm:$0xff] }
 0x385   : > { %2558 = vmatpush.msra.mxu0 %v3583_v32  ;;  %2679 = vmatpush.msrb.mxu2 %v3603_v34 }
 0x386   : > { %2355 = vmatpush.msra.mxu1 %v2307_v48 }
 0x387   : > { %2559 = vmatpush.msra.mxu0 %v3582_v39  ;;  %2680 = vmatpush.msrb.mxu2 %v3602_v41 }
 0x388   : > { %2356 = vmatpush.msra.mxu1 %v2306_v52 }
 0x389   : > { %2560 = vmatpush.msra.mxu0 %v3581_v42  ;;  %2681 = vmatpush.msrb.mxu2 %v3601_v43 }
 0x38a   : > { %2357 = vmatpush.msra.mxu1 %v2305_v55 }
 0x38b   : > { %2561 = vmatpush.msra.mxu0 %v3580_v44  ;;  %2682 = vmatpush.msrb.mxu2 %v3600_v45 }
 0x38c   : > { %2358 = vmatpush.msra.mxu1 %v2304_v57 }
 0x38d   : > { %3561 = vmatmul.msk.f32.vlgmr.msra.gmra.mxu1 %vm2320_vm6, %v2314_v58  ;;  %2562 = vmatpush.msra.mxu0 %v3579_v46 }
 0x38e   : > { %2608 = vmatpush.msrb.mxu1 %v2513_v16  ;;  %2683 = vmatpush.msrb.mxu2 %v3599_v47 }
 0x390   : > { %2609 = vmatpush.msrb.mxu1 %v2512_v18 }
 0x392   : > { %2610 = vmatpush.msrb.mxu1 %v2511_v38 }
 0x394   : > { %2611 = vmatpush.msrb.mxu1 %v2510_v19 }
 0x395   : > { %3562 = vmatmul.msk.f32.gmra.mxu1 %vm2320_vm6, %v2315_v25 }
 0x396   : > { %2612 = vmatpush.msrb.mxu1 %v2509_v20  ;;  %v2759_v20 = vld [vmem:[%s4718_s18 + $0x10] sm:$0xff] }
 0x397   : > { %2792 = vmatpush.msrb.mxu3 %v2759_v20 }
 0x398   : > { %2613 = vmatpush.msrb.mxu1 %v2508_v22  ;;  %v2757_v22 = vld [vmem:[%s4718_s18] sm:$0xff] }
 0x399   : > { %2793 = vmatpush.msrb.mxu3 %v2758_v21 }
 0x39a   : > { %2614 = vmatpush.msrb.mxu1 %v2507_v29  ;;  %v3744_v29 = vld [vmem:[%s4719_s22] ss:$0 sm:$0xff] }
 0x39b   : > { %2794 = vmatpush.msrb.mxu3 %v2757_v22 }
 0x39c   : > { %2615 = vmatpush.msrb.mxu1 %v2506_v33  ;;  %v3745_v33 = vld [vmem:[%s4719_s22 + $0x1] ss:$0 sm:$0xff] }
 0x39d   : > { %3563 = vmatmul.msk.f32.gmra.mxu1 %vm2320_vm6, %v2316_v28 }
 0x3a5   : > { %3564 = vmatmul.msk.f32.gmra.mxu1 %vm2320_vm6, %v2317_v10 }
 0x3ad   : > { %3565 = vmatmul.msk.f32.gmra.mxu1 %vm2320_vm6, %v2318_v11 }
 0x3b5   : > { %3566 = vmatmul.msk.f32.gmra.mxu1 %vm2320_vm6, %v2319_v12 }
 0x40a   : > { %v4412_v31 = vpop.f32.mrf.mxu1 }
 0x40b   : > { %3567 = vmatmul.msk.f32.vlgmr.msra.gmra.mxu2 %vm1224_vm0, %v4412_v31  ;;  %3573 = vmatmul.msk.f32.vlgmr.msra.gmra.mxu3 %vm1224_vm0, %v4412_v31 }
 0x412   : > { %v4418_v15 = vpop.f32.mrf.mxu1 }
 0x413   : > { %3568 = vmatmul.msk.f32.gmra.mxu2 %vm1224_vm0, %v4418_v15  ;;  %3574 = vmatmul.msk.f32.gmra.mxu3 %vm1224_vm0, %v4418_v15 }
 0x41a   : > { %v4425_v36 = vpop.f32.mrf.mxu1 }
 0x41b   : > { %3569 = vmatmul.msk.f32.gmra.mxu2 %vm1224_vm0, %v4425_v36  ;;  %3575 = vmatmul.msk.f32.gmra.mxu3 %vm1224_vm0, %v4425_v36 }
 0x422   : > { %v4431_v35 = vpop.f32.mrf.mxu1 }
 0x423   : > { %3570 = vmatmul.msk.f32.gmra.mxu2 %vm1224_vm0, %v4431_v35  ;;  %3576 = vmatmul.msk.f32.gmra.mxu3 %vm1224_vm0, %v4431_v35 }
 0x42a   : > { %v4437_v17 = vpop.f32.mrf.mxu1 }
 0x42b   : > { %3571 = vmatmul.msk.f32.gmra.mxu2 %vm1224_vm0, %v4437_v17  ;;  %3577 = vmatmul.msk.f32.gmra.mxu3 %vm1224_vm0, %v4437_v17 }
 0x432   : > { %v4443_v40 = vpop.f32.mrf.mxu1 }
 0x433   : > { %3572 = vmatmul.msk.f32.gmra.mxu2 %vm1224_vm0, %v4443_v40  ;;  %3578 = vmatmul.msk.f32.gmra.mxu3 %vm1224_vm0, %v4443_v40 }
 0x48e   : > { %v2421_v48 = vpop.f32.mrf.mxu2  ;;  %v2470_v49 = vpop.f32.mrf.mxu3 }
 0x48f   : > { %v2439_v37 = vmax.f32 %v4412_v31, %v2421_v48 }
 0x491   : > { %v2488_v50 = vmax.f32 %v2439_v37, %v2470_v49 }
 0x493   : > { %2494 = vst.msk [vmem:[#allocation5] sm:$0xff] %vm1224_vm0, %v2488_v50 }
 0x496   : > { %v2424_v51 = vpop.f32.mrf.mxu2  ;;  %v2473_v52 = vpop.f32.mrf.mxu3 }
 0x497   : > { %v2440_v53 = vmax.f32 %v4418_v15, %v2424_v51 }
 0x499   : > { %v2489_v54 = vmax.f32 %v2440_v53, %v2473_v52 }
 0x49a   : > { %v2500_v55 = vld [vmem:[#allocation5] sm:$0xff] }
 0x49b   : > { %2495 = vst.msk [vmem:[#allocation5 + $0x8] sm:$0xff] %vm1224_vm0, %v2489_v54  ;;  %3593 = vmatmul.msk.f32.vlgmr.msrb.gmra.mxu1 %vm1224_vm0, %v2500_v55 }
 0x49e   : > { %v2427_v56 = vpop.f32.mrf.mxu2  ;;  %v2476_v57 = vpop.f32.mrf.mxu3 }
 0x49f   : > { %v2441_v58 = vmax.f32 %v4425_v36, %v2427_v56 }
 0x4a1   : > { %v2490_v25 = vmax.f32 %v2441_v58, %v2476_v57 }
 0x4a2   : > { %v2514_v59 = vld [vmem:[#allocation5 + $0x1] sm:$0xff] }
 0x4a3   : > { %v2501_v60 = vld [vmem:[#allocation5 + $0x8] sm:$0xff]  ;;  %2496 = vst.msk [vmem:[#allocation5 + $0x10] sm:$0xff] %vm1224_vm0, %v2490_v25  ;;  %3587 = vmatmul.msk.f32.vlgmr.msra.gmra.mxu0 %vm1224_vm0, %v2514_v59 }
 0x4a4   : > { %v2635_v63 = vld [vmem:[#allocation5 + $0x2] sm:$0xff]  ;;  %3594 = vmatmul.msk.f32.gmra.mxu1 %vm1224_vm0, %v2501_v60 }
 0x4a5   : > { %3607 = vmatmul.msk.f32.vlgmr.msrb.gmra.mxu2 %vm1224_vm0, %v2635_v63 }
 0x4a6   : > { %v2430_v0 = vpop.f32.mrf.mxu2  ;;  %v2479_v1 = vpop.f32.mrf.mxu3 }
 0x4a7   : > { %v2442_v2 = vmax.f32 %v4431_v35, %v2430_v0 }
 0x4a9   : > { %v2491_v3 = vmax.f32 %v2442_v2, %v2479_v1 }
 0x4aa   : > { %v2515_v4 = vld [vmem:[#allocation5 + $0x9] sm:$0xff] }
 0x4ab   : > { %v2502_v28 = vld [vmem:[#allocation5 + $0x10] sm:$0xff]  ;;  %2497 = vst.msk [vmem:[#allocation5 + $0x18] sm:$0xff] %vm1224_vm0, %v2491_v3  ;;  %3588 = vmatmul.msk.f32.gmra.mxu0 %vm1224_vm0, %v2515_v4 }
 0x4ac   : > { %v2636_v5 = vld [vmem:[#allocation5 + $0xa] sm:$0xff]  ;;  %3595 = vmatmul.msk.f32.gmra.mxu1 %vm1224_vm0, %v2502_v28 }
 0x4ad   : > { %3608 = vmatmul.msk.f32.gmra.mxu2 %vm1224_vm0, %v2636_v5 }
 0x4ae   : > { %v2433_v6 = vpop.f32.mrf.mxu2  ;;  %v2482_v7 = vpop.f32.mrf.mxu3 }
 0x4af   : > { %v2443_v8 = vmax.f32 %v4437_v17, %v2433_v6 }
 0x4b1   : > { %v2492_v9 = vmax.f32 %v2443_v8, %v2482_v7 }
 0x4b2   : > { %v2516_v10 = vld [vmem:[#allocation5 + $0x11] sm:$0xff] }
 0x4b3   : > { %v2503_v11 = vld [vmem:[#allocation5 + $0x18] sm:$0xff]  ;;  %2498 = vst.msk [vmem:[#allocation5 + $0x20] sm:$0xff] %vm1224_vm0, %v2492_v9  ;;  %3589 = vmatmul.msk.f32.gmra.mxu0 %vm1224_vm0, %v2516_v10 }
 0x4b4   : > { %v2637_v12 = vld [vmem:[#allocation5 + $0x12] sm:$0xff]  ;;  %3596 = vmatmul.msk.f32.gmra.mxu1 %vm1224_vm0, %v2503_v11 }
 0x4b5   : > { %3609 = vmatmul.msk.f32.gmra.mxu2 %vm1224_vm0, %v2637_v12 }
 0x4b6   : > { %v2436_v13 = vpop.f32.mrf.mxu2  ;;  %v2485_v14 = vpop.f32.mrf.mxu3 }
 0x4b7   : > { %v2444_v23 = vmax.f32 %v4443_v40, %v2436_v13 }
 0x4b9   : > { %v2493_v31 = vmax.f32 %v2444_v23, %v2485_v14 }
 0x4ba   : > { %v2517_v15 = vld [vmem:[#allocation5 + $0x19] sm:$0xff] }
 0x4bb   : > { %v2504_v16 = vld [vmem:[#allocation5 + $0x20] sm:$0xff]  ;;  %2499 = vst.msk [vmem:[#allocation5 + $0x28] sm:$0xff] %vm1224_vm0, %v2493_v31  ;;  %3590 = vmatmul.msk.f32.gmra.mxu0 %vm1224_vm0, %v2517_v15 }
 0x4bc   : > { %v2638_v36 = vld [vmem:[#allocation5 + $0x1a] sm:$0xff]  ;;  %3597 = vmatmul.msk.f32.gmra.mxu1 %vm1224_vm0, %v2504_v16 }
 0x4bd   : > { %3610 = vmatmul.msk.f32.gmra.mxu2 %vm1224_vm0, %v2638_v36 }
 0x4c2   : > { %v2518_v35 = vld [vmem:[#allocation5 + $0x21] sm:$0xff]  ;;  %v2519_v40 = vld [vmem:[#allocation5 + $0x29] sm:$0x3f] }
 0x4c3   : > { %v2505_v17 = vld [vmem:[#allocation5 + $0x28] sm:$0x3f]  ;;  %3591 = vmatmul.msk.f32.gmra.mxu0 %vm1224_vm0, %v2518_v35 }
 0x4c4   : > { %v2639_v18 = vld [vmem:[#allocation5 + $0x22] sm:$0xff]  ;;  %3598 = vmatmul.msk.f32.gmra.mxu1 %vm1224_vm0, %v2505_v17  ;;  %v2640_v38 = vld [vmem:[#allocation5 + $0x2a] sm:$0x3f] }
 0x4c5   : > { %3611 = vmatmul.msk.f32.gmra.mxu2 %vm1224_vm0, %v2639_v18 }
 0x4cb   : > { %3592 = vmatmul.msk.f32.gmra.mxu0 %vm1224_vm0, %v2519_v40 }
 0x4cd   : > { %3612 = vmatmul.msk.f32.gmra.mxu2 %vm1224_vm0, %v2640_v38  ;;  %vm3007_vm0 = vcmask 781312  }
 0x4ce   : > { %3156 = vst.msk [vmem:[#allocation10] sm:$0xf] %vm3007_vm0, %v3795_v24  ;;  %v3011_v24 = vld [vmem:[%s4723_s0 + $0x8] sm:$0xff] }
 0x518   : > { %v2617_v19 = vpop.f32.mrf.mxu1 }
 0x520   : > { %v2564_v62 = vpop.f32.mrf.mxu0 }
 0x521   : > { %v2620_v26 = vpop.f32.mrf.mxu1  ;;  %v2618_v27 = vadd.f32 %v2617_v19, %v2564_v62 }
 0x528   : > { %v2685_v30 = vpop.f32.mrf.mxu2  ;;  %v2567_v34 = vpop.f32.mrf.mxu0 }
 0x529   : > { %v2703_v32 = vadd.f32 %v2685_v30, %v2618_v27  ;;  %v2621_v43 = vadd.f32 %v2620_v26, %v2567_v34  ;;  %v2623_v44 = vpop.f32.mrf.mxu1 }
 0x52b   : > { %v2711_v39 = vmul.f32 %v3744_v29, %v2703_v32 }
 0x52d   : > { %v2719_v41 = vadd.f32 %v3745_v33, %v2711_v39 }
 0x52f   : > { %v2725_v42 = vmax.f32 %v2719_v41, 0.0 }
 0x530   : > { %v2688_v45 = vpop.f32.mrf.mxu2  ;;  %v2570_v47 = vpop.f32.mrf.mxu0 }
 0x531   : > { %2732 = vst.msk [vmem:[#allocation6] sm:$0xff] %vm2731_vm7, %v2725_v42  ;;  %v2704_v46 = vadd.f32 %v2688_v45, %v2621_v43  ;;  %v2624_v50 = vadd.f32 %v2623_v44, %v2570_v47  ;;  %v2626_v54 = vpop.f32.mrf.mxu1 }
 0x533   : > { %v2712_v48 = vmul.f32 %v3744_v29, %v2704_v46 }
 0x535   : > { %v2720_v49 = vadd.f32 %v3745_v33, %v2712_v48  ;;  %v3624_v48 = vld [vmem:[%s4720_s23 + $0x10] sm:$0xff] }
 0x537   : > { %v2726_v37 = vmax.f32 %v2720_v49, 0.0  ;;  %v2820_v49 = vld [vmem:[%s4720_s23] sm:$0xff] }
 0x538   : > { %v2691_v51 = vpop.f32.mrf.mxu2  ;;  %v2573_v53 = vpop.f32.mrf.mxu0  ;;  %v2739_v59 = vld [vmem:[#allocation6] sm:$0xff] }
 0x539   : > { %2733 = vst.msk [vmem:[#allocation6 + $0x8] sm:$0xff] %vm2731_vm7, %v2726_v37  ;;  %v2705_v52 = vadd.f32 %v2691_v51, %v2624_v50  ;;  %v2627_v58 = vadd.f32 %v2626_v54, %v2573_v53  ;;  %v2629_v3 = vpop.f32.mrf.mxu1  ;;  %v3621_v37 = vld [vmem:[%s4720_s23 + $0x8] sm:$0xff]  ;;  %v2938_v50 = vld [vmem:[%s4721_s26 + $0x58] sm:$0xff]  ;;  %v2937_v51 = vld [vmem:[%s4721_s26 + $0x50] sm:$0xff] }
 0x53a   : > { %2947 = vmatpush.msra.mxu2 %v2938_v50  ;;  %v3746_v53 = vld [vmem:[%s4722_s28] ss:$0 sm:$0xff] }
 0x53b   : > { %v2713_v55 = vmul.f32 %v3744_v29, %v2705_v52  ;;  %v2936_v52 = vld [vmem:[%s4721_s26 + $0x48] sm:$0xff]  ;;  %v3747_v54 = vld [vmem:[%s4722_s28] ss:$0 sm:$0xff] }
 0x53c   : > { %2948 = vmatpush.msra.mxu2 %v2937_v51  ;;  %v3010_v50 = vld [vmem:[%s4723_s0] sm:$0xff] }
 0x53d   : > { %v2721_v56 = vadd.f32 %v3745_v33, %v2713_v55  ;;  %v3643_v51 = vld [vmem:[%s4723_s0 + $0xc0] sm:$0xff] }
 0x53e   : > { %2949 = vmatpush.msra.mxu2 %v2936_v52 }
 0x53f   : > { %v2727_v57 = vmax.f32 %v2721_v56, 0.0 }
 0x540   : > { %v2694_v25 = vpop.f32.mrf.mxu2  ;;  %v2745_v60 = vld [vmem:[#allocation6 + $0x1] sm:$0xff]  ;;  %v2576_v1 = vpop.f32.mrf.mxu0 }
 0x541   : > { %2734 = vst.msk [vmem:[#allocation6 + $0x10] sm:$0xff] %vm2731_vm7, %v2727_v57  ;;  %v2706_v63 = vadd.f32 %v2694_v25, %v2627_v58  ;;  %v4511_v0 = vmax.f32 %v2739_v59, %v2745_v60  ;;  %v2630_v5 = vadd.f32 %v2629_v3, %v2576_v1  ;;  %v2740_v7 = vld [vmem:[#allocation6 + $0x8] sm:$0xff]  ;;  %v2632_v23 = vpop.f32.mrf.mxu1  ;;  %v3748_v25 = vld [vmem:[%s4722_s28] ss:$0 sm:$0xff]  ;;  %v2933_v1 = vld [vmem:[%s4721_s26 + $0x30] sm:$0xff] }
 0x542   : > { %v2931_v3 = vld [vmem:[%s4721_s26 + $0x20] sm:$0xff] }
 0x543   : > { %v2714_v2 = vmul.f32 %v3744_v29, %v2706_v63  ;;  %3613 = vmatmul.msk.f32.vlgmr.msrb.gmra.mxu3 %vm2731_vm7, %v4511_v0  ;;  %v2935_v63 = vld [vmem:[%s4721_s26 + $0x40] sm:$0xff] }
 0x544   : > { %2950 = vmatpush.msra.mxu2 %v2935_v63 }
 0x545   : > { %v2722_v4 = vadd.f32 %v3745_v33, %v2714_v2  ;;  %v2932_v2 = vld [vmem:[%s4721_s26 + $0x28] sm:$0xff] }
 0x547   : > { %v2728_v28 = vmax.f32 %v2722_v4, 0.0  ;;  %v2930_v4 = vld [vmem:[%s4721_s26 + $0x18] sm:$0xff] }
 0x548   : > { %v2697_v6 = vpop.f32.mrf.mxu2  ;;  %v2746_v8 = vld [vmem:[#allocation6 + $0x9] sm:$0xff]  ;;  %v2579_v12 = vpop.f32.mrf.mxu0 }
 0x549   : > { %2735 = vst.msk [vmem:[#allocation6 + $0x18] sm:$0xff] %vm2731_vm7, %v2728_v28  ;;  %v2707_v9 = vadd.f32 %v2697_v6, %v2630_v5  ;;  %v2752_v10 = vmax.f32 %v2740_v7, %v2746_v8  ;;  %v2633_v31 = vadd.f32 %v2632_v23, %v2579_v12  ;;  %v2741_v16 = vld [vmem:[#allocation6 + $0x10] sm:$0xff]  ;;  %v2928_v5 = vld [vmem:[%s4721_s26 + $0x8] sm:$0xff]  ;;  %v2927_v6 = vld [vmem:[%s4721_s26] sm:$0xff] }
 0x54a   : > { %v2929_v28 = vld [vmem:[%s4721_s26 + $0x10] sm:$0xff]  ;;  %v3640_v8 = vld [vmem:[%s4723_s0 + $0xb8] sm:$0xff]  ;;  %v3637_v12 = vld [vmem:[%s4723_s0 + $0xa0] sm:$0xff] }
 0x54b   : > { %v2715_v11 = vmul.f32 %v3744_v29, %v2707_v9  ;;  %3614 = vmatmul.msk.f32.gmra.mxu3 %vm2731_vm7, %v2752_v10  ;;  %v3639_v9 = vld [vmem:[%s4723_s0 + $0xb0] sm:$0xff]  ;;  %v3636_v23 = vld [vmem:[%s4723_s0 + $0x98] sm:$0xff] }
 0x54c   : > { %3043 = vmatpush.msra.mxu3 %v3640_v8 }
 0x54d   : > { %v2723_v13 = vadd.f32 %v3745_v33, %v2715_v11  ;;  %v3654_v11 = vld [vmem:[%s4723_s0 + $0x118] sm:$0xff] }
 0x54e   : > { %3044 = vmatpush.msra.mxu3 %v3639_v9 }
 0x54f   : > { %v2729_v14 = vmax.f32 %v2723_v13, 0.0  ;;  %v3653_v13 = vld [vmem:[%s4723_s0 + $0x110] sm:$0xff] }
 0x550   : > { %v2700_v15 = vpop.f32.mrf.mxu2  ;;  %v2747_v36 = vld [vmem:[#allocation6 + $0x11] sm:$0xff] }
 0x551   : > { %2736 = vst.msk [vmem:[#allocation6 + $0x20] sm:$0xff] %vm2731_vm7, %v2729_v14  ;;  %v2708_v35 = vadd.f32 %v2700_v15, %v2633_v31  ;;  %v2753_v17 = vmax.f32 %v2741_v16, %v2747_v36  ;;  %v2742_v19 = vld [vmem:[#allocation6 + $0x18] sm:$0xff]  ;;  %v3652_v14 = vld [vmem:[%s4723_s0 + $0x108] sm:$0xff]  ;;  %v3635_v31 = vld [vmem:[%s4723_s0 + $0x90] sm:$0xff] }
 0x552   : > { %v3634_v16 = vld [vmem:[%s4723_s0 + $0x88] sm:$0xff] }
 0x553   : > { %v2716_v18 = vmul.f32 %v3744_v29, %v2708_v35  ;;  %3615 = vmatmul.msk.f32.gmra.mxu3 %vm2731_vm7, %v2753_v17 }
 0x555   : > { %v2724_v40 = vadd.f32 %v3745_v33, %v2716_v18 }
 0x557   : > { %v2730_v38 = vmax.f32 %v2724_v40, 0.0 }
 0x558   : > { %v2748_v61 = vld [vmem:[#allocation6 + $0x19] sm:$0xff] }
 0x559   : > { %2738 = vst.msk [vmem:[#allocation6 + $0x28] sm:$0x3f] %vm2737_vm8, %v2730_v38  ;;  %v2754_v20 = vmax.f32 %v2742_v19, %v2748_v61  ;;  %v2743_v21 = vld [vmem:[#allocation6 + $0x20] sm:$0xff]  ;;  %v3021_v61 = vld [vmem:[%s4723_s0 + $0x58] sm:$0xff] }
 0x55a   : > { %v2980_v19 = vld [vmem:[%s4724_s11] sm:$0xf]  ;;  %s4726_s11 = sld [smem:[#allocation24_spill]] }
 0x55b   : > { %3616 = vmatmul.msk.f32.gmra.mxu3 %vm2731_vm7, %v2754_v20 }
 0x560   : > { %v2749_v62 = vld [vmem:[#allocation6 + $0x21] sm:$0xff]  ;;  %v2750_v27 = vld [vmem:[#allocation6 + $0x29] sm:$0x1f]  ;;  %v3668_v63 = vld [vmem:[%s4726_s11 + $0xb0] sm:$0xff] }
 0x561   : > { %v2755_v22 = vmax.f32 %v2743_v21, %v2749_v62  ;;  %v2744_v26 = vld [vmem:[#allocation6 + $0x28] sm:$0x1f]  ;;  %v3018_v62 = vld [vmem:[%s4723_s0 + $0x40] sm:$0xff]  ;;  %v3169_v8 = vld [vmem:[%s4726_s11 + $0x50] sm:$0xff] }
 0x562   : > { %v2756_v30 = vmax.f32 %v2744_v26, %v2750_v27  ;;  %v3019_v21 = vld [vmem:[%s4723_s0 + $0x48] sm:$0xff]  ;;  %v3017_v26 = vld [vmem:[%s4723_s0 + $0x38] sm:$0xff] }
 0x563   : > { %3617 = vmatmul.msk.f32.gmra.mxu3 %vm2731_vm7, %v2755_v22  ;;  %v3650_v27 = vld [vmem:[%s4723_s0 + $0xf8] sm:$0xff]  ;;  %v3168_v9 = vld [vmem:[%s4726_s11 + $0x48] sm:$0xff] }
 0x56b   : > { %3618 = vmatmul.msk.f32.gmra.mxu3 %vm2731_vm7, %v2756_v30 }
 0x5c6   : > { %v2796_v29 = vpop.f32.mrf.mxu3 }
 0x5c7   : > { %v2814_v47 = vmax.f32 %v4511_v0, %v2796_v29  ;;  %v2934_v0 = vld [vmem:[%s4721_s26 + $0x38] sm:$0xff]  ;;  %v3649_v29 = vld [vmem:[%s4723_s0 + $0xf0] sm:$0xff] }
 0x5c8   : > { %2951 = vmatpush.msra.mxu2 %v2934_v0  ;;  %v3667_v0 = vld [vmem:[%s4726_s11 + $0xa8] sm:$0xff] }
 0x5ca   : > { %2952 = vmatpush.msra.mxu2 %v2933_v1  ;;  %v3666_v1 = vld [vmem:[%s4726_s11 + $0xa0] sm:$0xff] }
 0x5cc   : > { %2953 = vmatpush.msra.mxu2 %v2932_v2 }
 0x5ce   : > { %v2799_v32 = vpop.f32.mrf.mxu3  ;;  %2954 = vmatpush.msra.mxu2 %v2931_v3 }
 0x5cf   : > { %v2815_v46 = vmax.f32 %v2752_v10, %v2799_v32  ;;  %v3638_v10 = vld [vmem:[%s4723_s0 + $0xa8] sm:$0xff] }
 0x5d0   : > { %2955 = vmatpush.msra.mxu2 %v2930_v4  ;;  %3045 = vmatpush.msra.mxu3 %v3638_v10  ;;  %v3015_v32 = vld [vmem:[%s4723_s0 + $0x28] sm:$0xff]  ;;  %v3167_v10 = vld [vmem:[%s4726_s11 + $0x40] sm:$0xff] }
 0x5d2   : > { %2956 = vmatpush.msra.mxu2 %v2929_v28  ;;  %3046 = vmatpush.msra.mxu3 %v3637_v12  ;;  %v3682_v12 = vld [vmem:[%s4726_s11 + $0x110] sm:$0xff] }
 0x5d4   : > { %2957 = vmatpush.msra.mxu2 %v2928_v5  ;;  %3047 = vmatpush.msra.mxu3 %v3636_v23  ;;  %v3680_v23 = vld [vmem:[%s4726_s11 + $0x100] sm:$0xff] }
 0x5d6   : > { %v2802_v33 = vpop.f32.mrf.mxu3  ;;  %2958 = vmatpush.msra.mxu2 %v2927_v6  ;;  %3048 = vmatpush.msra.mxu3 %v3635_v31  ;;  %v3166_v31 = vld [vmem:[%s4726_s11 + $0x38] sm:$0xff] }
 0x5d7   : > { %v2816_v45 = vmax.f32 %v2753_v17, %v2802_v33  ;;  %v3648_v33 = vld [vmem:[%s4723_s0 + $0xe8] sm:$0xff] }
 0x5d8   : > { %3049 = vmatpush.msra.mxu3 %v3634_v16  ;;  %v3664_v16 = vld [vmem:[%s4726_s11 + $0x90] sm:$0xff] }
 0x5de   : > { %v2805_v34 = vpop.f32.mrf.mxu3 }
 0x5df   : > { %v2817_v44 = vmax.f32 %v2754_v20, %v2805_v34  ;;  %v3020_v20 = vld [vmem:[%s4723_s0 + $0x50] sm:$0xff]  ;;  %v3633_v34 = vld [vmem:[%s4723_s0 + $0x80] sm:$0xff] }
 0x5e0   : > { %3050 = vmatpush.msra.mxu3 %v3633_v34  ;;  %v3673_v34 = vld [vmem:[%s4726_s11 + $0xc8] sm:$0xff] }
 0x5e6   : > { %v2808_v39 = vpop.f32.mrf.mxu3 }
 0x5e7   : > { %v2818_v43 = vmax.f32 %v2755_v22, %v2808_v39  ;;  %v3651_v22 = vld [vmem:[%s4723_s0 + $0x100] sm:$0xff] }
 0x5e8   : > { %v3014_v39 = vld [vmem:[%s4723_s0 + $0x20] sm:$0xff] }
 0x5ee   : > { %v2811_v41 = vpop.f32.mrf.mxu3 }
 0x5ef   : > { %v2819_v42 = vmax.f32 %v2756_v30, %v2811_v41  ;;  %v3016_v30 = vld [vmem:[%s4723_s0 + $0x30] sm:$0xff]  ;;  %v3647_v41 = vld [vmem:[%s4723_s0 + $0xe0] sm:$0xff] }
 0x5f1   : > { %3619 = vmatpush.msk.msrb.mxu0 %vm2339_vm5, %v2819_v42  ;;  %3625 = vmatpush.msk.msra.mxu1 %vm2339_vm5, %v2819_v42 }
 0x5f3   : > { %2839 = vmatpush.msrb.mxu0 %v2818_v43  ;;  %2906 = vmatpush.msra.mxu1 %v2818_v43 }
 0x5f5   : > { %2840 = vmatpush.msrb.mxu0 %v2817_v44  ;;  %2907 = vmatpush.msra.mxu1 %v2817_v44 }
 0x5f7   : > { %2841 = vmatpush.msrb.mxu0 %v2816_v45  ;;  %2908 = vmatpush.msra.mxu1 %v2816_v45 }
 0x5f9   : > { %2842 = vmatpush.msrb.mxu0 %v2815_v46  ;;  %2909 = vmatpush.msra.mxu1 %v2815_v46 }
 0x5fb   : > { %2843 = vmatpush.msrb.mxu0 %v2814_v47  ;;  %2910 = vmatpush.msra.mxu1 %v2814_v47 }
 0x5fc   : > { %3626 = vmatmul.msk.f32.vlgmr.msra.gmra.mxu1 %vm2821_vm9, %v3624_v48  ;;  %3620 = vmatmul.msk.f32.vlgmr.msrb.gmra.mxu0 %vm2821_vm9, %v2820_v49  ;;  %v3645_v48 = vld [vmem:[%s4723_s0 + $0xd0] sm:$0xff]  ;;  %v3629_v49 = vld [vmem:[%s4723_s0 + $0x60] sm:$0xff] }
 0x5fd   : > { %3622 = vmatpush.msk.msra.mxu0 %vm2339_vm5, %v2819_v42  ;;  %3103 = vmatpush.msrb.mxu1 %v3654_v11  ;;  %v3632_v42 = vld [vmem:[%s4723_s0 + $0x78] sm:$0xff] }
 0x5fe   : > { %3051 = vmatpush.msra.mxu3 %v3632_v42  ;;  %v3683_v11 = vld [vmem:[%s4726_s11 + $0x118] sm:$0xff] }
 0x5ff   : > { %2870 = vmatpush.msra.mxu0 %v2818_v43  ;;  %3104 = vmatpush.msrb.mxu1 %v3653_v13  ;;  %v3631_v43 = vld [vmem:[%s4723_s0 + $0x70] sm:$0xff]  ;;  %v3681_v13 = vld [vmem:[%s4726_s11 + $0x108] sm:$0xff] }
 0x600   : > { %3052 = vmatpush.msra.mxu3 %v3631_v43 }
 0x601   : > { %2871 = vmatpush.msra.mxu0 %v2817_v44  ;;  %3105 = vmatpush.msrb.mxu1 %v3652_v14  ;;  %v3013_v44 = vld [vmem:[%s4723_s0 + $0x18] sm:$0xff] }
 0x602   : > { %v3665_v14 = vld [vmem:[%s4726_s11 + $0x98] sm:$0xff] }
 0x603   : > { %2872 = vmatpush.msra.mxu0 %v2816_v45  ;;  %3106 = vmatpush.msrb.mxu1 %v3651_v22  ;;  %v3646_v45 = vld [vmem:[%s4723_s0 + $0xd8] sm:$0xff]  ;;  %v3161_v22 = vld [vmem:[%s4726_s11 + $0x10] sm:$0xff] }
 0x605   : > { %2873 = vmatpush.msra.mxu0 %v2815_v46  ;;  %3107 = vmatpush.msrb.mxu1 %v3650_v27  ;;  %v3630_v46 = vld [vmem:[%s4723_s0 + $0x68] sm:$0xff] }
 0x606   : > { %3053 = vmatpush.msra.mxu3 %v3630_v46  ;;  %v3659_v27 = vld [vmem:[%s4726_s11 + $0x68] sm:$0xff] }
 0x607   : > { %2874 = vmatpush.msra.mxu0 %v2814_v47  ;;  %3108 = vmatpush.msrb.mxu1 %v3649_v29  ;;  %v3012_v47 = vld [vmem:[%s4723_s0 + $0x10] sm:$0xff] }
 0x608   : > { %3623 = vmatmul.msk.f32.vlgmr.msra.gmra.mxu0 %vm2821_vm9, %v3621_v37  ;;  %v3644_v37 = vld [vmem:[%s4723_s0 + $0xc8] sm:$0xff]  ;;  %3054 = vmatpush.msra.mxu3 %v3629_v49  ;;  %s4727_s0 = sld [smem:[#allocation23_spill]]  ;;  %v3674_v29 = vld [vmem:[%s4726_s11 + $0xd0] sm:$0xff] }
 0x609   : > { %3109 = vmatpush.msrb.mxu1 %v3648_v33  ;;  %v3159_v33 = vld [vmem:[%s4726_s11] sm:$0xff] }
 0x60b   : > { %3110 = vmatpush.msrb.mxu1 %v3647_v41  ;;  %v3158_v41 = vld [vmem:[#allocation10] sm:$0x1] }
 0x60d   : > { %3111 = vmatpush.msrb.mxu1 %v3646_v45 }
 0x60e   : > { %v3120_v6 = vld [vmem:[%s4727_s0] sm:$0x3]  ;;  %s4729_s0 = sld [smem:[#allocation22_spill]] }
 0x60f   : > { %3112 = vmatpush.msrb.mxu1 %v3645_v48 }
 0x611   : > { %3113 = vmatpush.msrb.mxu1 %v3644_v37 }
 0x613   : > { %3114 = vmatpush.msrb.mxu1 %v3643_v51 }
 0x614   : > { %v3751_v48 = vld [vmem:[%s4729_s0] ss:$0 sm:$0xff]  ;;  %v3752_v49 = vld [vmem:[%s4729_s0 + $0x1] ss:$0 sm:$0xff]  ;;  %s4731_s0 = sld [smem:[#allocation27_spill]] }
 0x679   : > { %v2912_v55 = vpop.f32.mrf.mxu1  ;;  %v2845_v57 = vpop.f32.mrf.mxu0 }
 0x67a   : > { %v2919_v56 = vmul.f32 %v3746_v53, %v2912_v55  ;;  %v2852_v58 = vmul.f32 %v3747_v54, %v2845_v57 }
 0x67c   : > { %2921 = vrot.lane.b32.xlu0 %v2919_v56, %s3796_s1  ;;  %2853 = vst.msk [vmem:[#allocation7] sm:$0xff] %vm2731_vm7, %v2852_v58  ;;  %s4725_s1 = sld [smem:[#allocation19_spill]] }
 0x682   : > { %v3749_v52 = vld [vmem:[%s4725_s1] ss:$0 sm:$0xff]  ;;  %v3750_v53 = vld [vmem:[%s4725_s1 + $0x1] ss:$0 sm:$0xff]  ;;  %s1021_s1 = scalar_lea.vmem %s3971_s4, %s4733_s10 }
 0x685   : > { %v2876_v59 = vpop.f32.mrf.mxu0 }
 0x686   : > { %v2883_v60 = vmul.f32 %v3748_v25, %v2876_v59 }
 0x688   : > { %2885 = vrot.lane.b32.xlu2 %v2883_v60, %s3797_s2  ;;  %s3472_s2 = sshll.u32 %s4733_s10, 3  ;;  %v3669_v60 = vld [vmem:[%s4726_s11 + $0xb8] sm:$0xff] }
 0x689   : > { %s1018_s3 = scalar_lea.vmem %s3966_s27, %s3472_s2  ;;  %3192 = vmatpush.msrb.mxu3 %v3669_v60  ;;  %v3324_v60 = vld [vmem:[%s3956_s12 + $0x50] sm:$0xff]  ;;  %s4730_s2 = sld [smem:[#allocation25_spill]] }
 0x68b   : > { %3193 = vmatpush.msrb.mxu3 %v3668_v63  ;;  %v3323_v63 = vld [vmem:[%s3956_s12 + $0x48] sm:$0xff] }
 0x68d   : > { %3194 = vmatpush.msrb.mxu3 %v3667_v0  ;;  %v3322_v0 = vld [vmem:[%s3956_s12 + $0x40] sm:$0xff] }
 0x68f   : > { %3195 = vmatpush.msrb.mxu3 %v3666_v1  ;;  %v3321_v1 = vld [vmem:[%s3956_s12 + $0x38] sm:$0xff] }
 0x691   : > { %3196 = vmatpush.msrb.mxu3 %v3665_v14  ;;  %v3316_v14 = vld [vmem:[%s3956_s12 + $0x10] sm:$0xff] }
 0x693   : > { %3197 = vmatpush.msrb.mxu3 %v3664_v16  ;;  %v3309_v16 = vld [vmem:[%s4731_s0] sm:$0x1] }
 0x6e2   : > { %v2886_v7 = vpop.permute.xlu2 %2885 }
 0x6e3   : > { %2889 = vst.msk [vmem:[#allocation7] sm:$0xff] %vm2888_vm12, %v2886_v7  ;;  %v3170_v7 = vld [vmem:[%s4726_s11 + $0x58] sm:$0xff] }
 0x6ee   : > { %v2922_v15 = vpop.permute.xlu0 %2921 }
 0x6ef   : > { %2925 = vst.msk [vmem:[#allocation7] sm:$0xff] %vm2924_vm13, %v2922_v15  ;;  %v3679_v15 = vld [vmem:[%s4726_s11 + $0xf8] sm:$0xff] }
 0x6f6   : > { %v2926_v36 = vld [vmem:[#allocation7] sm:$0xff] }
 0x6f7   : > { %3627 = vmatmul.msk.f32.vlgmr.msra.gmra.mxu2 %vm2939_vm10, %v2926_v36  ;;  %2974 = vst.msk [vmem:[#allocation8 + $0x1] sm:$0xff] %vm2939_vm10, %v2926_v36  ;;  %v3165_v36 = vld [vmem:[%s4726_s11 + $0x30] sm:$0xff] }
 0x6fe   : > { %v2975_v35 = vld [vmem:[#allocation8] sm:$0xff] }
 0x6ff   : > { %v2976_v17 = vld [vmem:[#allocation8 + $0x1] sm:$0xff] }
 0x700   : > { %v2977_v18 = vmax.f32 %v2975_v35, %v2976_v17  ;;  %v2978_v40 = vld [vmem:[#allocation8 + $0x2] sm:$0xff]  ;;  %v3678_v35 = vld [vmem:[%s4726_s11 + $0xf0] sm:$0xff]  ;;  %v3663_v17 = vld [vmem:[%s4726_s11 + $0x88] sm:$0xff] }
 0x701   : > { %3198 = vmatpush.msrb.mxu3 %v3663_v17 }
 0x702   : > { %v2979_v38 = vmax.f32 %v2977_v18, %v2978_v40  ;;  %v3164_v18 = vld [vmem:[%s4726_s11 + $0x28] sm:$0xff] }
 0x703   : > { %v3677_v40 = vld [vmem:[%s4726_s11 + $0xe8] sm:$0xff] }
 0x704   : > { %3000 = vmatpush.msrb.mxu0 %v2979_v38  ;;  %v3662_v38 = vld [vmem:[%s4726_s11 + $0x80] sm:$0xff] }
 0x705   : > { %3628 = vmatmul.msk.f32.vlgmr.msrb.gmra.mxu0 %vm2981_vm14, %v2980_v19  ;;  %v3163_v19 = vld [vmem:[%s4726_s11 + $0x20] sm:$0xff]  ;;  %3199 = vmatpush.msrb.mxu3 %v3662_v38 }
 0x706   : > { %3066 = vmatpush.msra.mxu0 %v3021_v61  ;;  %v3676_v61 = vld [vmem:[%s4726_s11 + $0xe0] sm:$0xff] }
 0x707   : > { %v3349_v38 = vld [vmem:[%s3961_s20] sm:$0x1] }
 0x708   : > { %3067 = vmatpush.msra.mxu0 %v3020_v20  ;;  %v3661_v20 = vld [vmem:[%s4726_s11 + $0x78] sm:$0xff] }
 0x709   : > { %3200 = vmatpush.msrb.mxu3 %v3661_v20 }
 0x70a   : > { %3068 = vmatpush.msra.mxu0 %v3019_v21  ;;  %v3162_v21 = vld [vmem:[%s4726_s11 + $0x18] sm:$0xff] }
 0x70c   : > { %3069 = vmatpush.msra.mxu0 %v3018_v62  ;;  %v3660_v62 = vld [vmem:[%s4726_s11 + $0x70] sm:$0xff] }
 0x70d   : > { %3201 = vmatpush.msrb.mxu3 %v3660_v62 }
 0x70e   : > { %3070 = vmatpush.msra.mxu0 %v3017_v26  ;;  %v3675_v26 = vld [vmem:[%s4726_s11 + $0xd8] sm:$0xff] }
 0x70f   : > { %3202 = vmatpush.msrb.mxu3 %v3659_v27 }
 0x710   : > { %3071 = vmatpush.msra.mxu0 %v3016_v30  ;;  %v3160_v30 = vld [vmem:[%s4726_s11 + $0x8] sm:$0xff] }
 0x712   : > { %3072 = vmatpush.msra.mxu0 %v3015_v32  ;;  %v3658_v32 = vld [vmem:[%s4726_s11 + $0x60] sm:$0xff] }
 0x713   : > { %3203 = vmatpush.msrb.mxu3 %v3658_v32 }
 0x714   : > { %3073 = vmatpush.msra.mxu0 %v3014_v39  ;;  %v3672_v39 = vld [vmem:[%s4726_s11 + $0xc0] sm:$0xff] }
 0x716   : > { %3074 = vmatpush.msra.mxu0 %v3013_v44 }
 0x718   : > { %3075 = vmatpush.msra.mxu0 %v3012_v47 }
 0x71a   : > { %3076 = vmatpush.msra.mxu0 %v3011_v24 }
 0x71c   : > { %3077 = vmatpush.msra.mxu0 %v3010_v50 }
 0x71e   : > { %3252 = vmatpush.msrb.mxu0 %v3683_v11 }
 0x720   : > { %3253 = vmatpush.msrb.mxu0 %v3682_v12 }
 0x722   : > { %3254 = vmatpush.msrb.mxu0 %v3681_v13 }
 0x724   : > { %3255 = vmatpush.msrb.mxu0 %v3680_v23  ;;  %v3317_v23 = vld [vmem:[%s3956_s12 + $0x18] sm:$0xff] }
 0x726   : > { %3256 = vmatpush.msrb.mxu0 %v3679_v15  ;;  %v3314_v15 = vld [vmem:[%s3956_s12] sm:$0xff] }
 0x728   : > { %3257 = vmatpush.msrb.mxu0 %v3678_v35  ;;  %v3311_v35 = vld [vmem:[%s4731_s0 + $0x1] sm:$0x1] }
 0x72a   : > { %3258 = vmatpush.msrb.mxu0 %v3677_v40 }
 0x72c   : > { %3259 = vmatpush.msrb.mxu0 %v3676_v61  ;;  %v3351_v61 = vld [vmem:[%s3961_s20 + $0x1] sm:$0x1] }
 0x72e   : > { %3260 = vmatpush.msrb.mxu0 %v3675_v26 }
 0x730   : > { %3261 = vmatpush.msrb.mxu0 %v3674_v29 }
 0x732   : > { %3262 = vmatpush.msrb.mxu0 %v3673_v34 }
 0x734   : > { %3263 = vmatpush.msrb.mxu0 %v3672_v39 }
 0x77a   : > { %v2960_v54 = vpop.f32.mrf.mxu2 }
 0x77b   : > { %v2965_v55 = vmul.f32 %v3749_v52, %v2960_v54 }
 0x77d   : > { %v2968_v56 = vadd.f32 %v3750_v53, %v2965_v55 }
 0x77f   : > { %2970 = vst.msk [vmem:[%s1018_s3] sm:$0xff] %vm2969_vm1, %v2968_v56  ;;  %s4728_s3 = sld [smem:[#allocation26_spill]] }
 0x782   : > { %v3002_v57 = vpop.f32.mrf.mxu0 }
 0x783   : > { %3008 = vst.msk [vmem:[#allocation9 + $0x1] sm:$0xf] %vm3007_vm0, %v3002_v57 }
 0x785   : > { %v3285_v42 = vld [vmem:[%s4728_s3 + $0x58] sm:$0xff]  ;;  %v3284_v43 = vld [vmem:[%s4728_s3 + $0x50] sm:$0xff]  ;;  %v3283_v44 = vld [vmem:[%s4728_s3 + $0x48] sm:$0xff] }
 0x786   : > { %3293 = vmatpush.msra.mxu1 %v3285_v42  ;;  %v3282_v45 = vld [vmem:[%s4728_s3 + $0x40] sm:$0xff]  ;;  %v3281_v46 = vld [vmem:[%s4728_s3 + $0x38] sm:$0xff]  ;;  %v3280_v47 = vld [vmem:[%s4728_s3 + $0x30] sm:$0xff] }
 0x787   : > { %v3279_v54 = vld [vmem:[%s4728_s3 + $0x28] sm:$0xff]  ;;  %v3278_v55 = vld [vmem:[%s4728_s3 + $0x20] sm:$0xff]  ;;  %v3277_v56 = vld [vmem:[%s4728_s3 + $0x18] sm:$0xff] }
 0x788   : > { %3294 = vmatpush.msra.mxu1 %v3284_v43  ;;  %v3276_v57 = vld [vmem:[%s4728_s3 + $0x10] sm:$0xff] }
 0x78a   : > { %v3022_v58 = vld [vmem:[#allocation9 + $0x1] sm:$0xf]  ;;  %3295 = vmatpush.msra.mxu1 %v3283_v44 }
 0x78b   : > { %v3009_v25 = vld [vmem:[#allocation9] sm:$0xf]  ;;  %3641 = vmatmul.msk.f32.vlgmr.msra.gmra.mxu3 %vm2939_vm10, %v3022_v58 }
 0x78c   : > { %v3082_v59 = vld [vmem:[#allocation9 + $0x2] sm:$0xf]  ;;  %3642 = vmatmul.msk.f32.vlgmr.msra.gmra.mxu0 %vm2939_vm10, %v3009_v25  ;;  %3296 = vmatpush.msra.mxu1 %v3282_v45  ;;  %v3274_v25 = vld [vmem:[%s4728_s3] sm:$0xff] }
 0x78d   : > { %3655 = vmatmul.msk.f32.vlgmr.msrb.gmra.mxu1 %vm2939_vm10, %v3082_v59  ;;  %v3275_v58 = vld [vmem:[%s4728_s3 + $0x8] sm:$0xff]  ;;  %v3325_v59 = vld [vmem:[%s3956_s12 + $0x58] sm:$0xff] }
 0x78e   : > { %3297 = vmatpush.msra.mxu1 %v3281_v46  ;;  %3333 = vmatpush.msra.mxu3 %v3325_v59 }
 0x790   : > { %3298 = vmatpush.msra.mxu1 %v3280_v47  ;;  %3334 = vmatpush.msra.mxu3 %v3324_v60 }
 0x792   : > { %3299 = vmatpush.msra.mxu1 %v3279_v54  ;;  %3335 = vmatpush.msra.mxu3 %v3323_v63 }
 0x794   : > { %3300 = vmatpush.msra.mxu1 %v3278_v55  ;;  %3336 = vmatpush.msra.mxu3 %v3322_v0 }
 0x796   : > { %3301 = vmatpush.msra.mxu1 %v3277_v56  ;;  %3337 = vmatpush.msra.mxu3 %v3321_v1 }
 0x798   : > { %3302 = vmatpush.msra.mxu1 %v3276_v57 }
 0x79a   : > { %3303 = vmatpush.msra.mxu1 %v3275_v58 }
 0x79c   : > { %3304 = vmatpush.msra.mxu1 %v3274_v25 }
 0x809   : > { %v3079_v3 = vpop.f32.mrf.mxu0 }
 0x80a   : > { %v3116_v28 = vpop.f32.mrf.mxu1 }
 0x80e   : > { %v3056_v2 = vpop.f32.mrf.mxu3 }
 0x80f   : > { %v3080_v4 = vadd.f32 %v3079_v3, %v3056_v2  ;;  %v3320_v2 = vld [vmem:[%s3956_s12 + $0x30] sm:$0xff]  ;;  %v3319_v3 = vld [vmem:[%s3956_s12 + $0x28] sm:$0xff] }
 0x810   : > { %3338 = vmatpush.msra.mxu3 %v3320_v2 }
 0x811   : > { %v3119_v5 = vadd.f32 %v3116_v28, %v3080_v4  ;;  %v3318_v4 = vld [vmem:[%s3956_s12 + $0x20] sm:$0xff] }
 0x812   : > { %3339 = vmatpush.msra.mxu3 %v3319_v3 }
 0x813   : > { %3656 = vmatpush.msk.msrb.mxu2 %vm3125_vm2, %v3119_v5 }
 0x814   : > { %3657 = vmatmul.msk.f32.vlgmr.msrb.gmra.mxu2 %vm3121_vm3, %v3120_v6  ;;  %3340 = vmatpush.msra.mxu3 %v3318_v4 }
 0x815   : > { %3215 = vmatpush.msra.mxu2 %v3170_v7 }
 0x816   : > { %3341 = vmatpush.msra.mxu3 %v3317_v23 }
 0x817   : > { %3216 = vmatpush.msra.mxu2 %v3169_v8  ;;  %v3269_v8 = vld [vmem:[%s4730_s2] sm:$0x1] }
 0x818   : > { %3342 = vmatpush.msra.mxu3 %v3316_v14 }
 0x819   : > { %3217 = vmatpush.msra.mxu2 %v3168_v9 }
 0x81b   : > { %3218 = vmatpush.msra.mxu2 %v3167_v10  ;;  %v3271_v10 = vld [vmem:[%s4730_s2 + $0x1] sm:$0x1] }
 0x81d   : > { %3219 = vmatpush.msra.mxu2 %v3166_v31  ;;  %v3315_v31 = vld [vmem:[%s3956_s12 + $0x8] sm:$0xff] }
 0x81e   : > { %3343 = vmatpush.msra.mxu3 %v3315_v31 }
 0x81f   : > { %3220 = vmatpush.msra.mxu2 %v3165_v36 }
 0x820   : > { %3344 = vmatpush.msra.mxu3 %v3314_v15 }
 0x821   : > { %3221 = vmatpush.msra.mxu2 %v3164_v18 }
 0x823   : > { %3222 = vmatpush.msra.mxu2 %v3163_v19 }
 0x825   : > { %3223 = vmatpush.msra.mxu2 %v3162_v21 }
 0x827   : > { %3224 = vmatpush.msra.mxu2 %v3161_v22 }
 0x829   : > { %3225 = vmatpush.msra.mxu2 %v3160_v30 }
 0x82b   : > { %3226 = vmatpush.msra.mxu2 %v3159_v33 }
 0x82c   : > { %3671 = vmatmul.msk.f32.vlgmr.msra.gmra.mxu2 %vm2939_vm10, %v3158_v41 }
 0x897   : > { %v3146_v24 = vpop.f32.mrf.mxu2 }
 0x898   : > { %v3151_v37 = vmul.f32 %v3751_v48, %v3146_v24 }
 0x89a   : > { %v3154_v50 = vadd.f32 %v3752_v49, %v3151_v37 }
 0x89c   : > { %v3155_v51 = vmax.f32 %v3154_v50, 0.0 }
 0x89e   : > { %3157 = vst.msk [vmem:[#allocation10 + $0x1] sm:$0x3] %vm2972_vm11, %v3155_v51 }
 0x8a5   : > { %v3171_v52 = vld [vmem:[#allocation10 + $0x1] sm:$0x1]  ;;  %v3231_v53 = vld [vmem:[#allocation10 + $0x2] sm:$0x1] }
 0x8a6   : > { %3670 = vmatmul.msk.f32.vlgmr.msrb.gmra.mxu3 %vm2939_vm10, %v3171_v52  ;;  %3684 = vmatmul.msk.f32.vlgmr.msrb.gmra.mxu0 %vm2939_vm10, %v3231_v53 }
 0x8af   : > { %v3228_v28 = vpop.f32.mrf.mxu2 }
 0x923   : > { %v3265_v7 = vpop.f32.mrf.mxu0 }
 0x929   : > { %v3205_v5 = vpop.f32.mrf.mxu3 }
 0x92a   : > { %v3229_v6 = vadd.f32 %v3228_v28, %v3205_v5 }
 0x92c   : > { %v3268_v9 = vadd.f32 %v3265_v7, %v3229_v6 }
 0x92e   : > { %v3270_v11 = vmul.f32 %v3269_v8, %v3268_v9 }
 0x930   : > { %v3272_v12 = vadd.f32 %v3271_v10, %v3270_v11 }
 0x932   : > { %v3273_v13 = vmax.f32 %v3272_v12, 0.0 }
 0x934   : > { %3685 = vmatmul.msk.f32.vlgmr.msra.gmra.mxu1 %vm2939_vm10, %v3273_v13 }
 0x9b1   : > { %v3306_v36 = vpop.f32.mrf.mxu1 }
 0x9b2   : > { %v3310_v17 = vmul.f32 %v3309_v16, %v3306_v36 }
 0x9b4   : > { %v3312_v18 = vadd.f32 %v3311_v35, %v3310_v17 }
 0x9b6   : > { %v3313_v40 = vmax.f32 %v3312_v18, 0.0 }
 0x9b8   : > { %3686 = vmatmul.msk.f32.vlgmr.msra.gmra.mxu3 %vm2939_vm10, %v3313_v40 }
 0xa3b   : > { %v3346_v19 = vpop.f32.mrf.mxu3 }
 0xa3c   : > { %v3350_v20 = vmul.f32 %v3349_v38, %v3346_v19 }
 0xa3e   : > { %v3352_v21 = vadd.f32 %v3351_v61, %v3350_v20 }
 0xa40   : > { %3354 = vst.msk [vmem:[%s1021_s1] sm:$0x1] %vm3353_vm4, %v3352_v21 }
 0xa41 PF: > { %s78_s7 = sadd.s32 1, %s3759_s7  }
 0xa42   : > { %p75_p4 = scmp.ge.s32.totalorder %s78_s7, 4  }
 0xa44   :  { %77 = sbr.rel (!%p75_p4) target bundleno = 60 (0x3c), region = 233 }

</bundles_post_ra>
